<compile_context>
chip_gen: v5e
topology: v5e:2x2
jax: 0.10.0
libtpu: 0.0.40
codegen_flags: <defaults>
</compile_context>

<pallas_src>
import functools

import jax
import jax.numpy as jnp
from jax import lax
from jax.experimental import pallas as pl
from jax.experimental.pallas import tpu as pltpu

K = 3  # Chebyshev polynomial degree (kernel_size)


# ----------------------------------------------------------------------------
# In-kernel building blocks (traced inside the single fused Pallas kernel)
# ----------------------------------------------------------------------------
def _cheb_fused(x2d, lap_t, w_fused):
    """Chebyshev graph conv with the K weight matmuls fused into one.

    x2d:     (R, V)        f32  activations (batch folded into rows, V on lanes)
    lap_t:   (V, V)        bf16 transposed rescaled Laplacian
    w_fused: (Rout, K*R)   bf16 block-diag-over-batch weights, K-blocks on columns
    returns  (Rout, V)     f32
    """
    kk = w_fused.shape[1] // x2d.shape[0]
    xb = x2d.astype(jnp.bfloat16)
    bases = [xb]                               # each base cast to bf16 exactly once
    if kk > 1:
        x_km2 = x2d                            # recurrence "k-2" state kept in f32
        x_km1 = jnp.dot(xb, lap_t, preferred_element_type=jnp.float32)     # T1 x
        bases.append(x_km1.astype(jnp.bfloat16))
        for _ in range(2, kk):                 # static unroll (K=3 -> one iteration)
            x_k = (2.0 * jnp.dot(bases[-1], lap_t,
                                 preferred_element_type=jnp.float32) - x_km2)
            x_km2, x_km1 = x_km1, x_k
            bases.append(x_k.astype(jnp.bfloat16))
    t_stack = jnp.concatenate(bases, axis=0) if kk > 1 else bases[0]  # (K*R, V) bf16
    return jnp.dot(w_fused, t_stack, preferred_element_type=jnp.float32)


def _bcast_rows(p, batch):
    """(C, 1) -> (batch*C, 1) by repeating along a new leading batch axis."""
    c = p.shape[0]
    return jnp.broadcast_to(p[None, :, :], (batch, c, 1)).reshape(batch * c, 1)


def _bias_bn_relu(y, vec_ref, offs, c, batch, eps):
    """Bias + training-mode BatchNorm (per-channel stats over batch & vertices) + ReLU.

    y: (batch*c, V) f32.  vec_ref holds bias/gamma/beta as (c, 1) slices at
    static 8-aligned offsets.
    """
    v = y.shape[1]
    ob, og, ot = offs
    bias = vec_ref[ob:ob + c, :]                    # (c, 1)
    gamma = vec_ref[og:og + c, :]
    beta = vec_ref[ot:ot + c, :]

    y = y + _bcast_rows(bias, batch)
    s = jnp.sum(y, axis=-1, keepdims=True).reshape(batch, c, 1)       # (B, c, 1)
    s2 = jnp.sum(y * y, axis=-1, keepdims=True).reshape(batch, c, 1)
    cs, cs2 = s[0], s2[0]
    for b in range(1, batch):        # tiny static loop; leading-dim indexing only
        cs, cs2 = cs + s[b], cs2 + s2[b]
    n = float(batch * v)
    mean = cs / n                                                      # (c, 1)
    var = jnp.maximum(cs2 / n - mean * mean, 0.0)   # guard E[x^2]-E[x]^2 cancellation
    scale = gamma * lax.rsqrt(var + eps)
    shift = beta - mean * scale
    return jnp.maximum(y * _bcast_rows(scale, batch) + _bcast_rows(shift, batch), 0.0)


def _maxpool4(y, sel_ref):
    """HEALPix-style pool: max over consecutive groups of 4 vertices (lane axis).

    Four bf16 0/1 selection matmuls (matrices precomputed on the host).
    """
    yb = y.astype(jnp.bfloat16)
    out = jnp.dot(yb, sel_ref[0], preferred_element_type=jnp.float32)
    for j in range(1, 4):
        out = jnp.maximum(out, jnp.dot(yb, sel_ref[j],
                                       preferred_element_type=jnp.float32))
    return out


def _upsample4(y, up):
    """Nearest-neighbour x4 upsample along vertices via one bf16 0/1 matmul."""
    return jnp.dot(y.astype(jnp.bfloat16), up, preferred_element_type=jnp.float32)


# ----------------------------------------------------------------------------
# The single fused U-Net kernel
# ----------------------------------------------------------------------------
def _unet_kernel(x_ref, l2_ref, l1_ref, l0_ref,
                 we2_ref, we1_ref, we0_ref, wd1_ref, wdf_ref,
                 vec_ref, sel2_ref, sel1_ref, up1_ref, up2_ref,
                 o_ref, *, batch, eps, offs, widths):
    c1, c2, c3, cout = widths
    lap2 = l2_ref[...]                      # (V, V)       bf16, pre-transposed
    lap1 = l1_ref[...]                      # (V/4, V/4)   bf16
    lap0 = l0_ref[...]                      # (V/16, V/16) bf16

    # ---- Encoder ----
    y = _cheb_fused(x_ref[...], lap2, we2_ref[...])
    e2 = _bias_bn_relu(y, vec_ref, offs["enc_l2"], c1, batch, eps)     # (B*c1, V)  skip
    p = _maxpool4(e2, sel2_ref)                                        # (B*c1, V/4)

    y = _cheb_fused(p, lap1, we1_ref[...])
    e1 = _bias_bn_relu(y, vec_ref, offs["enc_l1"], c2, batch, eps)     # (B*c2, V/4) skip
    p = _maxpool4(e1, sel1_ref)                                        # (B*c2, V/16)

    y = _cheb_fused(p, lap0, we0_ref[...])
    e0 = _bias_bn_relu(y, vec_ref, offs["enc_l0"], c3, batch, eps)     # (B*c3, V/16)

    # ---- Decoder (skip-concat along rows: cheap sublane concat, one conv each) ----
    u = _upsample4(e0, up1_ref[...])                                   # (B*c3, V/4)
    y = _cheb_fused(jnp.concatenate([u, e1], axis=0), lap1, wd1_ref[...])
    d1 = _bias_bn_relu(y, vec_ref, offs["dec_l1"], c2, batch, eps)     # (B*c2, V/4)

    u = _upsample4(d1, up2_ref[...])                                   # (B*c2, V)
    y = _cheb_fused(jnp.concatenate([u, e2], axis=0), lap2, wdf_ref[...])
    ob, nb = offs["dec_fin"]
    o_ref[...] = y + vec_ref[ob:ob + nb, :]                 # final conv bias, no BN/ReLU


# ----------------------------------------------------------------------------
# Host-side parameter preparation (layout plumbing, pure XLA, tiny tensors)
# ----------------------------------------------------------------------------
def _block_diag(wt, batch):
    """(Fout, Fin) -> (batch*Fout, batch*Fin) block-diagonal over batch."""
    fout, fin = wt.shape
    eye = jnp.eye(batch, dtype=wt.dtype)
    return jnp.einsum("bc,of->bocf", eye, wt).reshape(batch * fout, batch * fin)


def _fused_weight(w, batch, split=None):
    """(K, Fin, Fout) -> (batch*Fout, K*batch*Fin) bf16 fused Chebyshev weights.

    Column order matches the kernel's stacked bases [T0; T1; ...] row order.
    `split=ca` handles a decoder conv whose input rows are the concat
    [upsampled (ca channels, batch-major), skip (Fin-ca channels, batch-major)].
    """
    blocks = []
    for k in range(w.shape[0]):
        wt = jnp.transpose(w[k])                             # (Fout, Fin)
        if split is None:
            blocks.append(_block_diag(wt, batch))
        else:
            blocks.append(jnp.concatenate(
                [_block_diag(wt[:, :split], batch),
                 _block_diag(wt[:, split:], batch)], axis=1))
    return jnp.concatenate(blocks, axis=1).astype(jnp.bfloat16)


def _pool_sel(v):
    """(4, V, V/4) bf16 selection matrices: sel[j][4u+j, u] = 1."""
    vc = v // 4
    rows = jnp.arange(v)[:, None]
    cols = jnp.arange(vc)[None, :]
    return jnp.stack([rows == 4 * cols + j for j in range(4)], 0).astype(jnp.bfloat16)


def _upsample_mat(vc):
    """(V/4, V) bf16 nearest-neighbour broadcast matrix: U[u, 4u+j] = 1."""
    v = 4 * vc
    rows = jnp.arange(vc)[:, None]
    cols = jnp.arange(v)[None, :]
    return ((cols >= 4 * rows) & (cols < 4 * rows + 4)).astype(jnp.bfloat16)


def _pack_vectors(named):
    """Pack small per-channel vectors into one (N, 1) f32 operand (8-row aligned)."""
    offs, chunks, pos = {}, [], 0
    for name, a in named:
        a = a.reshape(-1)
        pad = (-a.shape[0]) % 8
        offs[name] = pos
        pos += a.shape[0] + pad
        chunks.append(jnp.pad(a, (0, pad)) if pad else a)
    return jnp.concatenate(chunks).reshape(-1, 1), offs


def spherical_unet_forward(params, laps, x):
    """x: (B, V, in_ch); laps = [lap(V/16), lap(V/4), lap(V)] (coarsest first)."""
    B, V, cin = x.shape
    lap0, lap1, lap2 = laps

    w_e2, b_e2, g_e2, t_e2 = params["enc_l2"]
    w_e1, b_e1, g_e1, t_e1 = params["enc_l1"]
    w_e0, b_e0, g_e0, t_e0 = params["enc_l0"]
    w_d1, b_d1, g_d1, t_d1 = params["dec_l1"]
    w_df, b_df = params["dec_fin"]
    c1, c2, c3, cout = w_e2.shape[2], w_e1.shape[2], w_e0.shape[2], w_df.shape[2]

    # Kernel layout: channels-major rows, vertex dim (lane-dense at top level) on lanes.
    x2d = jnp.transpose(x, (0, 2, 1)).reshape(B * cin, V)
    l2 = jnp.transpose(lap2).astype(jnp.bfloat16)
    l1 = jnp.transpose(lap1).astype(jnp.bfloat16)
    l0 = jnp.transpose(lap0).astype(jnp.bfloat16)

    # NOTE: block-diag batching wastes MXU columns ~B^2; fine at B=2 (K*B*Fin <= 288).
    we2 = _fused_weight(w_e2, B)
    we1 = _fused_weight(w_e1, B)
    we0 = _fused_weight(w_e0, B)
    wd1 = _fused_weight(w_d1, B, split=c3)   # decoder in rows = [up(c3), skip(c2)]
    wdf = _fused_weight(w_df, B, split=c2)   # final   in rows = [up(c2), skip(c1)]

    vec, voffs = _pack_vectors([
        ("e2b", b_e2), ("e2g", g_e2), ("e2t", t_e2),
        ("e1b", b_e1), ("e1g", g_e1), ("e1t", t_e1),
        ("e0b", b_e0), ("e0g", g_e0), ("e0t", t_e0),
        ("d1b", b_d1), ("d1g", g_d1), ("d1t", t_d1),
        ("dfb", jnp.tile(b_df, (B,))),       # final bias pre-tiled to (B*cout,)
    ])
    offs = {
        "enc_l2": (voffs["e2b"], voffs["e2g"], voffs["e2t"]),
        "enc_l1": (voffs["e1b"], voffs["e1g"], voffs["e1t"]),
        "enc_l0": (voffs["e0b"], voffs["e0g"], voffs["e0t"]),
        "dec_l1": (voffs["d1b"], voffs["d1g"], voffs["d1t"]),
        "dec_fin": (voffs["dfb"], B * cout),
    }

    sel2, sel1 = _pool_sel(V), _pool_sel(V // 4)
    up1, up2 = _upsample_mat(V // 16), _upsample_mat(V // 4)

    operands = (x2d, l2, l1, l0, we2, we1, we0, wd1, wdf, vec, sel2, sel1, up1, up2)

    out2d = pl.pallas_call(
        functools.partial(_unet_kernel, batch=B, eps=1e-5, offs=offs,
                          widths=(c1, c2, c3, cout)),
        out_shape=jax.ShapeDtypeStruct((B * cout, V), jnp.float32),
        in_specs=[pl.BlockSpec(memory_space=pltpu.MemorySpace.VMEM)] * len(operands),
        out_specs=pl.BlockSpec(memory_space=pltpu.MemorySpace.VMEM),
    )(*operands)

    return jnp.transpose(out2d.reshape(B, cout, V), (0, 2, 1))   # back to (B, V, out_ch)


# ----------------------------------------------------------------------------
# Model parameters + synthetic graph Laplacians
# ----------------------------------------------------------------------------
def _ring_laplacian(V):
    """Symmetric-normalized ring-graph Laplacian rescaled to eigenvalues in [-1, 1]."""
    idx = jnp.arange(V)
    A = jnp.zeros((V, V), jnp.float32)
    A = A.at[idx, (idx + 1) % V].set(1.0)
    A = A.at[idx, (idx - 1) % V].set(1.0)
    dinv = 1.0 / jnp.sqrt(A.sum(axis=1))
    L = jnp.eye(V, dtype=jnp.float32) - dinv[:, None] * A * dinv[None, :]
    return L - jnp.eye(V, dtype=jnp.float32)  # 2 L / lmax - I  with lmax = 2


def _cheb_params(key, fin, fout):
    std = (2.0 / (fin * K)) ** 0.5  # matches deepsphere ChebConv kaiming init
    w = std * jax.random.normal(key, (K, fin, fout), jnp.float32)
    b = jnp.full((fout,), 0.01, jnp.float32)
    return w, b


def _bn_params(c):
    return jnp.ones((c,), jnp.float32), jnp.zeros((c,), jnp.float32)


def init_params(key, in_ch=4, out_ch=4, widths=(8, 16, 32)):
    c1, c2, c3 = widths
    ks = jax.random.split(key, 5)
    return {
        "enc_l2": _cheb_params(ks[0], in_ch, c1) + _bn_params(c1),
        "enc_l1": _cheb_params(ks[1], c1, c2) + _bn_params(c2),
        "enc_l0": _cheb_params(ks[2], c2, c3) + _bn_params(c3),
        "dec_l1": _cheb_params(ks[3], c3 + c2, c2) + _bn_params(c2),
        "dec_fin": _cheb_params(ks[4], c2 + c1, out_ch),
    }


# ----------------------------------------------------------------------------
# Pure-JAX reference (original (B, V, F) layout, full f32) for a sanity check
# ----------------------------------------------------------------------------
def _reference_forward(params, laps, x):
    lap0, lap1, lap2 = laps

    def cheb(xx, lap, w, b):
        xs = [xx]
        if w.shape[0] > 1:
            xs.append(jnp.einsum("vu,buf->bvf", lap, xx))
            for _ in range(2, w.shape[0]):
                xs.append(2.0 * jnp.einsum("vu,buf->bvf", lap, xs[-1]) - xs[-2])
        out = sum(jnp.einsum("bvf,fo->bvo", xk, w[k]) for k, xk in enumerate(xs))
        return out + b

    def bn_relu(xx, g, t, eps=1e-5):
        mean = xx.mean(axis=(0, 1), keepdims=True)
        var = ((xx - mean) ** 2).mean(axis=(0, 1), keepdims=True)
        return jnp.maximum((xx - mean) * lax.rsqrt(var + eps) * g + t, 0.0)

    def pool(xx):
        bb, vv, ff = xx.shape
        return xx.reshape(bb, vv // 4, 4, ff).max(axis=2)

    def up(xx):
        return jnp.repeat(xx, 4, axis=1)

    w, b, g, t = params["enc_l2"]; e2 = bn_relu(cheb(x, lap2, w, b), g, t)
    w, b, g, t = params["enc_l1"]; e1 = bn_relu(cheb(pool(e2), lap1, w, b), g, t)
    w, b, g, t = params["enc_l0"]; e0 = bn_relu(cheb(pool(e1), lap0, w, b), g, t)
    w, b, g, t = params["dec_l1"]
    d1 = bn_relu(cheb(jnp.concatenate([up(e0), e1], axis=2), lap1, w, b), g, t)
    w, b = params["dec_fin"]
    return cheb(jnp.concatenate([up(d1), e2], axis=2), lap2, w, b)


# ----------------------------------------------------------------------------
if __name__ == "__main__":
    B, V, IN_CH, OUT_CH = 2, 256, 4, 4        # depth=3 => vertex counts 256, 64, 16

    key = jax.random.PRNGKey(0)
    k_x, k_p = jax.random.split(key)
    x = jax.random.normal(k_x, (B, V, IN_CH), jnp.float32)

    laps = [_ring_laplacian(V // 16), _ring_laplacian(V // 4), _ring_laplacian(V)]
    params = init_params(k_p, in_ch=IN_CH, out_ch=OUT_CH)

    fwd = jax.jit(spherical_unet_forward)
    out = fwd(params, laps, x)
    jax.block_until_ready(out)

    assert out.shape == (B, V, OUT_CH), out.shape
    assert out.dtype == jnp.float32
    assert bool(jnp.all(jnp.isfinite(out)))

    # Sanity check against a full-f32 pure-JAX reference (bf16 MXU operands in the
    # kernel => small numerical differences; generous tolerance).
    ref = _reference_forward(params, laps, x)
    num = float(jnp.sqrt(jnp.mean((out - ref) ** 2)))
    den = float(jnp.sqrt(jnp.mean(ref ** 2))) + 1e-6
    assert num / den < 0.1, (num, den)

    print("KERNEL_OK")
</pallas_src>

<mosaic_0001>
module attributes {stable_mosaic.version = 11 : i64} {
  func.func @_unet_kernel(%arg0: memref<8x256xf32, #tpu.memory_space<vmem>>, %arg1: memref<256x256xbf16, #tpu.memory_space<vmem>>, %arg2: memref<64x64xbf16, #tpu.memory_space<vmem>>, %arg3: memref<16x16xbf16, #tpu.memory_space<vmem>>, %arg4: memref<16x24xbf16, #tpu.memory_space<vmem>>, %arg5: memref<32x48xbf16, #tpu.memory_space<vmem>>, %arg6: memref<64x96xbf16, #tpu.memory_space<vmem>>, %arg7: memref<32x288xbf16, #tpu.memory_space<vmem>>, %arg8: memref<8x144xbf16, #tpu.memory_space<vmem>>, %arg9: memref<224x1xf32, #tpu.memory_space<vmem>>, %arg10: memref<4x256x64xbf16, #tpu.memory_space<vmem>>, %arg11: memref<4x64x16xbf16, #tpu.memory_space<vmem>>, %arg12: memref<16x64xbf16, #tpu.memory_space<vmem>>, %arg13: memref<64x256xbf16, #tpu.memory_space<vmem>>, %arg14: memref<8x256xf32, #tpu.memory_space<vmem>>) attributes {dimension_semantics = [], scalar_prefetch = 0 : i64, scratch_operands = 0 : i64, tpu.core_type = #tpu.core_type<tc>} {
    %c0 = arith.constant 0 : index
    %c0_0 = arith.constant 0 : index
    %0 = vector.load %arg1[%c0, %c0_0] : memref<256x256xbf16, #tpu.memory_space<vmem>>, vector<256x256xbf16>
    %c0_1 = arith.constant 0 : index
    %c0_2 = arith.constant 0 : index
    %1 = vector.load %arg2[%c0_1, %c0_2] : memref<64x64xbf16, #tpu.memory_space<vmem>>, vector<64x64xbf16>
    %c0_3 = arith.constant 0 : index
    %c0_4 = arith.constant 0 : index
    %2 = vector.load %arg3[%c0_3, %c0_4] : memref<16x16xbf16, #tpu.memory_space<vmem>>, vector<16x16xbf16>
    %c0_5 = arith.constant 0 : index
    %c0_6 = arith.constant 0 : index
    %3 = vector.load %arg0[%c0_5, %c0_6] : memref<8x256xf32, #tpu.memory_space<vmem>>, vector<8x256xf32>
    %c0_7 = arith.constant 0 : index
    %c0_8 = arith.constant 0 : index
    %4 = vector.load %arg4[%c0_7, %c0_8] : memref<16x24xbf16, #tpu.memory_space<vmem>>, vector<16x24xbf16>
    %5 = arith.truncf %3 : vector<8x256xf32> to vector<8x256xbf16>
    %cst = arith.constant dense<0.000000e+00> : vector<8x256xf32>
    %6 = tpu.matmul %5, %0, %cst {dimension_numbers = #tpu.dot_dimension_numbers<[1], [0], [0], [1], [0, 0, 1, 1], [], []>} : vector<8x256xbf16>, vector<256x256xbf16>, vector<8x256xf32> -> vector<8x256xf32>
    %7 = arith.truncf %6 : vector<8x256xf32> to vector<8x256xbf16>
    %cst_9 = arith.constant dense<0.000000e+00> : vector<8x256xf32>
    %8 = tpu.matmul %7, %0, %cst_9 {dimension_numbers = #tpu.dot_dimension_numbers<[1], [0], [0], [1], [0, 0, 1, 1], [], []>} : vector<8x256xbf16>, vector<256x256xbf16>, vector<8x256xf32> -> vector<8x256xf32>
    %cst_10 = arith.constant 2.000000e+00 : f32
    %9 = vector.broadcast %cst_10 : f32 to vector<8x256xf32>
    %10 = arith.mulf %9, %8 : vector<8x256xf32>
    %11 = arith.subf %10, %3 : vector<8x256xf32>
    %12 = arith.truncf %11 : vector<8x256xf32> to vector<8x256xbf16>
    %13 = tpu.concatenate %5, %7, %12 in 0 : vector<8x256xbf16>, vector<8x256xbf16>, vector<8x256xbf16> -> vector<24x256xbf16>
    %cst_11 = arith.constant dense<0.000000e+00> : vector<16x256xf32>
    %14 = tpu.matmul %4, %13, %cst_11 {dimension_numbers = #tpu.dot_dimension_numbers<[1], [0], [0], [1], [0, 0, 1, 1], [], []>} : vector<16x24xbf16>, vector<24x256xbf16>, vector<16x256xf32> -> vector<16x256xf32>
    %c0_12 = arith.constant 0 : index
    %c0_13 = arith.constant 0 : index
    %15 = vector.load %arg9[%c0_12, %c0_13] : memref<224x1xf32, #tpu.memory_space<vmem>>, vector<8x1xf32>
    %c8 = arith.constant 8 : index
    %c0_14 = arith.constant 0 : index
    %16 = vector.load %arg9[%c8, %c0_14] : memref<224x1xf32, #tpu.memory_space<vmem>>, vector<8x1xf32>
    %c16 = arith.constant 16 : index
    %c0_15 = arith.constant 0 : index
    %17 = vector.load %arg9[%c16, %c0_15] : memref<224x1xf32, #tpu.memory_space<vmem>>, vector<8x1xf32>
    %18 = vector.shape_cast %15 : vector<8x1xf32> to vector<1x8x1xf32>
    %19 = vector.shape_cast %18 : vector<1x8x1xf32> to vector<1x8x1xf32>
    %20 = vector.broadcast %19 : vector<1x8x1xf32> to vector<2x8x1xf32>
    %21 = vector.shape_cast %20 : vector<2x8x1xf32> to vector<16x1xf32>
    %22 = vector.broadcast %21 : vector<16x1xf32> to vector<16x256xf32>
    %23 = arith.addf %14, %22 : vector<16x256xf32>
    %cst_16 = arith.constant dense<0.000000e+00> : vector<16xf32>
    %24 = vector.multi_reduction <add>, %23, %cst_16 [1] : vector<16x256xf32> to vector<16xf32>
    %25 = vector.shape_cast %24 : vector<16xf32> to vector<16x1xf32>
    %26 = vector.shape_cast %25 : vector<16x1xf32> to vector<2x8x1xf32>
    %27 = arith.mulf %23, %23 : vector<16x256xf32>
    %cst_17 = arith.constant dense<0.000000e+00> : vector<16xf32>
    %28 = vector.multi_reduction <add>, %27, %cst_17 [1] : vector<16x256xf32> to vector<16xf32>
    %29 = vector.shape_cast %28 : vector<16xf32> to vector<16x1xf32>
    %30 = vector.shape_cast %29 : vector<16x1xf32> to vector<2x8x1xf32>
    %31 = vector.extract_strided_slice %26 {offsets = [0, 0, 0], sizes = [1, 8, 1], strides = [1, 1, 1]} : vector<2x8x1xf32> to vector<1x8x1xf32>
    %32 = vector.shape_cast %31 : vector<1x8x1xf32> to vector<8x1xf32>
    %33 = vector.extract_strided_slice %30 {offsets = [0, 0, 0], sizes = [1, 8, 1], strides = [1, 1, 1]} : vector<2x8x1xf32> to vector<1x8x1xf32>
    %34 = vector.shape_cast %33 : vector<1x8x1xf32> to vector<8x1xf32>
    %35 = vector.extract_strided_slice %26 {offsets = [1, 0, 0], sizes = [1, 8, 1], strides = [1, 1, 1]} : vector<2x8x1xf32> to vector<1x8x1xf32>
    %36 = vector.shape_cast %35 : vector<1x8x1xf32> to vector<8x1xf32>
    %37 = arith.addf %32, %36 : vector<8x1xf32>
    %38 = vector.extract_strided_slice %30 {offsets = [1, 0, 0], sizes = [1, 8, 1], strides = [1, 1, 1]} : vector<2x8x1xf32> to vector<1x8x1xf32>
    %39 = vector.shape_cast %38 : vector<1x8x1xf32> to vector<8x1xf32>
    %40 = arith.addf %34, %39 : vector<8x1xf32>
    %cst_18 = arith.constant 5.120000e+02 : f32
    %41 = vector.broadcast %cst_18 : f32 to vector<8x1xf32>
    %42 = arith.divf %37, %41 : vector<8x1xf32>
    %cst_19 = arith.constant 5.120000e+02 : f32
    %43 = vector.broadcast %cst_19 : f32 to vector<8x1xf32>
    %44 = arith.divf %40, %43 : vector<8x1xf32>
    %45 = arith.mulf %42, %42 : vector<8x1xf32>
    %46 = arith.subf %44, %45 : vector<8x1xf32>
    %cst_20 = arith.constant 0.000000e+00 : f32
    %47 = vector.broadcast %cst_20 : f32 to vector<8x1xf32>
    %48 = arith.maximumf %46, %47 : vector<8x1xf32>
    %cst_21 = arith.constant 9.99999974E-6 : f32
    %49 = vector.broadcast %cst_21 : f32 to vector<8x1xf32>
    %50 = arith.addf %48, %49 : vector<8x1xf32>
    %51 = math.rsqrt %50 : vector<8x1xf32>
    %52 = arith.mulf %16, %51 : vector<8x1xf32>
    %53 = arith.mulf %42, %52 : vector<8x1xf32>
    %54 = arith.subf %17, %53 : vector<8x1xf32>
    %55 = vector.shape_cast %52 : vector<8x1xf32> to vector<1x8x1xf32>
    %56 = vector.shape_cast %55 : vector<1x8x1xf32> to vector<1x8x1xf32>
    %57 = vector.broadcast %56 : vector<1x8x1xf32> to vector<2x8x1xf32>
    %58 = vector.shape_cast %57 : vector<2x8x1xf32> to vector<16x1xf32>
    %59 = vector.broadcast %58 : vector<16x1xf32> to vector<16x256xf32>
    %60 = arith.mulf %23, %59 : vector<16x256xf32>
    %61 = vector.shape_cast %54 : vector<8x1xf32> to vector<1x8x1xf32>
    %62 = vector.shape_cast %61 : vector<1x8x1xf32> to vector<1x8x1xf32>
    %63 = vector.broadcast %62 : vector<1x8x1xf32> to vector<2x8x1xf32>
    %64 = vector.shape_cast %63 : vector<2x8x1xf32> to vector<16x1xf32>
    %65 = vector.broadcast %64 : vector<16x1xf32> to vector<16x256xf32>
    %66 = arith.addf %60, %65 : vector<16x256xf32>
    %cst_22 = arith.constant 0.000000e+00 : f32
    %67 = vector.broadcast %cst_22 : f32 to vector<16x256xf32>
    %68 = arith.maximumf %66, %67 : vector<16x256xf32>
    %69 = arith.truncf %68 : vector<16x256xf32> to vector<16x256xbf16>
    %c0_23 = arith.constant 0 : index
    %c0_24 = arith.constant 0 : index
    %c0_25 = arith.constant 0 : index
    %70 = vector.load %arg10[%c0_23, %c0_24, %c0_25] : memref<4x256x64xbf16, #tpu.memory_space<vmem>>, vector<1x256x64xbf16>
    %71 = vector.shape_cast %70 : vector<1x256x64xbf16> to vector<256x64xbf16>
    %cst_26 = arith.constant dense<0.000000e+00> : vector<16x64xf32>
    %72 = tpu.matmul %69, %71, %cst_26 {dimension_numbers = #tpu.dot_dimension_numbers<[1], [0], [0], [1], [0, 0, 1, 1], [], []>} : vector<16x256xbf16>, vector<256x64xbf16>, vector<16x64xf32> -> vector<16x64xf32>
    %c1 = arith.constant 1 : index
    %c0_27 = arith.constant 0 : index
    %c0_28 = arith.constant 0 : index
    %73 = vector.load %arg10[%c1, %c0_27, %c0_28] : memref<4x256x64xbf16, #tpu.memory_space<vmem>>, vector<1x256x64xbf16>
    %74 = vector.shape_cast %73 : vector<1x256x64xbf16> to vector<256x64xbf16>
    %cst_29 = arith.constant dense<0.000000e+00> : vector<16x64xf32>
    %75 = tpu.matmul %69, %74, %cst_29 {dimension_numbers = #tpu.dot_dimension_numbers<[1], [0], [0], [1], [0, 0, 1, 1], [], []>} : vector<16x256xbf16>, vector<256x64xbf16>, vector<16x64xf32> -> vector<16x64xf32>
    %76 = arith.maximumf %72, %75 : vector<16x64xf32>
    %c2 = arith.constant 2 : index
    %c0_30 = arith.constant 0 : index
    %c0_31 = arith.constant 0 : index
    %77 = vector.load %arg10[%c2, %c0_30, %c0_31] : memref<4x256x64xbf16, #tpu.memory_space<vmem>>, vector<1x256x64xbf16>
    %78 = vector.shape_cast %77 : vector<1x256x64xbf16> to vector<256x64xbf16>
    %cst_32 = arith.constant dense<0.000000e+00> : vector<16x64xf32>
    %79 = tpu.matmul %69, %78, %cst_32 {dimension_numbers = #tpu.dot_dimension_numbers<[1], [0], [0], [1], [0, 0, 1, 1], [], []>} : vector<16x256xbf16>, vector<256x64xbf16>, vector<16x64xf32> -> vector<16x64xf32>
    %80 = arith.maximumf %76, %79 : vector<16x64xf32>
    %c3 = arith.constant 3 : index
    %c0_33 = arith.constant 0 : index
    %c0_34 = arith.constant 0 : index
    %81 = vector.load %arg10[%c3, %c0_33, %c0_34] : memref<4x256x64xbf16, #tpu.memory_space<vmem>>, vector<1x256x64xbf16>
    %82 = vector.shape_cast %81 : vector<1x256x64xbf16> to vector<256x64xbf16>
    %cst_35 = arith.constant dense<0.000000e+00> : vector<16x64xf32>
    %83 = tpu.matmul %69, %82, %cst_35 {dimension_numbers = #tpu.dot_dimension_numbers<[1], [0], [0], [1], [0, 0, 1, 1], [], []>} : vector<16x256xbf16>, vector<256x64xbf16>, vector<16x64xf32> -> vector<16x64xf32>
    %84 = arith.maximumf %80, %83 : vector<16x64xf32>
    %c0_36 = arith.constant 0 : index
    %c0_37 = arith.constant 0 : index
    %85 = vector.load %arg5[%c0_36, %c0_37] : memref<32x48xbf16, #tpu.memory_space<vmem>>, vector<32x48xbf16>
    %86 = arith.truncf %84 : vector<16x64xf32> to vector<16x64xbf16>
    %cst_38 = arith.constant dense<0.000000e+00> : vector<16x64xf32>
    %87 = tpu.matmul %86, %1, %cst_38 {dimension_numbers = #tpu.dot_dimension_numbers<[1], [0], [0], [1], [0, 0, 1, 1], [], []>} : vector<16x64xbf16>, vector<64x64xbf16>, vector<16x64xf32> -> vector<16x64xf32>
    %88 = arith.truncf %87 : vector<16x64xf32> to vector<16x64xbf16>
    %cst_39 = arith.constant dense<0.000000e+00> : vector<16x64xf32>
    %89 = tpu.matmul %88, %1, %cst_39 {dimension_numbers = #tpu.dot_dimension_numbers<[1], [0], [0], [1], [0, 0, 1, 1], [], []>} : vector<16x64xbf16>, vector<64x64xbf16>, vector<16x64xf32> -> vector<16x64xf32>
    %cst_40 = arith.constant 2.000000e+00 : f32
    %90 = vector.broadcast %cst_40 : f32 to vector<16x64xf32>
    %91 = arith.mulf %90, %89 : vector<16x64xf32>
    %92 = arith.subf %91, %84 : vector<16x64xf32>
    %93 = arith.truncf %92 : vector<16x64xf32> to vector<16x64xbf16>
    %94 = tpu.concatenate %86, %88, %93 in 0 : vector<16x64xbf16>, vector<16x64xbf16>, vector<16x64xbf16> -> vector<48x64xbf16>
    %cst_41 = arith.constant dense<0.000000e+00> : vector<32x64xf32>
    %95 = tpu.matmul %85, %94, %cst_41 {dimension_numbers = #tpu.dot_dimension_numbers<[1], [0], [0], [1], [0, 0, 1, 1], [], []>} : vector<32x48xbf16>, vector<48x64xbf16>, vector<32x64xf32> -> vector<32x64xf32>
    %c24 = arith.constant 24 : index
    %c0_42 = arith.constant 0 : index
    %96 = vector.load %arg9[%c24, %c0_42] : memref<224x1xf32, #tpu.memory_space<vmem>>, vector<16x1xf32>
    %c40 = arith.constant 40 : index
    %c0_43 = arith.constant 0 : index
    %97 = vector.load %arg9[%c40, %c0_43] : memref<224x1xf32, #tpu.memory_space<vmem>>, vector<16x1xf32>
    %c56 = arith.constant 56 : index
    %c0_44 = arith.constant 0 : index
    %98 = vector.load %arg9[%c56, %c0_44] : memref<224x1xf32, #tpu.memory_space<vmem>>, vector<16x1xf32>
    %99 = vector.shape_cast %96 : vector<16x1xf32> to vector<1x16x1xf32>
    %100 = vector.shape_cast %99 : vector<1x16x1xf32> to vector<1x16x1xf32>
    %101 = vector.broadcast %100 : vector<1x16x1xf32> to vector<2x16x1xf32>
    %102 = vector.shape_cast %101 : vector<2x16x1xf32> to vector<32x1xf32>
    %103 = vector.broadcast %102 : vector<32x1xf32> to vector<32x64xf32>
    %104 = arith.addf %95, %103 : vector<32x64xf32>
    %cst_45 = arith.constant dense<0.000000e+00> : vector<32xf32>
    %105 = vector.multi_reduction <add>, %104, %cst_45 [1] : vector<32x64xf32> to vector<32xf32>
    %106 = vector.shape_cast %105 : vector<32xf32> to vector<32x1xf32>
    %107 = vector.shape_cast %106 : vector<32x1xf32> to vector<2x16x1xf32>
    %108 = arith.mulf %104, %104 : vector<32x64xf32>
    %cst_46 = arith.constant dense<0.000000e+00> : vector<32xf32>
    %109 = vector.multi_reduction <add>, %108, %cst_46 [1] : vector<32x64xf32> to vector<32xf32>
    %110 = vector.shape_cast %109 : vector<32xf32> to vector<32x1xf32>
    %111 = vector.shape_cast %110 : vector<32x1xf32> to vector<2x16x1xf32>
    %112 = vector.extract_strided_slice %107 {offsets = [0, 0, 0], sizes = [1, 16, 1], strides = [1, 1, 1]} : vector<2x16x1xf32> to vector<1x16x1xf32>
    %113 = vector.shape_cast %112 : vector<1x16x1xf32> to vector<16x1xf32>
    %114 = vector.extract_strided_slice %111 {offsets = [0, 0, 0], sizes = [1, 16, 1], strides = [1, 1, 1]} : vector<2x16x1xf32> to vector<1x16x1xf32>
    %115 = vector.shape_cast %114 : vector<1x16x1xf32> to vector<16x1xf32>
    %116 = vector.extract_strided_slice %107 {offsets = [1, 0, 0], sizes = [1, 16, 1], strides = [1, 1, 1]} : vector<2x16x1xf32> to vector<1x16x1xf32>
    %117 = vector.shape_cast %116 : vector<1x16x1xf32> to vector<16x1xf32>
    %118 = arith.addf %113, %117 : vector<16x1xf32>
    %119 = vector.extract_strided_slice %111 {offsets = [1, 0, 0], sizes = [1, 16, 1], strides = [1, 1, 1]} : vector<2x16x1xf32> to vector<1x16x1xf32>
    %120 = vector.shape_cast %119 : vector<1x16x1xf32> to vector<16x1xf32>
    %121 = arith.addf %115, %120 : vector<16x1xf32>
    %cst_47 = arith.constant 1.280000e+02 : f32
    %122 = vector.broadcast %cst_47 : f32 to vector<16x1xf32>
    %123 = arith.divf %118, %122 : vector<16x1xf32>
    %cst_48 = arith.constant 1.280000e+02 : f32
    %124 = vector.broadcast %cst_48 : f32 to vector<16x1xf32>
    %125 = arith.divf %121, %124 : vector<16x1xf32>
    %126 = arith.mulf %123, %123 : vector<16x1xf32>
    %127 = arith.subf %125, %126 : vector<16x1xf32>
    %cst_49 = arith.constant 0.000000e+00 : f32
    %128 = vector.broadcast %cst_49 : f32 to vector<16x1xf32>
    %129 = arith.maximumf %127, %128 : vector<16x1xf32>
    %cst_50 = arith.constant 9.99999974E-6 : f32
    %130 = vector.broadcast %cst_50 : f32 to vector<16x1xf32>
    %131 = arith.addf %129, %130 : vector<16x1xf32>
    %132 = math.rsqrt %131 : vector<16x1xf32>
    %133 = arith.mulf %97, %132 : vector<16x1xf32>
    %134 = arith.mulf %123, %133 : vector<16x1xf32>
    %135 = arith.subf %98, %134 : vector<16x1xf32>
    %136 = vector.shape_cast %133 : vector<16x1xf32> to vector<1x16x1xf32>
    %137 = vector.shape_cast %136 : vector<1x16x1xf32> to vector<1x16x1xf32>
    %138 = vector.broadcast %137 : vector<1x16x1xf32> to vector<2x16x1xf32>
    %139 = vector.shape_cast %138 : vector<2x16x1xf32> to vector<32x1xf32>
    %140 = vector.broadcast %139 : vector<32x1xf32> to vector<32x64xf32>
    %141 = arith.mulf %104, %140 : vector<32x64xf32>
    %142 = vector.shape_cast %135 : vector<16x1xf32> to vector<1x16x1xf32>
    %143 = vector.shape_cast %142 : vector<1x16x1xf32> to vector<1x16x1xf32>
    %144 = vector.broadcast %143 : vector<1x16x1xf32> to vector<2x16x1xf32>
    %145 = vector.shape_cast %144 : vector<2x16x1xf32> to vector<32x1xf32>
    %146 = vector.broadcast %145 : vector<32x1xf32> to vector<32x64xf32>
    %147 = arith.addf %141, %146 : vector<32x64xf32>
    %cst_51 = arith.constant 0.000000e+00 : f32
    %148 = vector.broadcast %cst_51 : f32 to vector<32x64xf32>
    %149 = arith.maximumf %147, %148 : vector<32x64xf32>
    %150 = arith.truncf %149 : vector<32x64xf32> to vector<32x64xbf16>
    %c0_52 = arith.constant 0 : index
    %c0_53 = arith.constant 0 : index
    %c0_54 = arith.constant 0 : index
    %151 = vector.load %arg11[%c0_52, %c0_53, %c0_54] : memref<4x64x16xbf16, #tpu.memory_space<vmem>>, vector<1x64x16xbf16>
    %152 = vector.shape_cast %151 : vector<1x64x16xbf16> to vector<64x16xbf16>
    %cst_55 = arith.constant dense<0.000000e+00> : vector<32x16xf32>
    %153 = tpu.matmul %150, %152, %cst_55 {dimension_numbers = #tpu.dot_dimension_numbers<[1], [0], [0], [1], [0, 0, 1, 1], [], []>} : vector<32x64xbf16>, vector<64x16xbf16>, vector<32x16xf32> -> vector<32x16xf32>
    %c1_56 = arith.constant 1 : index
    %c0_57 = arith.constant 0 : index
    %c0_58 = arith.constant 0 : index
    %154 = vector.load %arg11[%c1_56, %c0_57, %c0_58] : memref<4x64x16xbf16, #tpu.memory_space<vmem>>, vector<1x64x16xbf16>
    %155 = vector.shape_cast %154 : vector<1x64x16xbf16> to vector<64x16xbf16>
    %cst_59 = arith.constant dense<0.000000e+00> : vector<32x16xf32>
    %156 = tpu.matmul %150, %155, %cst_59 {dimension_numbers = #tpu.dot_dimension_numbers<[1], [0], [0], [1], [0, 0, 1, 1], [], []>} : vector<32x64xbf16>, vector<64x16xbf16>, vector<32x16xf32> -> vector<32x16xf32>
    %157 = arith.maximumf %153, %156 : vector<32x16xf32>
    %c2_60 = arith.constant 2 : index
    %c0_61 = arith.constant 0 : index
    %c0_62 = arith.constant 0 : index
    %158 = vector.load %arg11[%c2_60, %c0_61, %c0_62] : memref<4x64x16xbf16, #tpu.memory_space<vmem>>, vector<1x64x16xbf16>
    %159 = vector.shape_cast %158 : vector<1x64x16xbf16> to vector<64x16xbf16>
    %cst_63 = arith.constant dense<0.000000e+00> : vector<32x16xf32>
    %160 = tpu.matmul %150, %159, %cst_63 {dimension_numbers = #tpu.dot_dimension_numbers<[1], [0], [0], [1], [0, 0, 1, 1], [], []>} : vector<32x64xbf16>, vector<64x16xbf16>, vector<32x16xf32> -> vector<32x16xf32>
    %161 = arith.maximumf %157, %160 : vector<32x16xf32>
    %c3_64 = arith.constant 3 : index
    %c0_65 = arith.constant 0 : index
    %c0_66 = arith.constant 0 : index
    %162 = vector.load %arg11[%c3_64, %c0_65, %c0_66] : memref<4x64x16xbf16, #tpu.memory_space<vmem>>, vector<1x64x16xbf16>
    %163 = vector.shape_cast %162 : vector<1x64x16xbf16> to vector<64x16xbf16>
    %cst_67 = arith.constant dense<0.000000e+00> : vector<32x16xf32>
    %164 = tpu.matmul %150, %163, %cst_67 {dimension_numbers = #tpu.dot_dimension_numbers<[1], [0], [0], [1], [0, 0, 1, 1], [], []>} : vector<32x64xbf16>, vector<64x16xbf16>, vector<32x16xf32> -> vector<32x16xf32>
    %165 = arith.maximumf %161, %164 : vector<32x16xf32>
    %c0_68 = arith.constant 0 : index
    %c0_69 = arith.constant 0 : index
    %166 = vector.load %arg6[%c0_68, %c0_69] : memref<64x96xbf16, #tpu.memory_space<vmem>>, vector<64x96xbf16>
    %167 = arith.truncf %165 : vector<32x16xf32> to vector<32x16xbf16>
    %cst_70 = arith.constant dense<0.000000e+00> : vector<32x16xf32>
    %168 = tpu.matmul %167, %2, %cst_70 {dimension_numbers = #tpu.dot_dimension_numbers<[1], [0], [0], [1], [0, 0, 1, 1], [], []>} : vector<32x16xbf16>, vector<16x16xbf16>, vector<32x16xf32> -> vector<32x16xf32>
    %169 = arith.truncf %168 : vector<32x16xf32> to vector<32x16xbf16>
    %cst_71 = arith.constant dense<0.000000e+00> : vector<32x16xf32>
    %170 = tpu.matmul %169, %2, %cst_71 {dimension_numbers = #tpu.dot_dimension_numbers<[1], [0], [0], [1], [0, 0, 1, 1], [], []>} : vector<32x16xbf16>, vector<16x16xbf16>, vector<32x16xf32> -> vector<32x16xf32>
    %cst_72 = arith.constant 2.000000e+00 : f32
    %171 = vector.broadcast %cst_72 : f32 to vector<32x16xf32>
    %172 = arith.mulf %171, %170 : vector<32x16xf32>
    %173 = arith.subf %172, %165 : vector<32x16xf32>
    %174 = arith.truncf %173 : vector<32x16xf32> to vector<32x16xbf16>
    %175 = tpu.concatenate %167, %169, %174 in 0 : vector<32x16xbf16>, vector<32x16xbf16>, vector<32x16xbf16> -> vector<96x16xbf16>
    %cst_73 = arith.constant dense<0.000000e+00> : vector<64x16xf32>
    %176 = tpu.matmul %166, %175, %cst_73 {dimension_numbers = #tpu.dot_dimension_numbers<[1], [0], [0], [1], [0, 0, 1, 1], [], []>} : vector<64x96xbf16>, vector<96x16xbf16>, vector<64x16xf32> -> vector<64x16xf32>
    %c72 = arith.constant 72 : index
    %c0_74 = arith.constant 0 : index
    %177 = vector.load %arg9[%c72, %c0_74] : memref<224x1xf32, #tpu.memory_space<vmem>>, vector<32x1xf32>
    %c104 = arith.constant 104 : index
    %c0_75 = arith.constant 0 : index
    %178 = vector.load %arg9[%c104, %c0_75] : memref<224x1xf32, #tpu.memory_space<vmem>>, vector<32x1xf32>
    %c136 = arith.constant 136 : index
    %c0_76 = arith.constant 0 : index
    %179 = vector.load %arg9[%c136, %c0_76] : memref<224x1xf32, #tpu.memory_space<vmem>>, vector<32x1xf32>
    %180 = vector.shape_cast %177 : vector<32x1xf32> to vector<1x32x1xf32>
    %181 = vector.shape_cast %180 : vector<1x32x1xf32> to vector<1x32x1xf32>
    %182 = vector.broadcast %181 : vector<1x32x1xf32> to vector<2x32x1xf32>
    %183 = vector.shape_cast %182 : vector<2x32x1xf32> to vector<64x1xf32>
    %184 = vector.broadcast %183 : vector<64x1xf32> to vector<64x16xf32>
    %185 = arith.addf %176, %184 : vector<64x16xf32>
    %cst_77 = arith.constant dense<0.000000e+00> : vector<64xf32>
    %186 = vector.multi_reduction <add>, %185, %cst_77 [1] : vector<64x16xf32> to vector<64xf32>
    %187 = vector.shape_cast %186 : vector<64xf32> to vector<64x1xf32>
    %188 = vector.shape_cast %187 : vector<64x1xf32> to vector<2x32x1xf32>
    %189 = arith.mulf %185, %185 : vector<64x16xf32>
    %cst_78 = arith.constant dense<0.000000e+00> : vector<64xf32>
    %190 = vector.multi_reduction <add>, %189, %cst_78 [1] : vector<64x16xf32> to vector<64xf32>
    %191 = vector.shape_cast %190 : vector<64xf32> to vector<64x1xf32>
    %192 = vector.shape_cast %191 : vector<64x1xf32> to vector<2x32x1xf32>
    %193 = vector.extract_strided_slice %188 {offsets = [0, 0, 0], sizes = [1, 32, 1], strides = [1, 1, 1]} : vector<2x32x1xf32> to vector<1x32x1xf32>
    %194 = vector.shape_cast %193 : vector<1x32x1xf32> to vector<32x1xf32>
    %195 = vector.extract_strided_slice %192 {offsets = [0, 0, 0], sizes = [1, 32, 1], strides = [1, 1, 1]} : vector<2x32x1xf32> to vector<1x32x1xf32>
    %196 = vector.shape_cast %195 : vector<1x32x1xf32> to vector<32x1xf32>
    %197 = vector.extract_strided_slice %188 {offsets = [1, 0, 0], sizes = [1, 32, 1], strides = [1, 1, 1]} : vector<2x32x1xf32> to vector<1x32x1xf32>
    %198 = vector.shape_cast %197 : vector<1x32x1xf32> to vector<32x1xf32>
    %199 = arith.addf %194, %198 : vector<32x1xf32>
    %200 = vector.extract_strided_slice %192 {offsets = [1, 0, 0], sizes = [1, 32, 1], strides = [1, 1, 1]} : vector<2x32x1xf32> to vector<1x32x1xf32>
    %201 = vector.shape_cast %200 : vector<1x32x1xf32> to vector<32x1xf32>
    %202 = arith.addf %196, %201 : vector<32x1xf32>
    %cst_79 = arith.constant 3.200000e+01 : f32
    %203 = vector.broadcast %cst_79 : f32 to vector<32x1xf32>
    %204 = arith.divf %199, %203 : vector<32x1xf32>
    %cst_80 = arith.constant 3.200000e+01 : f32
    %205 = vector.broadcast %cst_80 : f32 to vector<32x1xf32>
    %206 = arith.divf %202, %205 : vector<32x1xf32>
    %207 = arith.mulf %204, %204 : vector<32x1xf32>
    %208 = arith.subf %206, %207 : vector<32x1xf32>
    %cst_81 = arith.constant 0.000000e+00 : f32
    %209 = vector.broadcast %cst_81 : f32 to vector<32x1xf32>
    %210 = arith.maximumf %208, %209 : vector<32x1xf32>
    %cst_82 = arith.constant 9.99999974E-6 : f32
    %211 = vector.broadcast %cst_82 : f32 to vector<32x1xf32>
    %212 = arith.addf %210, %211 : vector<32x1xf32>
    %213 = math.rsqrt %212 : vector<32x1xf32>
    %214 = arith.mulf %178, %213 : vector<32x1xf32>
    %215 = arith.mulf %204, %214 : vector<32x1xf32>
    %216 = arith.subf %179, %215 : vector<32x1xf32>
    %217 = vector.shape_cast %214 : vector<32x1xf32> to vector<1x32x1xf32>
    %218 = vector.shape_cast %217 : vector<1x32x1xf32> to vector<1x32x1xf32>
    %219 = vector.broadcast %218 : vector<1x32x1xf32> to vector<2x32x1xf32>
    %220 = vector.shape_cast %219 : vector<2x32x1xf32> to vector<64x1xf32>
    %221 = vector.broadcast %220 : vector<64x1xf32> to vector<64x16xf32>
    %222 = arith.mulf %185, %221 : vector<64x16xf32>
    %223 = vector.shape_cast %216 : vector<32x1xf32> to vector<1x32x1xf32>
    %224 = vector.shape_cast %223 : vector<1x32x1xf32> to vector<1x32x1xf32>
    %225 = vector.broadcast %224 : vector<1x32x1xf32> to vector<2x32x1xf32>
    %226 = vector.shape_cast %225 : vector<2x32x1xf32> to vector<64x1xf32>
    %227 = vector.broadcast %226 : vector<64x1xf32> to vector<64x16xf32>
    %228 = arith.addf %222, %227 : vector<64x16xf32>
    %cst_83 = arith.constant 0.000000e+00 : f32
    %229 = vector.broadcast %cst_83 : f32 to vector<64x16xf32>
    %230 = arith.maximumf %228, %229 : vector<64x16xf32>
    %c0_84 = arith.constant 0 : index
    %c0_85 = arith.constant 0 : index
    %231 = vector.load %arg12[%c0_84, %c0_85] : memref<16x64xbf16, #tpu.memory_space<vmem>>, vector<16x64xbf16>
    %232 = arith.truncf %230 : vector<64x16xf32> to vector<64x16xbf16>
    %cst_86 = arith.constant dense<0.000000e+00> : vector<64x64xf32>
    %233 = tpu.matmul %232, %231, %cst_86 {dimension_numbers = #tpu.dot_dimension_numbers<[1], [0], [0], [1], [0, 0, 1, 1], [], []>} : vector<64x16xbf16>, vector<16x64xbf16>, vector<64x64xf32> -> vector<64x64xf32>
    %234 = tpu.concatenate %233, %149 in 0 : vector<64x64xf32>, vector<32x64xf32> -> vector<96x64xf32>
    %c0_87 = arith.constant 0 : index
    %c0_88 = arith.constant 0 : index
    %235 = vector.load %arg7[%c0_87, %c0_88] : memref<32x288xbf16, #tpu.memory_space<vmem>>, vector<32x288xbf16>
    %236 = arith.truncf %234 : vector<96x64xf32> to vector<96x64xbf16>
    %cst_89 = arith.constant dense<0.000000e+00> : vector<96x64xf32>
    %237 = tpu.matmul %236, %1, %cst_89 {dimension_numbers = #tpu.dot_dimension_numbers<[1], [0], [0], [1], [0, 0, 1, 1], [], []>} : vector<96x64xbf16>, vector<64x64xbf16>, vector<96x64xf32> -> vector<96x64xf32>
    %238 = arith.truncf %237 : vector<96x64xf32> to vector<96x64xbf16>
    %cst_90 = arith.constant dense<0.000000e+00> : vector<96x64xf32>
    %239 = tpu.matmul %238, %1, %cst_90 {dimension_numbers = #tpu.dot_dimension_numbers<[1], [0], [0], [1], [0, 0, 1, 1], [], []>} : vector<96x64xbf16>, vector<64x64xbf16>, vector<96x64xf32> -> vector<96x64xf32>
    %cst_91 = arith.constant 2.000000e+00 : f32
    %240 = vector.broadcast %cst_91 : f32 to vector<96x64xf32>
    %241 = arith.mulf %240, %239 : vector<96x64xf32>
    %242 = arith.subf %241, %234 : vector<96x64xf32>
    %243 = arith.truncf %242 : vector<96x64xf32> to vector<96x64xbf16>
    %244 = tpu.concatenate %236, %238, %243 in 0 : vector<96x64xbf16>, vector<96x64xbf16>, vector<96x64xbf16> -> vector<288x64xbf16>
    %cst_92 = arith.constant dense<0.000000e+00> : vector<32x64xf32>
    %245 = tpu.matmul %235, %244, %cst_92 {dimension_numbers = #tpu.dot_dimension_numbers<[1], [0], [0], [1], [0, 0, 1, 1], [], []>} : vector<32x288xbf16>, vector<288x64xbf16>, vector<32x64xf32> -> vector<32x64xf32>
    %c168 = arith.constant 168 : index
    %c0_93 = arith.constant 0 : index
    %246 = vector.load %arg9[%c168, %c0_93] : memref<224x1xf32, #tpu.memory_space<vmem>>, vector<16x1xf32>
    %c184 = arith.constant 184 : index
    %c0_94 = arith.constant 0 : index
    %247 = vector.load %arg9[%c184, %c0_94] : memref<224x1xf32, #tpu.memory_space<vmem>>, vector<16x1xf32>
    %c200 = arith.constant 200 : index
    %c0_95 = arith.constant 0 : index
    %248 = vector.load %arg9[%c200, %c0_95] : memref<224x1xf32, #tpu.memory_space<vmem>>, vector<16x1xf32>
    %249 = vector.shape_cast %246 : vector<16x1xf32> to vector<1x16x1xf32>
    %250 = vector.shape_cast %249 : vector<1x16x1xf32> to vector<1x16x1xf32>
    %251 = vector.broadcast %250 : vector<1x16x1xf32> to vector<2x16x1xf32>
    %252 = vector.shape_cast %251 : vector<2x16x1xf32> to vector<32x1xf32>
    %253 = vector.broadcast %252 : vector<32x1xf32> to vector<32x64xf32>
    %254 = arith.addf %245, %253 : vector<32x64xf32>
    %cst_96 = arith.constant dense<0.000000e+00> : vector<32xf32>
    %255 = vector.multi_reduction <add>, %254, %cst_96 [1] : vector<32x64xf32> to vector<32xf32>
    %256 = vector.shape_cast %255 : vector<32xf32> to vector<32x1xf32>
    %257 = vector.shape_cast %256 : vector<32x1xf32> to vector<2x16x1xf32>
    %258 = arith.mulf %254, %254 : vector<32x64xf32>
    %cst_97 = arith.constant dense<0.000000e+00> : vector<32xf32>
    %259 = vector.multi_reduction <add>, %258, %cst_97 [1] : vector<32x64xf32> to vector<32xf32>
    %260 = vector.shape_cast %259 : vector<32xf32> to vector<32x1xf32>
    %261 = vector.shape_cast %260 : vector<32x1xf32> to vector<2x16x1xf32>
    %262 = vector.extract_strided_slice %257 {offsets = [0, 0, 0], sizes = [1, 16, 1], strides = [1, 1, 1]} : vector<2x16x1xf32> to vector<1x16x1xf32>
    %263 = vector.shape_cast %262 : vector<1x16x1xf32> to vector<16x1xf32>
    %264 = vector.extract_strided_slice %261 {offsets = [0, 0, 0], sizes = [1, 16, 1], strides = [1, 1, 1]} : vector<2x16x1xf32> to vector<1x16x1xf32>
    %265 = vector.shape_cast %264 : vector<1x16x1xf32> to vector<16x1xf32>
    %266 = vector.extract_strided_slice %257 {offsets = [1, 0, 0], sizes = [1, 16, 1], strides = [1, 1, 1]} : vector<2x16x1xf32> to vector<1x16x1xf32>
    %267 = vector.shape_cast %266 : vector<1x16x1xf32> to vector<16x1xf32>
    %268 = arith.addf %263, %267 : vector<16x1xf32>
    %269 = vector.extract_strided_slice %261 {offsets = [1, 0, 0], sizes = [1, 16, 1], strides = [1, 1, 1]} : vector<2x16x1xf32> to vector<1x16x1xf32>
    %270 = vector.shape_cast %269 : vector<1x16x1xf32> to vector<16x1xf32>
    %271 = arith.addf %265, %270 : vector<16x1xf32>
    %cst_98 = arith.constant 1.280000e+02 : f32
    %272 = vector.broadcast %cst_98 : f32 to vector<16x1xf32>
    %273 = arith.divf %268, %272 : vector<16x1xf32>
    %cst_99 = arith.constant 1.280000e+02 : f32
    %274 = vector.broadcast %cst_99 : f32 to vector<16x1xf32>
    %275 = arith.divf %271, %274 : vector<16x1xf32>
    %276 = arith.mulf %273, %273 : vector<16x1xf32>
    %277 = arith.subf %275, %276 : vector<16x1xf32>
    %cst_100 = arith.constant 0.000000e+00 : f32
    %278 = vector.broadcast %cst_100 : f32 to vector<16x1xf32>
    %279 = arith.maximumf %277, %278 : vector<16x1xf32>
    %cst_101 = arith.constant 9.99999974E-6 : f32
    %280 = vector.broadcast %cst_101 : f32 to vector<16x1xf32>
    %281 = arith.addf %279, %280 : vector<16x1xf32>
    %282 = math.rsqrt %281 : vector<16x1xf32>
    %283 = arith.mulf %247, %282 : vector<16x1xf32>
    %284 = arith.mulf %273, %283 : vector<16x1xf32>
    %285 = arith.subf %248, %284 : vector<16x1xf32>
    %286 = vector.shape_cast %283 : vector<16x1xf32> to vector<1x16x1xf32>
    %287 = vector.shape_cast %286 : vector<1x16x1xf32> to vector<1x16x1xf32>
    %288 = vector.broadcast %287 : vector<1x16x1xf32> to vector<2x16x1xf32>
    %289 = vector.shape_cast %288 : vector<2x16x1xf32> to vector<32x1xf32>
    %290 = vector.broadcast %289 : vector<32x1xf32> to vector<32x64xf32>
    %291 = arith.mulf %254, %290 : vector<32x64xf32>
    %292 = vector.shape_cast %285 : vector<16x1xf32> to vector<1x16x1xf32>
    %293 = vector.shape_cast %292 : vector<1x16x1xf32> to vector<1x16x1xf32>
    %294 = vector.broadcast %293 : vector<1x16x1xf32> to vector<2x16x1xf32>
    %295 = vector.shape_cast %294 : vector<2x16x1xf32> to vector<32x1xf32>
    %296 = vector.broadcast %295 : vector<32x1xf32> to vector<32x64xf32>
    %297 = arith.addf %291, %296 : vector<32x64xf32>
    %cst_102 = arith.constant 0.000000e+00 : f32
    %298 = vector.broadcast %cst_102 : f32 to vector<32x64xf32>
    %299 = arith.maximumf %297, %298 : vector<32x64xf32>
    %c0_103 = arith.constant 0 : index
    %c0_104 = arith.constant 0 : index
    %300 = vector.load %arg13[%c0_103, %c0_104] : memref<64x256xbf16, #tpu.memory_space<vmem>>, vector<64x256xbf16>
    %301 = arith.truncf %299 : vector<32x64xf32> to vector<32x64xbf16>
    %cst_105 = arith.constant dense<0.000000e+00> : vector<32x256xf32>
    %302 = tpu.matmul %301, %300, %cst_105 {dimension_numbers = #tpu.dot_dimension_numbers<[1], [0], [0], [1], [0, 0, 1, 1], [], []>} : vector<32x64xbf16>, vector<64x256xbf16>, vector<32x256xf32> -> vector<32x256xf32>
    %303 = tpu.concatenate %302, %68 in 0 : vector<32x256xf32>, vector<16x256xf32> -> vector<48x256xf32>
    %c0_106 = arith.constant 0 : index
    %c0_107 = arith.constant 0 : index
    %304 = vector.load %arg8[%c0_106, %c0_107] : memref<8x144xbf16, #tpu.memory_space<vmem>>, vector<8x144xbf16>
    %305 = arith.truncf %303 : vector<48x256xf32> to vector<48x256xbf16>
    %cst_108 = arith.constant dense<0.000000e+00> : vector<48x256xf32>
    %306 = tpu.matmul %305, %0, %cst_108 {dimension_numbers = #tpu.dot_dimension_numbers<[1], [0], [0], [1], [0, 0, 1, 1], [], []>} : vector<48x256xbf16>, vector<256x256xbf16>, vector<48x256xf32> -> vector<48x256xf32>
    %307 = arith.truncf %306 : vector<48x256xf32> to vector<48x256xbf16>
    %cst_109 = arith.constant dense<0.000000e+00> : vector<48x256xf32>
    %308 = tpu.matmul %307, %0, %cst_109 {dimension_numbers = #tpu.dot_dimension_numbers<[1], [0], [0], [1], [0, 0, 1, 1], [], []>} : vector<48x256xbf16>, vector<256x256xbf16>, vector<48x256xf32> -> vector<48x256xf32>
    %cst_110 = arith.constant 2.000000e+00 : f32
    %309 = vector.broadcast %cst_110 : f32 to vector<48x256xf32>
    %310 = arith.mulf %309, %308 : vector<48x256xf32>
    %311 = arith.subf %310, %303 : vector<48x256xf32>
    %312 = arith.truncf %311 : vector<48x256xf32> to vector<48x256xbf16>
    %313 = tpu.concatenate %305, %307, %312 in 0 : vector<48x256xbf16>, vector<48x256xbf16>, vector<48x256xbf16> -> vector<144x256xbf16>
    %cst_111 = arith.constant dense<0.000000e+00> : vector<8x256xf32>
    %314 = tpu.matmul %304, %313, %cst_111 {dimension_numbers = #tpu.dot_dimension_numbers<[1], [0], [0], [1], [0, 0, 1, 1], [], []>} : vector<8x144xbf16>, vector<144x256xbf16>, vector<8x256xf32> -> vector<8x256xf32>
    %c216 = arith.constant 216 : index
    %c0_112 = arith.constant 0 : index
    %315 = vector.load %arg9[%c216, %c0_112] : memref<224x1xf32, #tpu.memory_space<vmem>>, vector<8x1xf32>
    %316 = vector.broadcast %315 : vector<8x1xf32> to vector<8x256xf32>
    %317 = arith.addf %314, %316 : vector<8x256xf32>
    %c0_113 = arith.constant 0 : index
    %c0_114 = arith.constant 0 : index
    %318 = vector.load %arg14[%c0_113, %c0_114] : memref<8x256xf32, #tpu.memory_space<vmem>>, vector<8x256xf32>
    tpu.vector_store %arg14[%c0_113, %c0_114], %317 {strides = array<i32>} : memref<8x256xf32, #tpu.memory_space<vmem>>, vector<8x256xf32>,
    return
  }
}

</mosaic_0001>

<bundles_post_ra>
// kernel: tile.8
= control target key start
LH: loop header
LB: loop body
LE: loop exit
PB: predicated region body
PF: predicated region fallthrough
CT: control target
= control target key end

     0   :  { %s22_s0 = inlined_call_operand.vmem [shape: f32[4], index: 0, kind: input, shape index: {}]   ;;  %s23_s1 = inlined_call_operand.vmem [shape: f32[2,4], index: 1, kind: output, shape index: {}]  }
   0x1   :  { %v4_v0 = vld [vmem:[%s22_s0] ss:$0 sm:$0xff] }
   0x2   :  { %5 = vst [vmem:[%s23_s1] sm:$0x3] %v4_v0 }

// kernel: tile.9
= control target key start
LH: loop header
LB: loop body
LE: loop exit
PB: predicated region body
PF: predicated region fallthrough
CT: control target
= control target key end

     0   :  { %vm7_vm0 = vcmask 31744   ;;  %vm13_vm1 = vcmask 64544   ;;  %s39_s0 = inlined_call_operand.vmem [shape: f32[2,4], index: 0, kind: input, shape index: {}]   ;;  %s40_s1 = inlined_call_operand.vmem [shape: f32[8], index: 1, kind: output, shape index: {}]  }
   0x1   :  { %v4_v0 = vld [vmem:[%s39_s0] sm:$0x3]  ;;  %s22_s0 = smov 4  }
   0x2   :  { %5 = vst [vmem:[#allocation1] sm:$0x3] %v4_v0 }
   0x9   :  { %v10_v1 = vld [vmem:[#allocation1 + $0x1] sm:$0x1]   ;;  %v6_v2 = vld [vmem:[#allocation1] sm:$0x1]  }
   0xa   :  { %11 = vrot.lane.b32.xlu0 %v10_v1, %s22_s0  ;;  %8 = vst.msk [vmem:[#allocation0] sm:$0x1] %vm7_vm0, %v6_v2  }
  0x7c   :  { %v12_v3 = vpop.permute.xlu0 %11  }
  0x7d   :  { %14 = vst.msk [vmem:[#allocation0] sm:$0x1] %vm13_vm1, %v12_v3  }
  0x84   :  { %v17_v4 = vld [vmem:[#allocation0] sm:$0x1] }
  0x85   :  { %20 = vst [vmem:[%s40_s1] sm:$0x1] %v17_v4 }

// kernel: spherical_unet_forward.1
= control target key start
LH: loop header
LB: loop body
LE: loop exit
PB: predicated region body
PF: predicated region fallthrough
CT: control target
= control target key end

     0   :  { %vm384_vm0 = vcmask 1043456   ;;  %vm406_vm1 = vcmask 195584   ;;  %vm1180_vm6 = vcmask 523264   ;;  %vm1262_vm7 = vcmask 392192   ;;  %s5384_s1 = inlined_call_operand.vmem [shape: bf16[256,256], index: 1, kind: input, shape index: {}]   ;;  %s5385_s0 = inlined_call_operand.vmem [shape: f32[8,256], index: 0, kind: input, shape index: {}]   ;;  %s5386_s9 = inlined_call_operand.vmem [shape: f32[224,1], index: 9, kind: input, shape index: {}]   ;;  %s5387_s4 = inlined_call_operand.vmem [shape: bf16[16,24], index: 4, kind: input, shape index: {}]   ;;  %s5388_s10 = inlined_call_operand.vmem [shape: bf16[4,256,64], index: 10, kind: input, shape index: {}]   ;;  %s5389_s2 = inlined_call_operand.vmem [shape: bf16[64,64], index: 2, kind: input, shape index: {}]   ;;  %s5390_s5 = inlined_call_operand.vmem [shape: bf16[32,48], index: 5, kind: input, shape index: {}]   ;;  %s5391_s11 = inlined_call_operand.vmem [shape: bf16[4,64,16], index: 11, kind: input, shape index: {}]   ;;  %s5392_s3 = inlined_call_operand.vmem [shape: bf16[16,16], index: 3, kind: input, shape index: {}]   ;;  %s5393_s6 = inlined_call_operand.vmem [shape: bf16[64,96], index: 6, kind: input, shape index: {}]   ;;  %s5394_s12 = inlined_call_operand.vmem [shape: bf16[16,64], index: 12, kind: input, shape index: {}]   ;;  %s5395_s7 = inlined_call_operand.vmem [shape: bf16[32,288], index: 7, kind: input, shape index: {}]   ;;  %s5396_s13 = inlined_call_operand.vmem [shape: bf16[64,256], index: 13, kind: input, shape index: {}]   ;;  %s5397_s8 = inlined_call_operand.vmem [shape: bf16[8,144], index: 8, kind: input, shape index: {}]   ;;  %s5398_s14 = inlined_call_operand.vmem [shape: f32[8,256], index: 14, kind: output, shape index: {}]  }
   0x1   :  { %v3155_v0 = vld [vmem:[%s5384_s1 + $0x70] sm:$0xf]  ;;  %v3834_v1 = vld [vmem:[%s5384_s1 + $0x74] sm:$0xf0]  ;;  %v3833_v5 = vld [vmem:[%s5384_s1 + $0x74] sm:$0xf] }
   0x2   :  { %v3219_v2 = vld [vmem:[%s5384_s1 + $0xf0] sm:$0xf]  ;;  %v4077_v3 = vor.u32 %v3834_v1, %v3155_v0  ;;  %v3850_v4 = vld [vmem:[%s5384_s1 + $0xf4] sm:$0xf0]  ;;  %v3157_v6 = vld [vmem:[%s5384_s1 + $0x78] sm:$0xf0] }
   0x3   :  { %v4088_v7 = vor.u32 %v3850_v4, %v3219_v2  ;;  %v4090_v8 = vor.u32 %v3833_v5, %v3157_v6  ;;  %v3849_v9 = vld [vmem:[%s5384_s1 + $0xf4] sm:$0xf]  ;;  %v3221_v10 = vld [vmem:[%s5384_s1 + $0xf8] sm:$0xf0]  ;;  %v3147_v11 = vld [vmem:[%s5384_s1 + $0x60] sm:$0xf] }
   0x4   :  { %262 = vmatpush.bf16.msra.mxu0 %v4077_v3  ;;  %v4102_v12 = vor.u32 %v3849_v9, %v3221_v10  ;;  %v3832_v13 = vld [vmem:[%s5384_s1 + $0x64] sm:$0xf0]  ;;  %v3211_v14 = vld [vmem:[%s5384_s1 + $0xe0] sm:$0xf]  ;;  %v3831_v18 = vld [vmem:[%s5384_s1 + $0x64] sm:$0xf] }
   0x5   :  { %v3848_v15 = vld [vmem:[%s5384_s1 + $0xe4] sm:$0xf0]  ;;  %275 = vmatpush.bf16.msra.mxu1 %v4088_v7  ;;  %288 = vmatpush.bf16.msra.mxu2 %v4090_v8  ;;  %v4115_v16 = vor.u32 %v3832_v13, %v3147_v11  ;;  %v3149_v19 = vld [vmem:[%s5384_s1 + $0x68] sm:$0xf0]  ;;  %v3847_v20 = vld [vmem:[%s5384_s1 + $0xe4] sm:$0xf] }
   0x6   :  { %v4117_v17 = vor.u32 %v3848_v15, %v3211_v14  ;;  %301 = vmatpush.bf16.msra.mxu3 %v4102_v12  ;;  %v4129_v21 = vor.u32 %v3831_v18, %v3149_v19  ;;  %v3213_v22 = vld [vmem:[%s5384_s1 + $0xe8] sm:$0xf0]  ;;  %v3139_v23 = vld [vmem:[%s5384_s1 + $0x50] sm:$0xf]  ;;  %v3830_v24 = vld [vmem:[%s5384_s1 + $0x54] sm:$0xf0] }
   0x7   :  { %v4140_v25 = vor.u32 %v3847_v20, %v3213_v22  ;;  %v3203_v26 = vld [vmem:[%s5384_s1 + $0xd0] sm:$0xf]  ;;  %v3846_v27 = vld [vmem:[%s5384_s1 + $0xd4] sm:$0xf0]  ;;  %v3829_v28 = vld [vmem:[%s5384_s1 + $0x54] sm:$0xf]  ;;  %v4152_v29 = vor.u32 %v3830_v24, %v3139_v23 }
   0x8   :  { %263 = vmatpush.bf16.msra.mxu0 %v4115_v16  ;;  %v3141_v30 = vld [vmem:[%s5384_s1 + $0x58] sm:$0xf0]  ;;  %v3845_v31 = vld [vmem:[%s5384_s1 + $0xd4] sm:$0xf]  ;;  %v4165_v33 = vor.u32 %v3846_v27, %v3203_v26  ;;  %v3131_v35 = vld [vmem:[%s5384_s1 + $0x40] sm:$0xf] }
   0x9   :  { %v3205_v32 = vld [vmem:[%s5384_s1 + $0xd8] sm:$0xf0]  ;;  %276 = vmatpush.bf16.msra.mxu1 %v4117_v17  ;;  %289 = vmatpush.bf16.msra.mxu2 %v4129_v21  ;;  %v4167_v34 = vor.u32 %v3829_v28, %v3141_v30  ;;  %v3828_v36 = vld [vmem:[%s5384_s1 + $0x44] sm:$0xf0]  ;;  %v3195_v37 = vld [vmem:[%s5384_s1 + $0xc0] sm:$0xf] }
   0xa   :  { %302 = vmatpush.bf16.msra.mxu3 %v4140_v25  ;;  %v4179_v38 = vor.u32 %v3845_v31, %v3205_v32  ;;  %v3844_v39 = vld [vmem:[%s5384_s1 + $0xc4] sm:$0xf0]  ;;  %v3827_v40 = vld [vmem:[%s5384_s1 + $0x44] sm:$0xf]  ;;  %v3133_v41 = vld [vmem:[%s5384_s1 + $0x48] sm:$0xf0]  ;;  %v4197_v44 = vor.u32 %v3828_v36, %v3131_v35 }
   0xb   :  { %v3843_v42 = vld [vmem:[%s5384_s1 + $0xc4] sm:$0xf]  ;;  %v3197_v43 = vld [vmem:[%s5384_s1 + $0xc8] sm:$0xf0]  ;;  %v4201_v45 = vor.u32 %v3844_v39, %v3195_v37  ;;  %v4203_v46 = vor.u32 %v3827_v40, %v3133_v41  ;;  %v3123_v47 = vld [vmem:[%s5384_s1 + $0x30] sm:$0xf] }
   0xc   :  { %264 = vmatpush.bf16.msra.mxu0 %v4152_v29  ;;  %v3826_v48 = vld [vmem:[%s5384_s1 + $0x34] sm:$0xf0]  ;;  %v3187_v49 = vld [vmem:[%s5384_s1 + $0xb0] sm:$0xf]  ;;  %v4215_v50 = vor.u32 %v3843_v42, %v3197_v43  ;;  %v3825_v52 = vld [vmem:[%s5384_s1 + $0x34] sm:$0xf] }
   0xd   :  { %277 = vmatpush.bf16.msra.mxu1 %v4165_v33  ;;  %290 = vmatpush.bf16.msra.mxu2 %v4167_v34  ;;  %v3842_v51 = vld [vmem:[%s5384_s1 + $0xb4] sm:$0xf0]  ;;  %v3125_v53 = vld [vmem:[%s5384_s1 + $0x38] sm:$0xf0]  ;;  %v3841_v54 = vld [vmem:[%s5384_s1 + $0xb4] sm:$0xf]  ;;  %v4233_v56 = vor.u32 %v3826_v48, %v3123_v47 }
   0xe   :  { %303 = vmatpush.bf16.msra.mxu3 %v4179_v38  ;;  %v3189_v55 = vld [vmem:[%s5384_s1 + $0xb8] sm:$0xf0]  ;;  %v4237_v57 = vor.u32 %v3842_v51, %v3187_v49  ;;  %v4239_v58 = vor.u32 %v3825_v52, %v3125_v53  ;;  %v3115_v59 = vld [vmem:[%s5384_s1 + $0x20] sm:$0xf]  ;;  %v3824_v60 = vld [vmem:[%s5384_s1 + $0x24] sm:$0xf0] }
   0xf   :  { %v3179_v61 = vld [vmem:[%s5384_s1 + $0xa0] sm:$0xf]  ;;  %v4251_v62 = vor.u32 %v3841_v54, %v3189_v55  ;;  %v3840_v63 = vld [vmem:[%s5384_s1 + $0xa4] sm:$0xf0]  ;;  %v3823_v0 = vld [vmem:[%s5384_s1 + $0x24] sm:$0xf]  ;;  %v4269_v5 = vor.u32 %v3824_v60, %v3115_v59 }
  0x10   :  { %265 = vmatpush.bf16.msra.mxu0 %v4197_v44  ;;  %v3117_v1 = vld [vmem:[%s5384_s1 + $0x28] sm:$0xf0]  ;;  %v3839_v2 = vld [vmem:[%s5384_s1 + $0xa4] sm:$0xf]  ;;  %v3107_v6 = vld [vmem:[%s5384_s1 + $0x10] sm:$0xf]  ;;  %v4279_v10 = vor.u32 %v3840_v63, %v3179_v61 }
  0x11   :  { %278 = vmatpush.bf16.msra.mxu1 %v4201_v45  ;;  %291 = vmatpush.bf16.msra.mxu2 %v4203_v46  ;;  %v3181_v4 = vld [vmem:[%s5384_s1 + $0xa8] sm:$0xf0]  ;;  %v3822_v9 = vld [vmem:[%s5384_s1 + $0x14] sm:$0xf0]  ;;  %v4281_v11 = vor.u32 %v3823_v0, %v3117_v1  ;;  %v3171_v13 = vld [vmem:[%s5384_s1 + $0x90] sm:$0xf] }
  0x12   :  { %304 = vmatpush.bf16.msra.mxu3 %v4215_v50  ;;  %v3838_v14 = vld [vmem:[%s5384_s1 + $0x94] sm:$0xf0]  ;;  %v3821_v15 = vld [vmem:[%s5384_s1 + $0x14] sm:$0xf]  ;;  %v4293_v18 = vor.u32 %v3839_v2, %v3181_v4  ;;  %v3109_v19 = vld [vmem:[%s5384_s1 + $0x18] sm:$0xf0]  ;;  %v4317_v27 = vor.u32 %v3822_v9, %v3107_v6 }
  0x13   :  { %v4301_v20 = vld [vmem:[%s5385_s0] sm:$0xff]  ;;  %v4306_v22 = vld [vmem:[%s5385_s0 + $0x8] sm:$0xff]  ;;  %v3837_v23 = vld [vmem:[%s5384_s1 + $0x94] sm:$0xf]  ;;  %v4321_v28 = vor.u32 %v3838_v14, %v3171_v13  ;;  %v4323_v30 = vor.u32 %v3821_v15, %v3109_v19  ;;  %vm1652_vm15 = vcmask 130048  }
  0x14   :  { %266 = vmatpush.bf16.msra.mxu0 %v4233_v56  ;;  %5417 = vst [vmem:[#allocation2_spill] sm:$0xff] %v4293_v18  ;;  %v3173_v24 = vld [vmem:[%s5384_s1 + $0x98] sm:$0xf0]  ;;  %v94_v26 = vpack.c.bf16 %v4306_v22, %v4301_v20  ;;  %v3099_v31 = vld [vmem:[%s5384_s1] sm:$0xf] }
  0x15   :  { %279 = vmatpush.bf16.msra.mxu1 %v4237_v57  ;;  %292 = vmatpush.bf16.msra.mxu2 %v4239_v58  ;;  %5418 = vst [vmem:[#allocation3_spill] sm:$0xff] %v4323_v30  ;;  %v3820_v32 = vld [vmem:[%s5384_s1 + $0x4] sm:$0xf0]  ;;  %v3163_v35 = vld [vmem:[%s5384_s1 + $0x80] sm:$0xf]  ;;  %v4335_v36 = vor.u32 %v3837_v23, %v3173_v24  ;;  %v3989_v24 = vmov 0  }
  0x16   :  { %305 = vmatpush.bf16.msra.mxu3 %v4251_v62  ;;  %v3836_v37 = vld [vmem:[%s5384_s1 + $0x84] sm:$0xf0]  ;;  %v3819_v39 = vld [vmem:[%s5384_s1 + $0x4] sm:$0xf]  ;;  %v3101_v40 = vld [vmem:[%s5384_s1 + $0x8] sm:$0xf0]  ;;  %v96_v43 = vunpack.c.l.b16 %v94_v26  ;;  %v4353_v47 = vor.u32 %v3820_v32, %v3099_v31  ;;  %v97_v48 = vunpack.c.h.b16 %v94_v26  ;;  %3962 = vset.pattern.permute.xlu0 %v3989_v24 }
  0x17   :  { %5419 = vst [vmem:[#allocation4_spill] sm:$0xff] %v4335_v36  ;;  %v3835_v41 = vld [vmem:[%s5384_s1 + $0x84] sm:$0xf]  ;;  %v3165_v42 = vld [vmem:[%s5384_s1 + $0x88] sm:$0xf0]  ;;  %v4357_v49 = vor.u32 %v3836_v37, %v3163_v35  ;;  %v4359_v51 = vor.u32 %v3819_v39, %v3101_v40  ;;  %3963 = vset.pattern.permute.xlu2 %v3989_v24  ;;  %3964 = vset.pattern.permute.xlu1 %v3989_v24 }
  0x18   :  { %267 = vmatpush.bf16.msra.mxu0 %v4269_v5  ;;  %v4362_v52 = vor.u32 %v3835_v41, %v3165_v42  ;;  %v4364_v53 = vpack.c.b16 %v96_v43, %v96_v43  ;;  %v4367_v54 = vpack.c.b16 %v97_v48, %v97_v48  ;;  %v393_v23 = vld [vmem:[%s5386_s9] sm:$0xff] }
  0x19   :  { %280 = vmatpush.bf16.msra.mxu1 %v4279_v10  ;;  %293 = vmatpush.bf16.msra.mxu2 %v4281_v11  ;;  %5420 = vst [vmem:[#allocation5_spill] sm:$0xff] %v4359_v51 }
  0x1a   :  { %306 = vmatpush.bf16.msra.mxu3 %v4293_v18  ;;  %5421 = vst [vmem:[#allocation6_spill] sm:$0xff] %v4362_v52  ;;  %398 = vperm.xlu0 %3962, %v393_v23  }
  0x1c   :  { %268 = vmatpush.bf16.msra.mxu0 %v4317_v27 }
  0x1d   :  { %281 = vmatpush.bf16.msra.mxu1 %v4321_v28  ;;  %294 = vmatpush.bf16.msra.mxu2 %v4323_v30 }
  0x1e   :  { %307 = vmatpush.bf16.msra.mxu3 %v4335_v36 }
  0x20   :  { %269 = vmatpush.bf16.msra.mxu0 %v4353_v47 }
  0x21   :  { %282 = vmatpush.bf16.msra.mxu1 %v4357_v49  ;;  %295 = vmatpush.bf16.msra.mxu2 %v4359_v51 }
  0x22   :  { %308 = vmatpush.bf16.msra.mxu3 %v4362_v52 }
  0x23   :  { %270 = vmatmul.bf16.vlgmr.msra.gmra.mxu0 %v4364_v53 }
  0x24   :  { %322 = vmatpush.bf16.msrb.mxu0 %v4077_v3  ;;  %283 = vmatmul.bf16.vlgmr.msra.gmra.mxu1 %v4367_v54 }
  0x25   :  { %335 = vmatpush.bf16.msrb.mxu1 %v4088_v7  ;;  %296 = vmatmul.bf16.vlgmr.msra.gmra.mxu2 %v4364_v53 }
  0x26   :  { %309 = vmatmul.bf16.vlgmr.msra.gmra.mxu3 %v4367_v54  ;;  %348 = vmatpush.bf16.msrb.mxu2 %v4090_v8 }
  0x27   :  { %361 = vmatpush.bf16.msrb.mxu3 %v4102_v12 }
  0x28   :  { %323 = vmatpush.bf16.msrb.mxu0 %v4115_v16 }
  0x29   :  { %336 = vmatpush.bf16.msrb.mxu1 %v4117_v17 }
  0x2a   :  { %349 = vmatpush.bf16.msrb.mxu2 %v4129_v21 }
  0x2b   :  { %362 = vmatpush.bf16.msrb.mxu3 %v4140_v25 }
  0x2c   :  { %324 = vmatpush.bf16.msrb.mxu0 %v4152_v29 }
  0x2d   :  { %337 = vmatpush.bf16.msrb.mxu1 %v4165_v33 }
  0x2e   :  { %350 = vmatpush.bf16.msrb.mxu2 %v4167_v34 }
  0x2f   :  { %363 = vmatpush.bf16.msrb.mxu3 %v4179_v38 }
  0x30   :  { %325 = vmatpush.bf16.msrb.mxu0 %v4197_v44 }
  0x31   :  { %338 = vmatpush.bf16.msrb.mxu1 %v4201_v45 }
  0x32   :  { %351 = vmatpush.bf16.msrb.mxu2 %v4203_v46 }
  0x33   :  { %364 = vmatpush.bf16.msrb.mxu3 %v4215_v50 }
  0x34   :  { %326 = vmatpush.bf16.msrb.mxu0 %v4233_v56 }
  0x35   :  { %339 = vmatpush.bf16.msrb.mxu1 %v4237_v57 }
  0x36   :  { %352 = vmatpush.bf16.msrb.mxu2 %v4239_v58 }
  0x37   :  { %365 = vmatpush.bf16.msrb.mxu3 %v4251_v62 }
  0x38   :  { %327 = vmatpush.bf16.msrb.mxu0 %v4269_v5 }
  0x39   :  { %340 = vmatpush.bf16.msrb.mxu1 %v4279_v10 }
  0x3a   :  { %353 = vmatpush.bf16.msrb.mxu2 %v4281_v11 }
  0x3b   :  { %366 = vmatpush.bf16.msrb.mxu3 %v4293_v18 }
  0x3c   :  { %328 = vmatpush.bf16.msrb.mxu0 %v4317_v27 }
  0x3d   :  { %341 = vmatpush.bf16.msrb.mxu1 %v4321_v28 }
  0x3e   :  { %354 = vmatpush.bf16.msrb.mxu2 %v4323_v30 }
  0x3f   :  { %367 = vmatpush.bf16.msrb.mxu3 %v4335_v36 }
  0x40   :  { %329 = vmatpush.bf16.msrb.mxu0 %v4353_v47 }
  0x41   :  { %342 = vmatpush.bf16.msrb.mxu1 %v4357_v49 }
  0x42   :  { %355 = vmatpush.bf16.msrb.mxu2 %v4359_v51 }
  0x43   :  { %368 = vmatpush.bf16.msrb.mxu3 %v4362_v52 }
  0xa0   :  { %v271_v55 = vpop.f32.mrf.mxu0 }
  0xa1   :  { %v284_v59 = vpop.f32.mrf.mxu1 }
  0xa2   :  { %v285_v60 = vadd.f32 %v284_v59, %v271_v55 }
  0xa8   :  { %v297_v61 = vpop.f32.mrf.mxu2  ;;  %v273_v0 = vpop.f32.mrf.mxu0 }
  0xa9   :  { %v310_v63 = vpop.f32.mrf.mxu3  ;;  %v286_v2 = vpop.f32.mrf.mxu1 }
  0xaa   :  { %v311_v1 = vadd.f32 %v310_v63, %v297_v61 }
  0xac   :  { %v314_v4 = vpack.c.bf16 %v311_v1, %v285_v60 }
  0xae   :  { %v316_v6 = vunpack.c.l.b16 %v314_v4  ;;  %v317_v9 = vunpack.c.h.b16 %v314_v4 }
  0xb0   :  { %v299_v13 = vpop.f32.mrf.mxu2  ;;  %v318_v14 = vpack.c.b16 %v316_v6, %v316_v6  ;;  %v319_v15 = vpack.c.b16 %v317_v9, %v317_v9 }
  0xb1   :  { %v312_v19 = vpop.f32.mrf.mxu3 }
  0xb2   :  { %330 = vmatmul.bf16.vlgmr.msrb.gmra.mxu0 %v318_v14  ;;  %343 = vmatmul.bf16.vlgmr.msrb.gmra.mxu1 %v319_v15  ;;  %v387_v9 = vsel %vm384_vm0, %v4364_v53, %v318_v14  ;;  %v391_v13 = vsel %vm384_vm0, %v4367_v54, %v319_v15  ;;  %v399_v19 = vpop.permute.xlu0 %398 }
  0xb3   :  { %356 = vmatmul.bf16.vlgmr.msrb.gmra.mxu2 %v318_v14  ;;  %369 = vmatmul.bf16.vlgmr.msrb.gmra.mxu3 %v319_v15 }
 0x12f   :  { %v331_v26 = vpop.f32.mrf.mxu0  ;;  %v344_v31 = vpop.f32.mrf.mxu1 }
 0x130   :  { %v345_v32 = vadd.f32 %v344_v31, %v331_v26 }
 0x132   :  { %v374_v39 = vmul.f32 2.0, %v345_v32 }
 0x134   :  { %v376_v48 = vsub.f32 %v374_v39, %v4301_v20  ;;  %v3856_v20 = vld [vmem:[%s5387_s4] sm:$0xff] }
 0x136   :  { %v357_v35 = vpop.f32.mrf.mxu2  ;;  %v370_v37 = vpop.f32.mrf.mxu3 }
 0x137   :  { %v371_v40 = vadd.f32 %v370_v37, %v357_v35  ;;  %v333_v41 = vpop.f32.mrf.mxu0  ;;  %v346_v42 = vpop.f32.mrf.mxu1 }
 0x139   :  { %v375_v43 = vmul.f32 2.0, %v371_v40 }
 0x13b   :  { %v377_v55 = vsub.f32 %v375_v43, %v4306_v22  ;;  %v3990_v43 = vmov 512.0  }
 0x13c   :  { %3965 = vrcp.f32 %v3990_v43  ;;  %v3887_v43 = vld [vmem:[%s5388_s10 + $0xf0] sm:$0xff] }
 0x13d   :  { %v378_v59 = vpack.c.bf16 %v377_v55, %v376_v48 }
 0x13e   :  { %v359_v60 = vpop.f32.mrf.mxu2  ;;  %v372_v61 = vpop.f32.mrf.mxu3 }
 0x13f   :  { %v380_v63 = vunpack.c.l.b16 %v378_v59  ;;  %v381_v0 = vunpack.c.h.b16 %v378_v59 }
 0x141   :  { %v382_v1 = vpack.c.b16 %v380_v63, %v380_v63  ;;  %v383_v2 = vpack.c.b16 %v381_v0, %v381_v0 }
 0x142   :  { %v3966_v48 = vpop.eup %3965 }
 0x143   :  { %v411_v4 = vsel %vm384_vm0, %v382_v1, 0  ;;  %v414_v6 = vsel %vm384_vm0, %v383_v2, 0  ;;  %v463_v55 = vmul.f32 512.0, %v3966_v48  ;;  %vm467_vm2 = vweird.f32 %v3966_v48 }
 0x144   :  { %422 = vmatpush.bf16.msra.mxu3 %v411_v4  ;;  %436 = vmatpush.bf16.msra.mxu1 %v414_v6  ;;  %vm1797_vm0 = vcmask 785408  }
 0x145   :  { %v464_v59 = vsub.f32 1.0, %v463_v55  ;;  %v3862_v55 = vld [vmem:[%s5388_s10 + $0x28] sm:$0xff] }
 0x147   :  { %v465_v60 = vmul.f32 %v3966_v48, %v464_v59  ;;  %v3870_v59 = vld [vmem:[%s5388_s10 + $0x68] sm:$0xff] }
 0x148   :  { %423 = vmatpush.bf16.msra.mxu3 %v387_v9  ;;  %437 = vmatpush.bf16.msra.mxu1 %v391_v13 }
 0x149   :  { %v466_v61 = vadd.f32 %v3966_v48, %v465_v60 }
 0x14b   :  { %3229 = vmatmul.msk.bf16.vlgmr.msra.gmra.mxu3 %vm406_vm1, %v3856_v20  ;;  %3230 = vmatmul.msk.bf16.vlgmr.msra.gmra.mxu1 %vm406_vm1, %v3856_v20  ;;  %v468_v2 = vsel %vm467_vm2, %v3966_v48, %v466_v61  ;;  %v3878_v61 = vld [vmem:[%s5388_s10 + $0xa8] sm:$0xff] }
 0x1c8   :  { %v439_v22 = vpop.f32.mrf.mxu1 }
 0x1c9   :  { %v4418_v23 = vadd.f32 %v439_v22, %v399_v19 }
 0x1cb   :  { %v451_v41 = vmul.f32 %v4418_v23, %v4418_v23 }
 0x1ce   :  { %v425_v24 = vpop.f32.mrf.mxu3 }
 0x1cf   :  { %v4420_v26 = vadd.f32 %v425_v24, %v399_v19 }
 0x1d0   :  { %v441_v54 = vpop.f32.mrf.mxu1 }
 0x1d1   :  { %v444_v53 = vadd.f32 %v4418_v23, %v4420_v26  ;;  %v4424_v14 = vadd.f32 %v441_v54, %v399_v19  ;;  %v450_v40 = vmul.f32 %v4420_v26, %v4420_v26  ;;  %v3864_v54 = vld [vmem:[%s5388_s10 + $0x38] sm:$0xff] }
 0x1d2   :  { %640 = vmatpush.bf16.msra.mxu2 %v3864_v54  ;;  %v3877_v54 = vld [vmem:[%s5388_s10 + $0xa0] sm:$0xff] }
 0x1d3   :  { %445 = vadd.xlane.f32.xlu0 %v444_v53  ;;  %v453_v37 = vmul.f32 %v4424_v14, %v4424_v14  ;;  %v454_v42 = vadd.f32 %v451_v41, %v450_v40  ;;  %v3871_v40 = vld [vmem:[%s5388_s10 + $0x70] sm:$0xff] }
 0x1d6   :  { %v427_v15 = vpop.f32.mrf.mxu3 }
 0x1d7   :  { %v4426_v31 = vadd.f32 %v427_v15, %v399_v19  ;;  %v3872_v15 = vld [vmem:[%s5388_s10 + $0x78] sm:$0xff] }
 0x1d8   :  { %654 = vmatpush.bf16.msrb.mxu3 %v3872_v15  ;;  %v3885_v15 = vld [vmem:[%s5388_s10 + $0xe0] sm:$0xff] }
 0x1d9   :  { %v447_v32 = vadd.f32 %v4424_v14, %v4426_v31  ;;  %v452_v35 = vmul.f32 %v4426_v31, %v4426_v31 }
 0x1db   :  { %448 = vadd.xlane.f32.xlu1 %v447_v32  ;;  %v457_v39 = vadd.f32 %v453_v37, %v452_v35  ;;  %v3880_v32 = vld [vmem:[%s5388_s10 + $0xb8] sm:$0xff] }
 0x1dc   :  { %v3888_v35 = vld [vmem:[%s5388_s10 + $0xf8] sm:$0xff]  ;;  %797 = vmatpush.bf16.msra.mxu0 %v3880_v32  ;;  %655 = vmatpush.bf16.msrb.mxu3 %v3871_v40  ;;  %v3859_v40 = vld [vmem:[%s5388_s10 + $0x10] sm:$0xff] }
 0x1dd   :  { %458 = vadd.xlane.f32.xlu2 %v457_v39  ;;  %v3863_v39 = vld [vmem:[%s5388_s10 + $0x30] sm:$0xff]  ;;  %811 = vmatpush.bf16.msrb.mxu1 %v3888_v35  ;;  %v3860_v32 = vld [vmem:[%s5388_s10 + $0x18] sm:$0xff] }
 0x1de   :  { %641 = vmatpush.bf16.msra.mxu2 %v3863_v39  ;;  %v3868_v35 = vld [vmem:[%s5388_s10 + $0x58] sm:$0xff] }
 0x1df   :  { %v3884_v39 = vld [vmem:[%s5388_s10 + $0xd8] sm:$0xff] }
 0x1e0   :  { %656 = vmatpush.bf16.msrb.mxu3 %v3870_v59  ;;  %v3874_v59 = vld [vmem:[%s5388_s10 + $0x88] sm:$0xff] }
 0x1e1   :  { %812 = vmatpush.bf16.msrb.mxu1 %v3887_v43  ;;  %v3883_v43 = vld [vmem:[%s5388_s10 + $0xd0] sm:$0xff] }
 0x1e2   :  { %642 = vmatpush.bf16.msra.mxu2 %v3862_v55  ;;  %v3866_v55 = vld [vmem:[%s5388_s10 + $0x48] sm:$0xff] }
 0x1e3   :  { %455 = vadd.xlane.f32.xlu1 %v454_v42  ;;  %v3879_v42 = vld [vmem:[%s5388_s10 + $0xb0] sm:$0xff] }
 0x1e4   :  { %798 = vmatpush.bf16.msra.mxu0 %v3879_v42  ;;  %v3875_v42 = vld [vmem:[%s5388_s10 + $0x90] sm:$0xff] }
 0x1e8   :  { %799 = vmatpush.bf16.msra.mxu0 %v3878_v61  ;;  %v3857_v61 = vld [vmem:[%s5388_s10] sm:$0xff] }
 0x1ec   :  { %800 = vmatpush.bf16.msra.mxu0 %v3877_v54  ;;  %v3910_v54 = vld [vmem:[%s5388_s10 + $0x1a8] sm:$0xff] }
 0x246   :  { %v446_v0 = vpop.xlane.xlu0 %445 }
 0x24e   :  { %v449_v63 = vpop.xlane.xlu1 %448 }
 0x24f   :  { %v460_v1 = vadd.f32 %v449_v63, %v446_v0  ;;  %v3886_v63 = vld [vmem:[%s5388_s10 + $0xe8] sm:$0xff] }
 0x250   :  { %v459_v6 = vpop.xlane.xlu2 %458  ;;  %813 = vmatpush.bf16.msrb.mxu1 %v3886_v63  ;;  %v3865_v63 = vld [vmem:[%s5388_s10 + $0x40] sm:$0xff] }
 0x251   :  { %v469_v4 = vmul.f32 %v468_v2, %v460_v1  ;;  %v394_v1 = vld [vmem:[%s5386_s9 + $0x8] sm:$0xff] }
 0x253   :  { %v471_v20 = vmul.f32 %v469_v4, %v469_v4 }
 0x254   :  { %814 = vmatpush.bf16.msrb.mxu1 %v3885_v15  ;;  %v3918_v15 = vld [vmem:[%s5388_s10 + $0x1e8] sm:$0xff] }
 0x256   :  { %v456_v9 = vpop.xlane.xlu1 %455 }
 0x257   :  { %v461_v13 = vadd.f32 %v459_v6, %v456_v9 }
 0x258   :  { %815 = vmatpush.bf16.msrb.mxu1 %v3884_v39  ;;  %v3917_v39 = vld [vmem:[%s5388_s10 + $0x1e0] sm:$0xff] }
 0x259   :  { %v470_v22 = vmul.f32 %v468_v2, %v461_v13  ;;  %v395_v13 = vld [vmem:[%s5386_s9 + $0x10] sm:$0xff] }
 0x25b   :  { %v472_v19 = vsub.f32 %v470_v22, %v471_v20 }
 0x25c   :  { %816 = vmatpush.bf16.msrb.mxu1 %v3883_v43  ;;  %v3916_v43 = vld [vmem:[%s5388_s10 + $0x1d8] sm:$0xff] }
 0x25d   :  { %v473_v24 = vmax.f32 %v472_v19, 0.0  ;;  %v1236_v19 = vld [vmem:[%s5386_s9 + $0x18] sm:$0xff] }
 0x25f   :  { %v474_v53 = vadd.f32 1e-05, %v473_v24  ;;  %v1237_v24 = vld [vmem:[%s5386_s9 + $0x20] sm:$0xff] }
 0x261   :  { %3967 = vrsqrt.f32 %v474_v53  ;;  %vm481_vm4 = vweird.f32 %v474_v53 }
 0x267   :  { %v3968_v37 = vpop.eup %3967 }
 0x268   :  { %v476_v41 = vmul.f32 %v3968_v37, %v474_v53  ;;  %vm482_vm3 = vweird.f32 %v3968_v37  ;;  %v3861_v53 = vld [vmem:[%s5388_s10 + $0x20] sm:$0xff] }
 0x269   :  { %vm483_vm5 = vmor %vm481_vm4, %vm482_vm3  ;;  %643 = vmatpush.bf16.msra.mxu2 %v3861_v53  ;;  %v3894_v53 = vld [vmem:[%s5388_s10 + $0x128] sm:$0xff] }
 0x26a   :  { %v477_v48 = vmul.f32 %v3968_v37, %v476_v41  ;;  %v3867_v41 = vld [vmem:[%s5388_s10 + $0x50] sm:$0xff] }
 0x26c   :  { %v478_v60 = vmul.f32 0.5, %v477_v48  ;;  %v3858_v48 = vld [vmem:[%s5388_s10 + $0x8] sm:$0xff] }
 0x26d   :  { %644 = vmatpush.bf16.msra.mxu2 %v3860_v32  ;;  %v3893_v32 = vld [vmem:[%s5388_s10 + $0x120] sm:$0xff] }
 0x26e   :  { %v479_v0 = vsub.f32 1.5, %v478_v60  ;;  %v3882_v60 = vld [vmem:[%s5388_s10 + $0xc8] sm:$0xff] }
 0x26f   :  { %817 = vmatpush.bf16.msrb.mxu1 %v3882_v60  ;;  %v3915_v60 = vld [vmem:[%s5388_s10 + $0x1d0] sm:$0xff] }
 0x270   :  { %v480_v2 = vmul.f32 %v3968_v37, %v479_v0  ;;  %v3873_v0 = vld [vmem:[%s5388_s10 + $0x80] sm:$0xff] }
 0x271   :  { %645 = vmatpush.bf16.msra.mxu2 %v3859_v40  ;;  %v3892_v40 = vld [vmem:[%s5388_s10 + $0x118] sm:$0xff] }
 0x272   :  { %v484_v6 = vsel %vm483_vm5, %v3968_v37, %v480_v2  ;;  %v3876_v37 = vld [vmem:[%s5388_s10 + $0x98] sm:$0xff] }
 0x273   :  { %v485_v9 = vmul.f32 %v484_v6, %v394_v1  ;;  %801 = vmatpush.bf16.msra.mxu0 %v3876_v37  ;;  %v3881_v1 = vld [vmem:[%s5388_s10 + $0xc0] sm:$0xff]  ;;  %v3896_v2 = vld [vmem:[%s5388_s10 + $0x138] sm:$0xff] }
 0x274   :  { %v3904_v6 = vld [vmem:[%s5388_s10 + $0x178] sm:$0xff]  ;;  %818 = vmatpush.bf16.msrb.mxu1 %v3881_v1  ;;  %v3909_v37 = vld [vmem:[%s5388_s10 + $0x1a0] sm:$0xff]  ;;  %v3914_v1 = vld [vmem:[%s5388_s10 + $0x1c8] sm:$0xff] }
 0x275   :  { %490 = vperm.xlu2 %3963, %v485_v9   ;;  %v486_v20 = vmul.f32 %v485_v9, %v469_v4  ;;  %v3869_v4 = vld [vmem:[%s5388_s10 + $0x60] sm:$0xff]  ;;  %646 = vmatpush.bf16.msra.mxu2 %v3858_v48  ;;  %v3912_v9 = vld [vmem:[%s5388_s10 + $0x1b8] sm:$0xff]  ;;  %v3891_v48 = vld [vmem:[%s5388_s10 + $0x110] sm:$0xff] }
 0x276   :  { %657 = vmatpush.bf16.msrb.mxu3 %v3869_v4  ;;  %v3902_v4 = vld [vmem:[%s5388_s10 + $0x168] sm:$0xff] }
 0x277   :  { %v487_v22 = vsub.f32 %v395_v13, %v486_v20  ;;  %802 = vmatpush.bf16.msra.mxu0 %v3875_v42  ;;  %v3920_v13 = vld [vmem:[%s5388_s10 + $0x1f8] sm:$0xff]  ;;  %v3895_v20 = vld [vmem:[%s5388_s10 + $0x130] sm:$0xff] }
 0x278   :  { %1129 = vmatpush.bf16.msra.mxu1 %v3920_v13  ;;  %v3908_v42 = vld [vmem:[%s5388_s10 + $0x198] sm:$0xff]  ;;  %v3913_v13 = vld [vmem:[%s5388_s10 + $0x1c0] sm:$0xff] }
 0x279   :  { %499 = vperm.xlu1 %3964, %v487_v22   ;;  %647 = vmatpush.bf16.msra.mxu2 %v3857_v61  ;;  %v3903_v22 = vld [vmem:[%s5388_s10 + $0x170] sm:$0xff]  ;;  %v3890_v61 = vld [vmem:[%s5388_s10 + $0x108] sm:$0xff] }
 0x27a   :  { %658 = vmatpush.bf16.msrb.mxu3 %v3868_v35  ;;  %v3901_v35 = vld [vmem:[%s5388_s10 + $0x160] sm:$0xff] }
 0x27b   :  { %803 = vmatpush.bf16.msra.mxu0 %v3874_v59  ;;  %v3907_v59 = vld [vmem:[%s5388_s10 + $0x190] sm:$0xff] }
 0x27d   :  { %1244 = vperm.xlu2 %3963, %v1236_v19   ;;  %956 = vmatpush.bf16.msrb.mxu2 %v3896_v2  ;;  %v3911_v19 = vld [vmem:[%s5388_s10 + $0x1b0] sm:$0xff]  ;;  %v3889_v2 = vld [vmem:[%s5388_s10 + $0x100] sm:$0xff] }
 0x27e   :  { %659 = vmatpush.bf16.msrb.mxu3 %v3867_v41  ;;  %v3900_v41 = vld [vmem:[%s5388_s10 + $0x158] sm:$0xff] }
 0x27f   :  { %804 = vmatpush.bf16.msra.mxu0 %v3873_v0  ;;  %v3906_v0 = vld [vmem:[%s5388_s10 + $0x188] sm:$0xff] }
 0x281   :  { %957 = vmatpush.bf16.msrb.mxu2 %v3895_v20 }
 0x282   :  { %660 = vmatpush.bf16.msrb.mxu3 %v3866_v55  ;;  %v3899_v55 = vld [vmem:[%s5388_s10 + $0x150] sm:$0xff] }
 0x283   :  { %1115 = vmatpush.bf16.msrb.mxu0 %v3912_v9  ;;  %v3905_v9 = vld [vmem:[%s5388_s10 + $0x180] sm:$0xff] }
 0x285   :  { %1249 = vperm.xlu2 %3963, %v1237_v24   ;;  %v3919_v24 = vld [vmem:[%s5388_s10 + $0x1f0] sm:$0xff]  ;;  %958 = vmatpush.bf16.msrb.mxu2 %v3894_v53 }
 0x286   :  { %661 = vmatpush.bf16.msrb.mxu3 %v3865_v63  ;;  %1130 = vmatpush.bf16.msra.mxu1 %v3919_v24  ;;  %v3898_v63 = vld [vmem:[%s5388_s10 + $0x148] sm:$0xff] }
 0x287   :  { %1116 = vmatpush.bf16.msrb.mxu0 %v3911_v19 }
 0x289   :  { %959 = vmatpush.bf16.msrb.mxu2 %v3893_v32 }
 0x28a   :  { %970 = vmatpush.bf16.msra.mxu3 %v3904_v6  ;;  %1131 = vmatpush.bf16.msra.mxu1 %v3918_v15  ;;  %v3897_v6 = vld [vmem:[%s5388_s10 + $0x140] sm:$0xff] }
 0x28b   :  { %1117 = vmatpush.bf16.msrb.mxu0 %v3910_v54 }
 0x28d   :  { %960 = vmatpush.bf16.msrb.mxu2 %v3892_v40 }
 0x28e   :  { %971 = vmatpush.bf16.msra.mxu3 %v3903_v22  ;;  %1132 = vmatpush.bf16.msra.mxu1 %v3917_v39 }
 0x28f   :  { %1118 = vmatpush.bf16.msrb.mxu0 %v3909_v37 }
 0x291   :  { %961 = vmatpush.bf16.msrb.mxu2 %v3891_v48  ;;  %v4675_v48 = vld [vmem:[%s5389_s2 + $0x8] sm:$0xff] }
 0x292   :  { %972 = vmatpush.bf16.msra.mxu3 %v3902_v4  ;;  %1133 = vmatpush.bf16.msra.mxu1 %v3916_v43 }
 0x293   :  { %1119 = vmatpush.bf16.msrb.mxu0 %v3908_v42 }
 0x295   :  { %962 = vmatpush.bf16.msrb.mxu2 %v3890_v61 }
 0x296   :  { %973 = vmatpush.bf16.msra.mxu3 %v3901_v35  ;;  %1134 = vmatpush.bf16.msra.mxu1 %v3915_v60  ;;  %v4682_v60 = vld [vmem:[%s5389_s2] sm:$0xff] }
 0x297   :  { %1120 = vmatpush.bf16.msrb.mxu0 %v3907_v59 }
 0x299   :  { %963 = vmatpush.bf16.msrb.mxu2 %v3889_v2 }
 0x29a   :  { %974 = vmatpush.bf16.msra.mxu3 %v3900_v41  ;;  %1135 = vmatpush.bf16.msra.mxu1 %v3914_v1 }
 0x29b   :  { %1121 = vmatpush.bf16.msrb.mxu0 %v3906_v0 }
 0x29e   :  { %975 = vmatpush.bf16.msra.mxu3 %v3899_v55  ;;  %1136 = vmatpush.bf16.msra.mxu1 %v3913_v13 }
 0x29f   :  { %1122 = vmatpush.bf16.msrb.mxu0 %v3905_v9 }
 0x2a2   :  { %976 = vmatpush.bf16.msra.mxu3 %v3898_v63 }
 0x2a6   :  { %977 = vmatpush.bf16.msra.mxu3 %v3897_v6 }
 0x2cf   :  { %v491_v20 = vpop.permute.xlu2 %490 }
 0x2d0   :  { %v493_v22 = vmul.f32 %v491_v20, %v4420_v26  ;;  %v494_v19 = vmul.f32 %v491_v20, %v4418_v23  ;;  %v495_v24 = vmul.f32 %v491_v20, %v4426_v31  ;;  %v496_v53 = vmul.f32 %v491_v20, %v4424_v14  ;;  %v4661_v14 = vld [vmem:[%s5389_s2 + $0x18] sm:$0xff]  ;;  %v4668_v31 = vld [vmem:[%s5389_s2 + $0x10] sm:$0xff] }
 0x2eb   :  { %v500_v4 = vpop.permute.xlu1 %499 }
 0x2ec   :  { %v502_v54 = vadd.f32 %v500_v4, %v493_v22  ;;  %v503_v15 = vadd.f32 %v500_v4, %v494_v19  ;;  %v504_v32 = vadd.f32 %v500_v4, %v495_v24  ;;  %v505_v35 = vadd.f32 %v500_v4, %v496_v53 }
 0x2ee   :  { %v4646_v37 = vmax.f32 %v502_v54, 0.0  ;;  %v4648_v39 = vmax.f32 %v503_v15, 0.0  ;;  %v4650_v40 = vmax.f32 %v504_v32, 0.0  ;;  %v4652_v41 = vmax.f32 %v505_v35, 0.0 }
 0x2f0   :  { %5422 = vst [vmem:[#allocation7_spill] sm:$0xff] %v4646_v37  ;;  %v510_v23 = vpack.c.bf16 %v4650_v40, %v4646_v37  ;;  %v511_v26 = vpack.c.bf16 %v4652_v41, %v4648_v39 }
 0x2f1   :  { %5423 = vst [vmem:[#allocation8_spill] sm:$0xff] %v4648_v39 }
 0x2f2   :  { %5424 = vst [vmem:[#allocation9_spill] sm:$0xff] %v4650_v40  ;;  %648 = vmatmul.bf16.vlgmr.msra.gmra.mxu2 %v510_v23  ;;  %662 = vmatmul.bf16.vlgmr.msrb.gmra.mxu3 %v511_v26 }
 0x2f3   :  { %5425 = vst [vmem:[#allocation10_spill] sm:$0xff] %v4652_v41  ;;  %805 = vmatmul.bf16.vlgmr.msra.gmra.mxu0 %v510_v23  ;;  %819 = vmatmul.bf16.vlgmr.msrb.gmra.mxu1 %v511_v26 }
 0x2f4   :  { %1188 = vmatpush.bf16.msra.mxu2 %v4661_v14  ;;  %1212 = vmatpush.bf16.msrb.mxu3 %v4661_v14 }
 0x2f8   :  { %1189 = vmatpush.bf16.msra.mxu2 %v4668_v31  ;;  %1213 = vmatpush.bf16.msrb.mxu3 %v4668_v31 }
 0x2fc   :  { %1190 = vmatpush.bf16.msra.mxu2 %v4675_v48  ;;  %1214 = vmatpush.bf16.msrb.mxu3 %v4675_v48 }
 0x300   :  { %1191 = vmatpush.bf16.msra.mxu2 %v4682_v60  ;;  %1215 = vmatpush.bf16.msrb.mxu3 %v4682_v60 }
 0x302   :  { %964 = vmatmul.bf16.vlgmr.msrb.gmra.mxu2 %v510_v23  ;;  %978 = vmatmul.bf16.vlgmr.msra.gmra.mxu3 %v511_v26 }
 0x303   :  { %1123 = vmatmul.bf16.vlgmr.msrb.gmra.mxu0 %v510_v23  ;;  %1137 = vmatmul.bf16.vlgmr.msra.gmra.mxu1 %v511_v26 }
 0x370   :  { %v806_v42 = vpop.f32.mrf.mxu0  ;;  %v820_v43 = vpop.f32.mrf.mxu1 }
 0x371   :  { %v821_v22 = vadd.f32 %v820_v43, %v806_v42 }
 0x375   :  { %v649_v55 = vpop.f32.mrf.mxu2  ;;  %v663_v59 = vpop.f32.mrf.mxu3 }
 0x376   :  { %v664_v9 = vadd.f32 %v663_v59, %v649_v55 }
 0x378   :  { %v808_v61 = vpop.f32.mrf.mxu0  ;;  %v822_v63 = vpop.f32.mrf.mxu1  ;;  %v825_v24 = vmax.f32 %v664_v9, %v821_v22 }
 0x379   :  { %v823_v54 = vadd.f32 %v822_v63, %v808_v61 }
 0x37d   :  { %v651_v0 = vpop.f32.mrf.mxu2  ;;  %v665_v1 = vpop.f32.mrf.mxu3 }
 0x37e   :  { %v666_v53 = vadd.f32 %v665_v1, %v651_v0 }
 0x380   :  { %v1124_v2 = vpop.f32.mrf.mxu0  ;;  %v1138_v6 = vpop.f32.mrf.mxu1  ;;  %v826_v41 = vmax.f32 %v666_v53, %v823_v54  ;;  %v3921_v53 = vld [vmem:[%s5390_s5] sm:$0xff] }
 0x381   :  { %v1139_v15 = vadd.f32 %v1138_v6, %v1124_v2 }
 0x385   :  { %v965_v13 = vpop.f32.mrf.mxu2  ;;  %v979_v20 = vpop.f32.mrf.mxu3 }
 0x386   :  { %v980_v19 = vadd.f32 %v979_v20, %v965_v13 }
 0x388   :  { %v984_v4 = vmax.f32 %v825_v24, %v980_v19  ;;  %v1126_v32 = vpop.f32.mrf.mxu0  ;;  %v1140_v35 = vpop.f32.mrf.mxu1 }
 0x389   :  { %v1141_v37 = vadd.f32 %v1140_v35, %v1126_v32 }
 0x38a   :  { %v1143_v40 = vmax.f32 %v984_v4, %v1139_v15  ;;  %v1245_v4 = vpop.permute.xlu2 %1244 }
 0x38c   :  { %v1149_v51 = vpack.c.bf16 %v1143_v40, %v1143_v40 }
 0x38d   :  { %v967_v23 = vpop.f32.mrf.mxu2  ;;  %v981_v26 = vpop.f32.mrf.mxu3 }
 0x38e   :  { %v982_v39 = vadd.f32 %v981_v26, %v967_v23  ;;  %v1153_v36 = vunpack.c.l.b16 %v1149_v51 }
 0x390   :  { %v985_v52 = vmax.f32 %v826_v41, %v982_v39 }
 0x392   :  { %v1144_v55 = vmax.f32 %v985_v52, %v1141_v37  ;;  %v1250_v26 = vpop.permute.xlu2 %1249 }
 0x394   :  { %v1150_v59 = vpack.c.bf16 %v1144_v55, %v1144_v55 }
 0x396   :  { %v1154_v42 = vunpack.c.l.b16 %v1150_v59 }
 0x398   :  { %v1155_v43 = vpack.c.b16 %v1154_v42, %v1153_v36 }
 0x39a   :  { %3599 = vmatmul.msk.bf16.vlgmr.msra.gmra.mxu2 %vm1180_vm6, %v1155_v43 }
 0x41d   :  { %v1193_v61 = vpop.f32.mrf.mxu2 }
 0x41e   :  { %v1198_v63 = vpack.c.bf16 %v1193_v61, %v1193_v61 }
 0x420   :  { %v1202_v2 = vunpack.c.l.b16 %v1198_v63 }
 0x425   :  { %v1195_v0 = vpop.f32.mrf.mxu2 }
 0x426   :  { %v1199_v1 = vpack.c.bf16 %v1195_v0, %v1195_v0 }
 0x428   :  { %v1203_v6 = vunpack.c.l.b16 %v1199_v1 }
 0x42a   :  { %v1204_v9 = vpack.c.b16 %v1203_v6, %v1202_v2 }
 0x42c   :  { %3600 = vmatmul.msk.bf16.vlgmr.msrb.gmra.mxu3 %vm1180_vm6, %v1204_v9 }
 0x4af   :  { %v1217_v13 = vpop.f32.mrf.mxu3 }
 0x4b0   :  { %v1222_v39 = vmul.f32 2.0, %v1217_v13 }
 0x4b2   :  { %v1224_v41 = vsub.f32 %v1222_v39, %v1143_v40  ;;  %v3922_v40 = vld [vmem:[%s5390_s5 + $0x8] sm:$0xff] }
 0x4b4   :  { %v1226_v51 = vpack.c.bf16 %v1224_v41, %v1224_v41 }
 0x4b6   :  { %v1232_v36 = vunpack.c.l.b16 %v1226_v51  ;;  %v3991_v51 = vmov 128.0  }
 0x4b7   :  { %v1219_v52 = vpop.f32.mrf.mxu3  ;;  %3969 = vrcp.f32 %v3991_v51 }
 0x4b8   :  { %v1223_v37 = vmul.f32 2.0, %v1219_v52 }
 0x4ba   :  { %v1225_v20 = vsub.f32 %v1223_v37, %v1144_v55 }
 0x4bc   :  { %v1227_v22 = vpack.c.bf16 %v1225_v20, %v1225_v20 }
 0x4bd   :  { %v3970_v20 = vpop.eup %3969 }
 0x4be   :  { %v1233_v19 = vunpack.c.l.b16 %v1227_v22  ;;  %vm1325_vm8 = vweird.f32 %v3970_v20 }
 0x4c0   :  { %v1234_v24 = vpack.c.b16 %v1233_v19, %v1232_v36  ;;  %v1321_v36 = vmul.f32 128.0, %v3970_v20 }
 0x4c2   :  { %1274 = vmatpush.bf16.msra.mxu0 %v1234_v24  ;;  %v1322_v19 = vsub.f32 1.0, %v1321_v36 }
 0x4c6   :  { %1275 = vmatpush.bf16.msra.mxu0 %v1204_v9 }
 0x4ca   :  { %1276 = vmatpush.bf16.msra.mxu0 %v1155_v43 }
 0x4cd   :  { %3609 = vmatmul.msk.bf16.vlgmr.msra.gmra.mxu0 %vm1262_vm7, %v3921_v53 }
 0x4dd   :  { %3610 = vmatmul.msk.bf16.gmra.mxu0 %vm1262_vm7, %v3922_v40  ;;  %v1323_v40 = vmul.f32 %v3970_v20, %v1322_v19 }
 0x54a   :  { %v1278_v54 = vpop.f32.mrf.mxu0 }
 0x54b   :  { %v4694_v15 = vadd.f32 %v1278_v54, %v1245_v4 }
 0x54d   :  { %v1288_v32 = vsel %vm1180_vm6, %v4694_v15, 0.0  ;;  %v1300_v35 = vmul.f32 %v4694_v15, %v4694_v15 }
 0x54e   :  { %1289 = vadd.xlane.f32.xlu1 %v1288_v32 }
 0x54f   :  { %v1304_v23 = vsel %vm1180_vm6, %v1300_v35, 0.0 }
 0x550   :  { %1305 = vadd.xlane.f32.xlu0 %v1304_v23 }
 0x552   :  { %v1280_v55 = vpop.f32.mrf.mxu0 }
 0x553   :  { %v4701_v59 = vadd.f32 %v1280_v55, %v1250_v26 }
 0x555   :  { %v1291_v42 = vsel %vm1180_vm6, %v4701_v59, 0.0  ;;  %v1301_v43 = vmul.f32 %v4701_v59, %v4701_v59 }
 0x556   :  { %1292 = vadd.xlane.f32.xlu2 %v1291_v42 }
 0x557   :  { %v1307_v61 = vsel %vm1180_vm6, %v1301_v43, 0.0 }
 0x558   :  { %1308 = vadd.xlane.f32.xlu0 %v1307_v61 }
 0x55a   :  { %v1283_v63 = vpop.f32.mrf.mxu0 }
 0x55b   :  { %v4708_v0 = vadd.f32 %v1283_v63, %v1245_v4  ;;  %v1324_v4 = vadd.f32 %v3970_v20, %v1323_v40 }
 0x55d   :  { %v1294_v1 = vsel %vm1180_vm6, %v4708_v0, 0.0  ;;  %v1302_v41 = vmul.f32 %v4708_v0, %v4708_v0  ;;  %v4722_v55 = vsel %vm1325_vm8, %v3970_v20, %v1324_v4 }
 0x55f   :  { %v1310_v52 = vsel %vm1180_vm6, %v1302_v41, 0.0 }
 0x560   :  { %1295 = vadd.xlane.f32.xlu0 %v1294_v1 }
 0x562   :  { %v1285_v2 = vpop.f32.mrf.mxu0 }
 0x563   :  { %v4712_v6 = vadd.f32 %v1285_v2, %v1250_v26 }
 0x565   :  { %v1303_v9 = vmul.f32 %v4712_v6, %v4712_v6  ;;  %v1297_v13 = vsel %vm1180_vm6, %v4712_v6, 0.0 }
 0x567   :  { %v1313_v39 = vsel %vm1180_vm6, %v1303_v9, 0.0 }
 0x568   :  { %1298 = vadd.xlane.f32.xlu0 %v1297_v13  ;;  %1314 = vadd.xlane.f32.xlu1 %v1313_v39 }
 0x570   :  { %1311 = vadd.xlane.f32.xlu0 %v1310_v52 }
 0x5c1   :  { %v1290_v24 = vpop.xlane.xlu1 %1289 }
 0x5c3   :  { %v1306_v37 = vpop.xlane.xlu0 %1305 }
 0x5c9   :  { %v1293_v54 = vpop.xlane.xlu2 %1292 }
 0x5cb   :  { %v1309_v22 = vpop.xlane.xlu0 %1308 }
 0x5d3   :  { %v1296_v53 = vpop.xlane.xlu0 %1295 }
 0x5d4   :  { %v1316_v42 = vadd.f32 %v1296_v53, %v1290_v24 }
 0x5d6   :  { %v1327_v1 = vmul.f32 %v4722_v55, %v1316_v42 }
 0x5d8   :  { %v1331_v41 = vmul.f32 %v1327_v1, %v1327_v1 }
 0x5db   :  { %v1299_v32 = vpop.xlane.xlu0 %1298  ;;  %v1315_v35 = vpop.xlane.xlu1 %1314 }
 0x5dc   :  { %v1317_v23 = vadd.f32 %v1299_v32, %v1293_v54  ;;  %v1319_v26 = vadd.f32 %v1315_v35, %v1309_v22 }
 0x5de   :  { %v1328_v43 = vmul.f32 %v4722_v55, %v1317_v23  ;;  %v1330_v63 = vmul.f32 %v4722_v55, %v1319_v26 }
 0x5e0   :  { %v1332_v61 = vmul.f32 %v1328_v43, %v1328_v43 }
 0x5e2   :  { %v1334_v2 = vsub.f32 %v1330_v63, %v1332_v61 }
 0x5e3   :  { %v1312_v9 = vpop.xlane.xlu0 %1311 }
 0x5e4   :  { %v1336_v13 = vmax.f32 %v1334_v2, 0.0  ;;  %v1318_v39 = vadd.f32 %v1312_v9, %v1306_v37  ;;  %v1239_v37 = vld [vmem:[%s5386_s9 + $0x30] sm:$0xff]  ;;  %v1238_v2 = vld [vmem:[%s5386_s9 + $0x28] sm:$0xff] }
 0x5e6   :  { %v1338_v52 = vadd.f32 1e-05, %v1336_v13  ;;  %v1329_v51 = vmul.f32 %v4722_v55, %v1318_v39 }
 0x5e8   :  { %3971 = vrsqrt.f32 %v1338_v52  ;;  %v1333_v22 = vsub.f32 %v1329_v51, %v1331_v41  ;;  %vm1355_vm10 = vweird.f32 %v1338_v52  ;;  %v1241_v41 = vld [vmem:[%s5386_s9 + $0x40] sm:$0xff]  ;;  %v1240_v51 = vld [vmem:[%s5386_s9 + $0x38] sm:$0xff] }
 0x5ea   :  { %v1335_v20 = vmax.f32 %v1333_v22, 0.0 }
 0x5ec   :  { %v1337_v36 = vadd.f32 1e-05, %v1335_v20 }
 0x5ee   :  { %v3972_v19 = vpop.eup %3971  ;;  %3973 = vrsqrt.f32 %v1337_v36  ;;  %vm1345_vm13 = vweird.f32 %v1337_v36 }
 0x5ef   :  { %v1350_v24 = vmul.f32 %v3972_v19, %v1338_v52  ;;  %vm1356_vm9 = vweird.f32 %v3972_v19 }
 0x5f0   :  { %vm1357_vm11 = vmor %vm1355_vm10, %vm1356_vm9 }
 0x5f1   :  { %v1351_v53 = vmul.f32 %v3972_v19, %v1350_v24  ;;  %v1746_v24 = vld [vmem:[%s5386_s9 + $0x50] sm:$0xff] }
 0x5f3   :  { %v1352_v40 = vmul.f32 0.5, %v1351_v53  ;;  %v3926_v53 = vld [vmem:[%s5391_s11 + $0x18] sm:$0xff] }
 0x5f4   :  { %v3974_v4 = vpop.eup %3973  ;;  %1441 = vmatpush.bf16.msrb.mxu1 %v3926_v53 }
 0x5f5   :  { %v1340_v54 = vmul.f32 %v3974_v4, %v1337_v36  ;;  %v1353_v32 = vsub.f32 1.5, %v1352_v40  ;;  %vm1346_vm12 = vweird.f32 %v3974_v4  ;;  %v1747_v36 = vld [vmem:[%s5386_s9 + $0x58] sm:$0xff] }
 0x5f6   :  { %vm1347_vm14 = vmor %vm1345_vm13, %vm1346_vm12  ;;  %v3930_v40 = vld [vmem:[%s5391_s11 + $0x38] sm:$0xff] }
 0x5f7   :  { %v1341_v35 = vmul.f32 %v3974_v4, %v1340_v54  ;;  %v1354_v23 = vmul.f32 %v3972_v19, %v1353_v32  ;;  %v3938_v54 = vld [vmem:[%s5391_s11 + $0x78] sm:$0xff]  ;;  %1493 = vmatpush.bf16.msrb.mxu2 %v3930_v40  ;;  %v3925_v32 = vld [vmem:[%s5391_s11 + $0x10] sm:$0xff] }
 0x5f8   :  { %1605 = vmatpush.bf16.msrb.mxu0 %v3938_v54  ;;  %1442 = vmatpush.bf16.msrb.mxu1 %v3925_v32 }
 0x5f9   :  { %v1358_v26 = vsel %vm1357_vm11, %v3972_v19, %v1354_v23  ;;  %v1342_v42 = vmul.f32 0.5, %v1341_v35  ;;  %v3929_v35 = vld [vmem:[%s5391_s11 + $0x30] sm:$0xff] }
 0x5fa   :  { %v1360_v61 = vmul.f32 %v1358_v26, %v1239_v37  ;;  %v3933_v37 = vld [vmem:[%s5391_s11 + $0x50] sm:$0xff]  ;;  %v3924_v26 = vld [vmem:[%s5391_s11 + $0x8] sm:$0xff] }
 0x5fb   :  { %v1343_v63 = vsub.f32 1.5, %v1342_v42  ;;  %v3937_v23 = vld [vmem:[%s5391_s11 + $0x70] sm:$0xff]  ;;  %1494 = vmatpush.bf16.msrb.mxu2 %v3929_v35  ;;  %v3928_v42 = vld [vmem:[%s5391_s11 + $0x28] sm:$0xff] }
 0x5fc   :  { %1372 = vperm.xlu0 %3962, %v1360_v61   ;;  %v1362_v13 = vmul.f32 %v1360_v61, %v1328_v43  ;;  %v1745_v43 = vld [vmem:[%s5386_s9 + $0x48] sm:$0xff]  ;;  %1606 = vmatpush.bf16.msrb.mxu0 %v3937_v23 }
 0x5fd   :  { %v1344_v9 = vmul.f32 %v3974_v4, %v1343_v63  ;;  %v3932_v61 = vld [vmem:[%s5391_s11 + $0x48] sm:$0xff]  ;;  %1443 = vmatpush.bf16.msrb.mxu1 %v3924_v26 }
 0x5fe   :  { %v1364_v22 = vsub.f32 %v1241_v41, %v1362_v13  ;;  %v3936_v63 = vld [vmem:[%s5391_s11 + $0x68] sm:$0xff]  ;;  %v3931_v13 = vld [vmem:[%s5391_s11 + $0x40] sm:$0xff] }
 0x5ff   :  { %v1348_v39 = vsel %vm1347_vm14, %v3974_v4, %v1344_v9  ;;  %v3934_v4 = vld [vmem:[%s5391_s11 + $0x58] sm:$0xff]  ;;  %1495 = vmatpush.bf16.msrb.mxu2 %v3928_v42  ;;  %v3927_v9 = vld [vmem:[%s5391_s11 + $0x20] sm:$0xff] }
 0x600   :  { %v1359_v52 = vmul.f32 %v1348_v39, %v1238_v2  ;;  %1549 = vmatpush.bf16.msra.mxu3 %v3934_v4  ;;  %1607 = vmatpush.bf16.msrb.mxu0 %v3936_v63  ;;  %v3923_v2 = vld [vmem:[%s5391_s11] sm:$0xff] }
 0x601   :  { %v3935_v39 = vld [vmem:[%s5391_s11 + $0x60] sm:$0xff]  ;;  %1444 = vmatpush.bf16.msrb.mxu1 %v3923_v2 }
 0x602   :  { %1367 = vperm.xlu2 %3963, %v1359_v52   ;;  %v1361_v20 = vmul.f32 %v1359_v52, %v1327_v1  ;;  %v1748_v1 = vld [vmem:[%s5386_s9 + $0x60] sm:$0xff] }
 0x603   :  { %1496 = vmatpush.bf16.msrb.mxu2 %v3927_v9 }
 0x604   :  { %1386 = vperm.xlu0 %3962, %v1364_v22   ;;  %v1363_v19 = vsub.f32 %v1240_v51, %v1361_v20  ;;  %1550 = vmatpush.bf16.msra.mxu3 %v3933_v37 }
 0x605   :  { %1608 = vmatpush.bf16.msrb.mxu0 %v3935_v39 }
 0x606   :  { %1381 = vperm.xlu1 %3964, %v1363_v19  }
 0x608   :  { %1551 = vmatpush.bf16.msra.mxu3 %v3932_v61 }
 0x60a   :  { %1759 = vperm.xlu2 %3963, %v1745_v43  }
 0x60c   :  { %1769 = vperm.xlu0 %3962, %v1747_v36   ;;  %1552 = vmatpush.bf16.msra.mxu3 %v3931_v13 }
 0x60e   :  { %1764 = vperm.xlu1 %3964, %v1746_v24  }
 0x612   :  { %1774 = vperm.xlu2 %3963, %v1748_v1  }
 0x65c   :  { %v1368_v52 = vpop.permute.xlu2 %1367 }
 0x65d   :  { %v1375_v20 = vmul.f32 %v1368_v52, %v4694_v15  ;;  %v1377_v15 = vmul.f32 %v1368_v52, %v4708_v0  ;;  %v3855_v0 = vld [vmem:[%s5392_s3] sm:$0xff] }
 0x65e   :  { %1666 = vmatpush.bf16.msra.mxu1 %v3855_v0  ;;  %1705 = vmatpush.bf16.msra.mxu2 %v3855_v0 }
 0x66e   :  { %v1373_v41 = vpop.permute.xlu0 %1372 }
 0x66f   :  { %v1376_v51 = vmul.f32 %v1373_v41, %v4701_v59  ;;  %v1378_v59 = vmul.f32 %v1373_v41, %v4712_v6 }
 0x676   :  { %v1387_v22 = vpop.permute.xlu0 %1386 }
 0x677   :  { %v1390_v19 = vadd.f32 %v1387_v22, %v1376_v51  ;;  %v1392_v4 = vadd.f32 %v1387_v22, %v1378_v59 }
 0x678   :  { %v1382_v43 = vpop.permute.xlu1 %1381 }
 0x679   :  { %v1389_v36 = vadd.f32 %v1382_v43, %v1375_v20  ;;  %v4802_v24 = vmax.f32 %v1390_v19, 0.0  ;;  %v1391_v40 = vadd.f32 %v1382_v43, %v1377_v15  ;;  %v4816_v32 = vmax.f32 %v1392_v4, 0.0 }
 0x67b   :  { %v4804_v1 = vmax.f32 %v1389_v36, 0.0  ;;  %v4814_v54 = vmax.f32 %v1391_v40, 0.0 }
 0x67d   :  { %v1397_v53 = vpack.c.bf16 %v4802_v24, %v4804_v1  ;;  %v1398_v35 = vpack.c.bf16 %v4816_v32, %v4814_v54 }
 0x67f   :  { %3627 = vmatmul.msk.bf16.vlgmr.msrb.gmra.mxu1 %vm1180_vm6, %v1397_v53  ;;  %3653 = vmatmul.msk.bf16.vlgmr.msrb.gmra.mxu2 %vm1180_vm6, %v1397_v53 }
 0x680   :  { %3679 = vmatmul.msk.bf16.vlgmr.msra.gmra.mxu3 %vm1180_vm6, %v1397_v53  ;;  %3705 = vmatmul.msk.bf16.vlgmr.msrb.gmra.mxu0 %vm1180_vm6, %v1397_v53 }
 0x681   :  { %2175 = vmatpush.bf16.msrb.mxu1 %v4661_v14  ;;  %2274 = vmatpush.bf16.msrb.mxu2 %v4661_v14 }
 0x685   :  { %2176 = vmatpush.bf16.msrb.mxu1 %v4668_v31  ;;  %2275 = vmatpush.bf16.msrb.mxu2 %v4668_v31 }
 0x689   :  { %2177 = vmatpush.bf16.msrb.mxu1 %v4675_v48  ;;  %2276 = vmatpush.bf16.msrb.mxu2 %v4675_v48 }
 0x68d   :  { %2178 = vmatpush.bf16.msrb.mxu1 %v4682_v60  ;;  %2277 = vmatpush.bf16.msrb.mxu2 %v4682_v60 }
 0x68f   :  { %3628 = vmatmul.msk.bf16.gmra.mxu1 %vm1180_vm6, %v1398_v35  ;;  %3654 = vmatmul.msk.bf16.gmra.mxu2 %vm1180_vm6, %v1398_v35 }
 0x690   :  { %3680 = vmatmul.msk.bf16.gmra.mxu3 %vm1180_vm6, %v1398_v35  ;;  %3706 = vmatmul.msk.bf16.gmra.mxu0 %vm1180_vm6, %v1398_v35 }
 0x6fc   :  { %v1446_v6 = vpop.f32.mrf.mxu1 }
 0x6fd   :  { %v1610_v37 = vpop.f32.mrf.mxu0 }
 0x702   :  { %v1498_v23 = vpop.f32.mrf.mxu2 }
 0x703   :  { %v1508_v26 = vmax.f32 %v1446_v6, %v1498_v23  ;;  %v1554_v42 = vpop.f32.mrf.mxu3 }
 0x704   :  { %v1448_v61 = vpop.f32.mrf.mxu1 }
 0x705   :  { %v1564_v63 = vmax.f32 %v1508_v26, %v1554_v42  ;;  %v1612_v14 = vpop.f32.mrf.mxu0 }
 0x707   :  { %v4835_v9 = vmax.f32 %v1564_v63, %v1610_v37 }
 0x709   :  { %v1632_v48 = vpack.c.bf16 %v4835_v9, %v4835_v9 }
 0x70a   :  { %v1500_v2 = vpop.f32.mrf.mxu2 }
 0x70b   :  { %v1509_v31 = vmax.f32 %v1448_v61, %v1500_v2  ;;  %v1556_v13 = vpop.f32.mrf.mxu3  ;;  %v1640_v20 = vunpack.c.l.b16 %v1632_v48 }
 0x70c   :  { %v1451_v52 = vpop.f32.mrf.mxu1 }
 0x70d   :  { %v1565_v39 = vmax.f32 %v1509_v31, %v1556_v13  ;;  %v1615_v36 = vpop.f32.mrf.mxu0 }
 0x70f   :  { %v1621_v41 = vmax.f32 %v1565_v39, %v1612_v14 }
 0x711   :  { %v1633_v51 = vpack.c.bf16 %v1621_v41, %v1621_v41 }
 0x712   :  { %v1503_v22 = vpop.f32.mrf.mxu2 }
 0x713   :  { %v1641_v60 = vunpack.c.l.b16 %v1633_v51  ;;  %v1510_v19 = vmax.f32 %v1451_v52, %v1503_v22  ;;  %v1559_v43 = vpop.f32.mrf.mxu3 }
 0x714   :  { %v1453_v59 = vpop.f32.mrf.mxu1 }
 0x715   :  { %v4839_v53 = vpack.c.b16 %v1641_v60, %v1640_v20  ;;  %v1566_v15 = vmax.f32 %v1510_v19, %v1559_v43  ;;  %v1617_v37 = vpop.f32.mrf.mxu0 }
 0x717   :  { %3711 = vmatmul.msk.bf16.vlgmr.msra.gmra.mxu1 %vm1652_vm15, %v4839_v53  ;;  %v1622_v4 = vmax.f32 %v1566_v15, %v1615_v36 }
 0x719   :  { %v1634_v23 = vpack.c.bf16 %v1622_v4, %v1622_v4 }
 0x71a   :  { %v1505_v40 = vpop.f32.mrf.mxu2 }
 0x71b   :  { %v1511_v35 = vmax.f32 %v1453_v59, %v1505_v40  ;;  %v1561_v0 = vpop.f32.mrf.mxu3  ;;  %v1642_v61 = vunpack.c.l.b16 %v1634_v23 }
 0x71d   :  { %v1567_v6 = vmax.f32 %v1511_v35, %v1561_v0 }
 0x71f   :  { %v1623_v26 = vmax.f32 %v1567_v6, %v1617_v37 }
 0x721   :  { %v1635_v42 = vpack.c.bf16 %v1623_v26, %v1623_v26 }
 0x723   :  { %v1643_v63 = vunpack.c.l.b16 %v1635_v42 }
 0x725   :  { %v1645_v14 = vpack.c.b16 %v1643_v63, %v1642_v61 }
 0x727   :  { %3712 = vmatmul.msk.bf16.gmra.mxu1 %vm1652_vm15, %v1645_v14 }
 0x794   :  { %v1668_v2 = vpop.f32.mrf.mxu1 }
 0x795   :  { %v1678_v31 = vpack.c.bf16 %v1668_v2, %v1668_v2 }
 0x797   :  { %v1686_v48 = vunpack.c.l.b16 %v1678_v31 }
 0x79c   :  { %v1670_v13 = vpop.f32.mrf.mxu1 }
 0x79d   :  { %v1679_v39 = vpack.c.bf16 %v1670_v13, %v1670_v13 }
 0x79f   :  { %v1687_v52 = vunpack.c.l.b16 %v1679_v39 }
 0x7a1   :  { %v1690_v51 = vpack.c.b16 %v1687_v52, %v1686_v48 }
 0x7a3   :  { %3713 = vmatmul.msk.bf16.vlgmr.msra.gmra.mxu2 %vm1652_vm15, %v1690_v51 }
 0x7a4   :  { %v1673_v22 = vpop.f32.mrf.mxu1  ;;  %2736 = vmatpush.bf16.msra.mxu2 %v4077_v3 }
 0x7a5   :  { %v1680_v20 = vpack.c.bf16 %v1673_v22, %v1673_v22 }
 0x7a7   :  { %v1688_v43 = vunpack.c.l.b16 %v1680_v20 }
 0x7a8   :  { %2737 = vmatpush.bf16.msra.mxu2 %v4115_v16 }
 0x7ac   :  { %v1675_v60 = vpop.f32.mrf.mxu1  ;;  %2738 = vmatpush.bf16.msra.mxu2 %v4152_v29 }
 0x7ad   :  { %v1681_v19 = vpack.c.bf16 %v1675_v60, %v1675_v60 }
 0x7af   :  { %v1689_v36 = vunpack.c.l.b16 %v1681_v19 }
 0x7b0   :  { %2739 = vmatpush.bf16.msra.mxu2 %v4197_v44 }
 0x7b1   :  { %v1691_v15 = vpack.c.b16 %v1689_v36, %v1688_v43 }
 0x7b3   :  { %3714 = vmatmul.msk.bf16.gmra.mxu2 %vm1652_vm15, %v1691_v15 }
 0x7b4   :  { %2740 = vmatpush.bf16.msra.mxu2 %v4233_v56 }
 0x7b8   :  { %2741 = vmatpush.bf16.msra.mxu2 %v4269_v5 }
 0x7bc   :  { %2742 = vmatpush.bf16.msra.mxu2 %v4317_v27 }
 0x7c0   :  { %2743 = vmatpush.bf16.msra.mxu2 %v4353_v47 }
 0x826   :  { %v1707_v59 = vpop.f32.mrf.mxu2 }
 0x827   :  { %v1717_v37 = vmul.f32 2.0, %v1707_v59 }
 0x829   :  { %v1721_v2 = vsub.f32 %v1717_v37, %v4835_v9  ;;  %v3939_v9 = vld [vmem:[%s5393_s6] sm:$0xff] }
 0x82b   :  { %v1725_v52 = vpack.c.bf16 %v1721_v2, %v1721_v2 }
 0x82d   :  { %v1737_v43 = vunpack.c.l.b16 %v1725_v52  ;;  %v1770_v52 = vpop.permute.xlu0 %1769 }
 0x82e   :  { %v1709_v40 = vpop.f32.mrf.mxu2 }
 0x82f   :  { %v1718_v6 = vmul.f32 2.0, %v1709_v40 }
 0x831   :  { %v1722_v61 = vsub.f32 %v1718_v6, %v1621_v41  ;;  %v3940_v41 = vld [vmem:[%s5393_s6 + $0x8] sm:$0xff] }
 0x833   :  { %v1726_v39 = vpack.c.bf16 %v1722_v61, %v1722_v61 }
 0x835   :  { %v1738_v60 = vunpack.c.l.b16 %v1726_v39 }
 0x836   :  { %v1712_v35 = vpop.f32.mrf.mxu2 }
 0x837   :  { %v1719_v0 = vmul.f32 2.0, %v1712_v35  ;;  %v1741_v36 = vpack.c.b16 %v1738_v60, %v1737_v43  ;;  %v1765_v35 = vpop.permute.xlu1 %1764 }
 0x839   :  { %v1723_v23 = vsub.f32 %v1719_v0, %v1622_v4  ;;  %v3941_v4 = vld [vmem:[%s5393_s6 + $0x10] sm:$0xff] }
 0x83b   :  { %v1727_v31 = vpack.c.bf16 %v1723_v23, %v1723_v23 }
 0x83d   :  { %v1739_v22 = vunpack.c.l.b16 %v1727_v31 }
 0x83e   :  { %v1714_v42 = vpop.f32.mrf.mxu2 }
 0x83f   :  { %v1720_v63 = vmul.f32 2.0, %v1714_v42 }
 0x841   :  { %v1724_v13 = vsub.f32 %v1720_v63, %v1623_v26  ;;  %v3942_v26 = vld [vmem:[%s5393_s6 + $0x18] sm:$0xff] }
 0x843   :  { %v1728_v48 = vpack.c.bf16 %v1724_v13, %v1724_v13 }
 0x845   :  { %v1740_v20 = vunpack.c.l.b16 %v1728_v48 }
 0x847   :  { %v1742_v19 = vpack.c.b16 %v1740_v20, %v1739_v22 }
 0x849   :  { %1812 = vmatpush.bf16.msrb.mxu3 %v1742_v19 }
 0x84d   :  { %1813 = vmatpush.bf16.msrb.mxu3 %v1741_v36 }
 0x851   :  { %1814 = vmatpush.bf16.msrb.mxu3 %v1691_v15 }
 0x855   :  { %1815 = vmatpush.bf16.msrb.mxu3 %v1690_v51 }
 0x859   :  { %1816 = vmatpush.bf16.msrb.mxu3 %v1645_v14  ;;  %v1760_v14 = vpop.permute.xlu2 %1759 }
 0x85d   :  { %1817 = vmatpush.bf16.msrb.mxu3 %v4839_v53 }
 0x860   :  { %3731 = vmatmul.msk.bf16.vlgmr.msrb.gmra.mxu3 %vm1797_vm0, %v3939_v9 }
 0x870   :  { %3732 = vmatmul.msk.bf16.gmra.mxu3 %vm1797_vm0, %v3940_v41  ;;  %v1775_v41 = vpop.permute.xlu2 %1774 }
 0x880   :  { %3733 = vmatmul.msk.bf16.gmra.mxu3 %vm1797_vm0, %v3941_v4 }
 0x890   :  { %3734 = vmatmul.msk.bf16.gmra.mxu3 %vm1797_vm0, %v3942_v26  ;;  %vm2439_vm0 = vcmask 261120  }
 0x8e3   :  { %v1819_v51 = vpop.f32.mrf.mxu3 }
 0x8e4   :  { %v4868_v53 = vadd.f32 %v1819_v51, %v1760_v14 }
 0x8e6   :  { %v1839_v15 = vsel %vm1652_vm15, %v4868_v53, 0.0  ;;  %v1863_v59 = vmul.f32 %v4868_v53, %v4868_v53 }
 0x8e7   :  { %1840 = vadd.xlane.f32.xlu1 %v1839_v15 }
 0x8e8   :  { %v1871_v40 = vsel %vm1652_vm15, %v1863_v59, 0.0 }
 0x8e9   :  { %1872 = vadd.xlane.f32.xlu0 %v1871_v40 }
 0x8eb   :  { %v1821_v0 = vpop.f32.mrf.mxu3 }
 0x8ec   :  { %v4875_v6 = vadd.f32 %v1821_v0, %v1765_v35 }
 0x8ee   :  { %v1864_v37 = vmul.f32 %v4875_v6, %v4875_v6  ;;  %v1842_v42 = vsel %vm1652_vm15, %v4875_v6, 0.0 }
 0x8f0   :  { %v1874_v23 = vsel %vm1652_vm15, %v1864_v37, 0.0 }
 0x8f1   :  { %1875 = vadd.xlane.f32.xlu2 %v1874_v23  ;;  %1843 = vadd.xlane.f32.xlu0 %v1842_v42 }
 0x8f3   :  { %v1824_v61 = vpop.f32.mrf.mxu3 }
 0x8f4   :  { %v4889_v22 = vadd.f32 %v1824_v61, %v1770_v52 }
 0x8f6   :  { %v1845_v19 = vsel %vm1652_vm15, %v4889_v22, 0.0 }
 0x8fb   :  { %v1826_v63 = vpop.f32.mrf.mxu3 }
 0x8fc   :  { %v4900_v26 = vadd.f32 %v1826_v63, %v1775_v41 }
 0x8fe   :  { %v1848_v51 = vsel %vm1652_vm15, %v4900_v26, 0.0  ;;  %v1866_v0 = vmul.f32 %v4900_v26, %v4900_v26 }
 0x900   :  { %v1880_v42 = vsel %vm1652_vm15, %v1866_v0, 0.0 }
 0x903   :  { %v1829_v2 = vpop.f32.mrf.mxu3 }
 0x904   :  { %v4882_v31 = vadd.f32 %v1829_v2, %v1760_v14 }
 0x906   :  { %v1851_v13 = vsel %vm1652_vm15, %v4882_v31, 0.0  ;;  %v1867_v39 = vmul.f32 %v4882_v31, %v4882_v31 }
 0x907   :  { %1852 = vadd.xlane.f32.xlu2 %v1851_v13 }
 0x908   :  { %v1883_v48 = vsel %vm1652_vm15, %v1867_v39, 0.0  ;;  %v3992_v39 = vmov 32.0  }
 0x909   :  { %1884 = vadd.xlane.f32.xlu1 %v1883_v48  ;;  %3975 = vrcp.f32 %v3992_v39 }
 0x90b   :  { %v1831_v20 = vpop.f32.mrf.mxu3 }
 0x90c   :  { %v4891_v60 = vadd.f32 %v1831_v20, %v1765_v35  ;;  %v1865_v35 = vmul.f32 %v4889_v22, %v4889_v22 }
 0x90e   :  { %v1868_v43 = vmul.f32 %v4891_v60, %v4891_v60  ;;  %v1854_v36 = vsel %vm1652_vm15, %v4891_v60, 0.0  ;;  %v1877_v23 = vsel %vm1652_vm15, %v1865_v35, 0.0 }
 0x90f   :  { %1846 = vadd.xlane.f32.xlu2 %v1845_v19  ;;  %v3976_v48 = vpop.eup %3975 }
 0x910   :  { %v1886_v9 = vsel %vm1652_vm15, %v1868_v43, 0.0  ;;  %vm1908_vm1 = vweird.f32 %v3976_v48 }
 0x911   :  { %1855 = vadd.xlane.f32.xlu1 %v1854_v36  ;;  %1887 = vadd.xlane.f32.xlu0 %v1886_v9 }
 0x913   :  { %v1834_v4 = vpop.f32.mrf.mxu3 }
 0x914   :  { %v4902_v14 = vadd.f32 %v1834_v4, %v1770_v52  ;;  %v1904_v52 = vmul.f32 32.0, %v3976_v48 }
 0x916   :  { %v1857_v15 = vsel %vm1652_vm15, %v4902_v14, 0.0  ;;  %v1869_v61 = vmul.f32 %v4902_v14, %v4902_v14  ;;  %v1905_v20 = vsub.f32 1.0, %v1904_v52 }
 0x918   :  { %v1889_v2 = vsel %vm1652_vm15, %v1869_v61, 0.0  ;;  %v1906_v36 = vmul.f32 %v3976_v48, %v1905_v20 }
 0x919   :  { %1849 = vadd.xlane.f32.xlu1 %v1848_v51  ;;  %1858 = vadd.xlane.f32.xlu0 %v1857_v15 }
 0x91b   :  { %v1836_v59 = vpop.f32.mrf.mxu3 }
 0x91c   :  { %v4908_v40 = vadd.f32 %v1836_v59, %v1775_v41  ;;  %v1907_v41 = vadd.f32 %v3976_v48, %v1906_v36 }
 0x91e   :  { %v1860_v37 = vsel %vm1652_vm15, %v4908_v40, 0.0  ;;  %v1870_v63 = vmul.f32 %v4908_v40, %v4908_v40  ;;  %v4924_v4 = vsel %vm1908_vm1, %v3976_v48, %v1907_v41 }
 0x91f   :  { %1861 = vadd.xlane.f32.xlu2 %v1860_v37 }
 0x920   :  { %v1892_v13 = vsel %vm1652_vm15, %v1870_v63, 0.0 }
 0x921   :  { %1878 = vadd.xlane.f32.xlu1 %v1877_v23  ;;  %1881 = vadd.xlane.f32.xlu0 %v1880_v42 }
 0x927   :  { %1890 = vadd.xlane.f32.xlu2 %v1889_v2 }
 0x929   :  { %1893 = vadd.xlane.f32.xlu1 %v1892_v13 }
 0x95a   :  { %v1841_v9 = vpop.xlane.xlu1 %1840 }
 0x95c   :  { %v1873_v19 = vpop.xlane.xlu0 %1872 }
 0x964   :  { %v1876_v43 = vpop.xlane.xlu2 %1875  ;;  %v1844_v59 = vpop.xlane.xlu0 %1843 }
 0x97a   :  { %v1853_v51 = vpop.xlane.xlu2 %1852 }
 0x97b   :  { %v1895_v15 = vadd.f32 %v1853_v51, %v1841_v9 }
 0x97c   :  { %v1885_v35 = vpop.xlane.xlu1 %1884 }
 0x97d   :  { %v1910_v0 = vmul.f32 %v4924_v4, %v1895_v15  ;;  %v1899_v37 = vadd.f32 %v1885_v35, %v1873_v19 }
 0x97f   :  { %v1918_v23 = vmul.f32 %v1910_v0, %v1910_v0  ;;  %v1914_v42 = vmul.f32 %v4924_v4, %v1899_v37 }
 0x981   :  { %v1922_v61 = vsub.f32 %v1914_v42, %v1918_v23 }
 0x982   :  { %v1847_v19 = vpop.xlane.xlu2 %1846 }
 0x983   :  { %v1926_v63 = vmax.f32 %v1922_v61, 0.0 }
 0x984   :  { %v1888_v2 = vpop.xlane.xlu0 %1887  ;;  %v1856_v13 = vpop.xlane.xlu1 %1855 }
 0x985   :  { %v1930_v39 = vadd.f32 1e-05, %v1926_v63  ;;  %v1900_v52 = vadd.f32 %v1888_v2, %v1876_v43  ;;  %v1896_v20 = vadd.f32 %v1856_v13, %v1844_v59 }
 0x987   :  { %3977 = vrsqrt.f32 %v1930_v39  ;;  %v4929_v48 = vmul.f32 %v4924_v4, %v1896_v20  ;;  %v1915_v36 = vmul.f32 %v4924_v4, %v1900_v52  ;;  %v1749_v52 = vld [vmem:[%s5386_s9 + $0x68] sm:$0xff]  ;;  %vm1940_vm3 = vweird.f32 %v1930_v39 }
 0x989   :  { %v1919_v9 = vmul.f32 %v4929_v48, %v4929_v48 }
 0x98b   :  { %v1923_v41 = vsub.f32 %v1915_v36, %v1919_v9 }
 0x98c   :  { %v1850_v51 = vpop.xlane.xlu1 %1849  ;;  %v1859_v43 = vpop.xlane.xlu0 %1858 }
 0x98d   :  { %v3978_v15 = vpop.eup %3977  ;;  %v1927_v35 = vmax.f32 %v1923_v41, 0.0  ;;  %v1897_v13 = vadd.f32 %v1859_v43, %v1847_v19  ;;  %v1753_v19 = vld [vmem:[%s5386_s9 + $0x88] sm:$0xff] }
 0x98e   :  { %v1935_v37 = vmul.f32 %v3978_v15, %v1930_v39  ;;  %vm1941_vm2 = vweird.f32 %v3978_v15 }
 0x98f   :  { %v1931_v23 = vadd.f32 1e-05, %v1927_v35  ;;  %vm1942_vm4 = vmor %vm1940_vm3, %vm1941_vm2 }
 0x990   :  { %v1936_v42 = vmul.f32 %v3978_v15, %v1935_v37  ;;  %v4938_v37 = vmul.f32 %v4924_v4, %v1897_v13 }
 0x991   :  { %3979 = vrsqrt.f32 %v1931_v23  ;;  %vm1950_vm7 = vweird.f32 %v1931_v23 }
 0x992   :  { %v1862_v59 = vpop.xlane.xlu2 %1861  ;;  %v1937_v61 = vmul.f32 0.5, %v1936_v42 }
 0x993   :  { %v1898_v9 = vadd.f32 %v1862_v59, %v1850_v51 }
 0x994   :  { %v1879_v63 = vpop.xlane.xlu1 %1878  ;;  %v1938_v2 = vsub.f32 1.5, %v1937_v61  ;;  %v1882_v51 = vpop.xlane.xlu0 %1881 }
 0x995   :  { %v4944_v61 = vmul.f32 %v4924_v4, %v1898_v9 }
 0x996   :  { %v1939_v20 = vmul.f32 %v3978_v15, %v1938_v2 }
 0x997   :  { %v3980_v36 = vpop.eup %3979 }
 0x998   :  { %v1945_v41 = vmul.f32 %v3980_v36, %v1931_v23  ;;  %v1943_v35 = vsel %vm1942_vm4, %v3978_v15, %v1939_v20  ;;  %v1920_v15 = vmul.f32 %v4938_v37, %v4938_v37  ;;  %vm1951_vm5 = vweird.f32 %v3980_v36 }
 0x999   :  { %v1974_v30 = vmul.f32 %v1943_v35, %v1749_v52  ;;  %vm1952_vm8 = vmor %vm1950_vm7, %vm1951_vm5 }
 0x99a   :  { %v1891_v42 = vpop.xlane.xlu2 %1890  ;;  %v1946_v43 = vmul.f32 %v3980_v36, %v1945_v41  ;;  %v1921_v41 = vmul.f32 %v4944_v61, %v4944_v61 }
 0x99b   :  { %v1901_v2 = vadd.f32 %v1891_v42, %v1879_v63  ;;  %1988 = vperm.xlu0 %3962, %v1974_v30   ;;  %v1978_v39 = vmul.f32 %v1974_v30, %v1910_v0  ;;  %v1750_v30 = vld [vmem:[%s5386_s9 + $0x70] sm:$0xff] }
 0x99c   :  { %v1894_v59 = vpop.xlane.xlu1 %1893  ;;  %v1947_v18 = vmul.f32 0.5, %v1946_v43 }
 0x99d   :  { %v1916_v13 = vmul.f32 %v4924_v4, %v1901_v2  ;;  %v1902_v52 = vadd.f32 %v1894_v59, %v1882_v51  ;;  %v1982_v20 = vsub.f32 %v1753_v19, %v1978_v39  ;;  %v1754_v51 = vld [vmem:[%s5386_s9 + $0x90] sm:$0xff] }
 0x99e   :  { %v1948_v35 = vsub.f32 1.5, %v1947_v18 }
 0x99f   :  { %v1924_v9 = vsub.f32 %v1916_v13, %v1920_v15  ;;  %v1917_v63 = vmul.f32 %v4924_v4, %v1902_v52  ;;  %2016 = vperm.xlu1 %3964, %v1982_v20  }
 0x9a0   :  { %v1949_v0 = vmul.f32 %v3980_v36, %v1948_v35 }
 0x9a1   :  { %v1928_v42 = vmax.f32 %v1924_v9, 0.0  ;;  %v1925_v43 = vsub.f32 %v1917_v63, %v1921_v41 }
 0x9a2   :  { %v1953_v2 = vsel %vm1952_vm8, %v3980_v36, %v1949_v0 }
 0x9a3   :  { %v1932_v19 = vadd.f32 1e-05, %v1928_v42  ;;  %v1929_v18 = vmax.f32 %v1925_v43, 0.0  ;;  %v1975_v39 = vmul.f32 %v1953_v2, %v1750_v30  ;;  %v1751_v30 = vld [vmem:[%s5386_s9 + $0x78] sm:$0xff]  ;;  %v1752_v43 = vld [vmem:[%s5386_s9 + $0x80] sm:$0xff] }
 0x9a5   :  { %3981 = vrsqrt.f32 %v1932_v19  ;;  %v1933_v4 = vadd.f32 1e-05, %v1929_v18  ;;  %1993 = vperm.xlu2 %3963, %v1975_v39   ;;  %v1979_v59 = vmul.f32 %v1975_v39, %v4929_v48  ;;  %vm1960_vm10 = vweird.f32 %v1932_v19 }
 0x9a7   :  { %3983 = vrsqrt.f32 %v1933_v4  ;;  %v1983_v15 = vsub.f32 %v1754_v51, %v1979_v59  ;;  %vm1970_vm13 = vweird.f32 %v1933_v4  ;;  %v1755_v51 = vld [vmem:[%s5386_s9 + $0x98] sm:$0xff] }
 0x9a9   :  { %2021 = vperm.xlu0 %3962, %v1983_v15  }
 0x9ab   :  { %v3982_v23 = vpop.eup %3981 }
 0x9ac   :  { %v1955_v13 = vmul.f32 %v3982_v23, %v1932_v19  ;;  %vm1961_vm9 = vweird.f32 %v3982_v23 }
 0x9ad   :  { %v3984_v52 = vpop.eup %3983  ;;  %vm1962_vm12 = vmor %vm1960_vm10, %vm1961_vm9 }
 0x9ae   :  { %v1956_v20 = vmul.f32 %v3982_v23, %v1955_v13  ;;  %v1965_v36 = vmul.f32 %v3984_v52, %v1933_v4  ;;  %vm1971_vm11 = vweird.f32 %v3984_v52  ;;  %v1756_v13 = vld [vmem:[%s5386_s9 + $0xa0] sm:$0xff] }
 0x9af   :  { %vm1972_vm14 = vmor %vm1970_vm13, %vm1971_vm11 }
 0x9b0   :  { %v1966_v35 = vmul.f32 %v3984_v52, %v1965_v36  ;;  %v1957_v41 = vmul.f32 0.5, %v1956_v20  ;;  %v2394_v20 = vld [vmem:[%s5386_s9 + $0xb0] sm:$0xff] }
 0x9b2   :  { %v1958_v9 = vsub.f32 1.5, %v1957_v41  ;;  %v1967_v63 = vmul.f32 0.5, %v1966_v35 }
 0x9b4   :  { %v1959_v0 = vmul.f32 %v3982_v23, %v1958_v9  ;;  %v1968_v48 = vsub.f32 1.5, %v1967_v63 }
 0x9b6   :  { %v1963_v42 = vsel %vm1962_vm12, %v3982_v23, %v1959_v0  ;;  %v1969_v2 = vmul.f32 %v3984_v52, %v1968_v48 }
 0x9b7   :  { %v1976_v18 = vmul.f32 %v1963_v42, %v1751_v30 }
 0x9b8   :  { %v1973_v39 = vsel %vm1972_vm14, %v3984_v52, %v1969_v2  ;;  %v2393_v52 = vld [vmem:[%s5386_s9 + $0xa8] sm:$0xff] }
 0x9b9   :  { %1998 = vperm.xlu2 %3963, %v1976_v18   ;;  %v1977_v59 = vmul.f32 %v1973_v39, %v1752_v43  ;;  %v1980_v19 = vmul.f32 %v1976_v18, %v4938_v37  ;;  %v3943_v37 = vld [vmem:[%s5394_s12] sm:$0xff] }
 0x9ba   :  { %2081 = vmatpush.bf16.msra.mxu0 %v3943_v37 }
 0x9bb   :  { %2003 = vperm.xlu0 %3962, %v1977_v59   ;;  %v1984_v15 = vsub.f32 %v1755_v51, %v1980_v19  ;;  %v1981_v23 = vmul.f32 %v1977_v59, %v4944_v61 }
 0x9bd   :  { %2026 = vperm.xlu1 %3964, %v1984_v15   ;;  %v1985_v4 = vsub.f32 %v1756_v13, %v1981_v23 }
 0x9c1   :  { %2031 = vperm.xlu2 %3963, %v1985_v4  }
 0x9c3   :  { %2401 = vperm.xlu0 %3962, %v2393_v52  }
 0x9c5   :  { %2406 = vperm.xlu1 %3964, %v2394_v20  }
 0x9ff   :  { %v1994_v36 = vpop.permute.xlu2 %1993 }
 0xa00   :  { %v2007_v9 = vmul.f32 %v1994_v36, %v4875_v6  ;;  %v2011_v4 = vmul.f32 %v1994_v36, %v4891_v60 }
 0xa0d   :  { %v1989_v61 = vpop.permute.xlu0 %1988 }
 0xa0e   :  { %v2006_v41 = vmul.f32 %v1989_v61, %v4868_v53  ;;  %v2010_v52 = vmul.f32 %v1989_v61, %v4882_v31 }
 0xa11   :  { %v2017_v35 = vpop.permute.xlu1 %2016 }
 0xa12   :  { %v2034_v63 = vadd.f32 %v2017_v35, %v2006_v41  ;;  %v2038_v37 = vadd.f32 %v2017_v35, %v2010_v52 }
 0xa13   :  { %v1999_v2 = vpop.permute.xlu2 %1998 }
 0xa14   :  { %v2042_v48 = vmax.f32 %v2034_v63, 0.0  ;;  %v2008_v39 = vmul.f32 %v1999_v2, %v4889_v22  ;;  %v2012_v63 = vmul.f32 %v1999_v2, %v4902_v14 }
 0xa1b   :  { %v2022_v30 = vpop.permute.xlu0 %2021  ;;  %v2032_v59 = vpop.permute.xlu2 %2031 }
 0xa1c   :  { %v2035_v0 = vadd.f32 %v2022_v30, %v2007_v9  ;;  %v2039_v20 = vadd.f32 %v2022_v30, %v2011_v4  ;;  %v2046_v9 = vmax.f32 %v2038_v37, 0.0 }
 0xa1e   :  { %v2043_v42 = vmax.f32 %v2035_v0, 0.0  ;;  %v2047_v41 = vmax.f32 %v2039_v20, 0.0 }
 0xa20   :  { %v2052_v43 = vpack.c.bf16 %v2043_v42, %v2042_v48  ;;  %v2054_v22 = vpack.c.bf16 %v2047_v41, %v2046_v9 }
 0xa22   :  { %3739 = vmatmul.msk.bf16.vlgmr.msra.gmra.mxu0 %vm1652_vm15, %v2052_v43 }
 0xa2d   :  { %v2004_v18 = vpop.permute.xlu0 %2003 }
 0xa2e   :  { %v2009_v51 = vmul.f32 %v2004_v18, %v4900_v26  ;;  %v2013_v26 = vmul.f32 %v2004_v18, %v4908_v40 }
 0xa2f   :  { %v2027_v19 = vpop.permute.xlu1 %2026 }
 0xa30   :  { %v2037_v15 = vadd.f32 %v2032_v59, %v2009_v51  ;;  %v2036_v53 = vadd.f32 %v2027_v19, %v2008_v39  ;;  %v2041_v0 = vadd.f32 %v2032_v59, %v2013_v26  ;;  %v2040_v48 = vadd.f32 %v2027_v19, %v2012_v63 }
 0xa32   :  { %v2045_v23 = vmax.f32 %v2037_v15, 0.0  ;;  %v2044_v6 = vmax.f32 %v2036_v53, 0.0  ;;  %v2049_v42 = vmax.f32 %v2041_v0, 0.0  ;;  %v2048_v43 = vmax.f32 %v2040_v48, 0.0 }
 0xa33   :  { %v2119_v48 = vpack.c.bf16 %v4804_v1, %v4804_v1 }
 0xa34   :  { %v2053_v13 = vpack.c.bf16 %v2045_v23, %v2044_v6  ;;  %v2055_v39 = vpack.c.bf16 %v2049_v42, %v2048_v43  ;;  %v2120_v42 = vpack.c.bf16 %v4802_v24, %v4802_v24 }
 0xa35   :  { %v2143_v43 = vunpack.c.l.b16 %v2119_v48 }
 0xa36   :  { %3740 = vmatmul.msk.bf16.gmra.mxu0 %vm1652_vm15, %v2053_v13 }
 0xa46   :  { %3741 = vmatmul.msk.bf16.gmra.mxu0 %vm1652_vm15, %v2054_v22 }
 0xa56   :  { %3742 = vmatmul.msk.bf16.gmra.mxu0 %vm1652_vm15, %v2055_v39  ;;  %v2144_v39 = vunpack.c.l.b16 %v2120_v42 }
 0xa9f   :  { %v4994_v60 = vpop.f32.mrf.mxu0 }
 0xaa0   :  { %v2111_v31 = vpack.c.bf16 %v4994_v60, %v4994_v60 }
 0xaa2   :  { %v2135_v40 = vunpack.c.l.b16 %v2111_v31  ;;  %v2151_v31 = vpack.c.b16 %v2144_v39, %v2143_v43 }
 0xaa7   :  { %v4998_v61 = vpop.f32.mrf.mxu0 }
 0xaa8   :  { %v2112_v36 = vpack.c.bf16 %v4998_v61, %v4998_v61 }
 0xaaa   :  { %v2136_v35 = vunpack.c.l.b16 %v2112_v36  ;;  %v2121_v36 = vpack.c.bf16 %v4814_v54, %v4814_v54 }
 0xaac   :  { %v5002_v14 = vpack.c.b16 %v2136_v35, %v2135_v40  ;;  %v2122_v40 = vpack.c.bf16 %v4816_v32, %v4816_v32  ;;  %v2145_v35 = vunpack.c.l.b16 %v2121_v36 }
 0xaae   :  { %3743 = vmatmul.msk.bf16.vlgmr.msrb.gmra.mxu1 %vm1180_vm6, %v5002_v14 }
 0xab3   :  { %v5006_v30 = vpop.f32.mrf.mxu0 }
 0xab4   :  { %v2113_v2 = vpack.c.bf16 %v5006_v30, %v5006_v30 }
 0xab6   :  { %v2137_v59 = vunpack.c.l.b16 %v2113_v2  ;;  %v2146_v2 = vunpack.c.l.b16 %v2122_v40 }
 0xabb   :  { %v5010_v18 = vpop.f32.mrf.mxu0 }
 0xabc   :  { %v2114_v51 = vpack.c.bf16 %v5010_v18, %v5010_v18 }
 0xabe   :  { %v2138_v19 = vunpack.c.l.b16 %v2114_v51  ;;  %v2152_v51 = vpack.c.b16 %v2146_v2, %v2145_v35 }
 0xac0   :  { %v5014_v15 = vpack.c.b16 %v2138_v19, %v2137_v59 }
 0xac2   :  { %3744 = vmatmul.msk.bf16.gmra.mxu1 %vm1180_vm6, %v5014_v15 }
 0xac3   :  { %v5018_v53 = vpop.f32.mrf.mxu0 }
 0xac4   :  { %v2115_v23 = vpack.c.bf16 %v5018_v53, %v5018_v53 }
 0xac6   :  { %v2139_v4 = vunpack.c.l.b16 %v2115_v23 }
 0xacb   :  { %v5022_v6 = vpop.f32.mrf.mxu0 }
 0xacc   :  { %v2116_v13 = vpack.c.bf16 %v5022_v6, %v5022_v6 }
 0xace   :  { %v2140_v52 = vunpack.c.l.b16 %v2116_v13 }
 0xad0   :  { %v2149_v20 = vpack.c.b16 %v2140_v52, %v2139_v4 }
 0xad2   :  { %3745 = vmatmul.msk.bf16.gmra.mxu1 %vm1180_vm6, %v2149_v20 }
 0xad3   :  { %v5027_v37 = vpop.f32.mrf.mxu0 }
 0xad4   :  { %v2117_v41 = vpack.c.bf16 %v5027_v37, %v5027_v37 }
 0xad6   :  { %v2141_v26 = vunpack.c.l.b16 %v2117_v41 }
 0xadb   :  { %v5031_v9 = vpop.f32.mrf.mxu0 }
 0xadc   :  { %v2118_v22 = vpack.c.bf16 %v5031_v9, %v5031_v9 }
 0xade   :  { %v2142_v63 = vunpack.c.l.b16 %v2118_v22 }
 0xae0   :  { %v2150_v0 = vpack.c.b16 %v2142_v63, %v2141_v26 }
 0xae2   :  { %3746 = vmatmul.msk.bf16.gmra.mxu1 %vm1180_vm6, %v2150_v0 }
 0xaf2   :  { %3747 = vmatmul.msk.bf16.gmra.mxu1 %vm1180_vm6, %v2151_v31 }
 0xb02   :  { %3748 = vmatmul.msk.bf16.gmra.mxu1 %vm1180_vm6, %v2152_v51 }
 0xb2b   :  { %v2180_v59 = vpop.f32.mrf.mxu1 }
 0xb2c   :  { %v2210_v19 = vpack.c.bf16 %v2180_v59, %v2180_v59 }
 0xb2e   :  { %v2234_v4 = vunpack.c.l.b16 %v2210_v19 }
 0xb33   :  { %v2182_v23 = vpop.f32.mrf.mxu1 }
 0xb34   :  { %v2211_v13 = vpack.c.bf16 %v2182_v23, %v2182_v23  ;;  %v3769_v23 = vld [vmem:[%s5395_s7 + $0x18] sm:$0xf] }
 0xb36   :  { %v2235_v52 = vunpack.c.l.b16 %v2211_v13  ;;  %v3948_v13 = vld [vmem:[%s5395_s7 + $0x20] sm:$0xf0] }
 0xb38   :  { %v2246_v41 = vpack.c.b16 %v2235_v52, %v2234_v4 }
 0xb3a   :  { %3749 = vmatmul.msk.bf16.vlgmr.msrb.gmra.mxu2 %vm1180_vm6, %v2246_v41 }
 0xb3b   :  { %2868 = vmatpush.bf16.msrb.mxu2 %v4077_v3 }
 0xb3f   :  { %v2185_v22 = vpop.f32.mrf.mxu1  ;;  %2869 = vmatpush.bf16.msrb.mxu2 %v4115_v16 }
 0xb40   :  { %v2212_v26 = vpack.c.bf16 %v2185_v22, %v2185_v22 }
 0xb42   :  { %v2236_v42 = vunpack.c.l.b16 %v2212_v26 }
 0xb43   :  { %2870 = vmatpush.bf16.msrb.mxu2 %v4152_v29 }
 0xb47   :  { %v2187_v63 = vpop.f32.mrf.mxu1  ;;  %2871 = vmatpush.bf16.msrb.mxu2 %v4197_v44 }
 0xb48   :  { %v2213_v48 = vpack.c.bf16 %v2187_v63, %v2187_v63 }
 0xb4a   :  { %v2237_v43 = vunpack.c.l.b16 %v2213_v48 }
 0xb4b   :  { %2872 = vmatpush.bf16.msrb.mxu2 %v4233_v56 }
 0xb4c   :  { %v2247_v39 = vpack.c.b16 %v2237_v43, %v2236_v42 }
 0xb4e   :  { %3750 = vmatmul.msk.bf16.gmra.mxu2 %vm1180_vm6, %v2247_v39  ;;  %2446 = vmatpush.bf16.msra.mxu3 %v2247_v39 }
 0xb4f   :  { %v2190_v36 = vpop.f32.mrf.mxu1  ;;  %2873 = vmatpush.bf16.msrb.mxu2 %v4269_v5 }
 0xb50   :  { %v2214_v3 = vpack.c.bf16 %v2190_v36, %v2190_v36 }
 0xb52   :  { %2447 = vmatpush.bf16.msra.mxu3 %v2246_v41  ;;  %v2238_v44 = vunpack.c.l.b16 %v2214_v3  ;;  %v3770_v41 = vor.u32 %v3948_v13, %v3769_v23 }
 0xb53   :  { %2874 = vmatpush.bf16.msrb.mxu2 %v4317_v27  ;;  %v3757_v27 = vld [vmem:[%s5395_s7] sm:$0xf] }
 0xb56   :  { %2448 = vmatpush.bf16.msra.mxu3 %v2152_v51 }
 0xb57   :  { %v2192_v16 = vpop.f32.mrf.mxu1  ;;  %2875 = vmatpush.bf16.msrb.mxu2 %v4353_v47  ;;  %v3945_v47 = vld [vmem:[%s5395_s7 + $0x8] sm:$0xf0] }
 0xb58   :  { %v2215_v29 = vpack.c.bf16 %v2192_v16, %v2192_v16  ;;  %v3758_v51 = vor.u32 %v3945_v47, %v3757_v27 }
 0xb5a   :  { %v2239_v40 = vunpack.c.l.b16 %v2215_v29  ;;  %2449 = vmatpush.bf16.msra.mxu3 %v2151_v31 }
 0xb5c   :  { %v5056_v56 = vpack.c.b16 %v2239_v40, %v2238_v44 }
 0xb5e   :  { %3751 = vmatmul.msk.bf16.gmra.mxu2 %vm1180_vm6, %v5056_v56  ;;  %2450 = vmatpush.bf16.msra.mxu3 %v2150_v0 }
 0xb5f   :  { %v2195_v35 = vpop.f32.mrf.mxu1 }
 0xb60   :  { %v2216_v5 = vpack.c.bf16 %v2195_v35, %v2195_v35 }
 0xb62   :  { %2451 = vmatpush.bf16.msra.mxu3 %v2149_v20  ;;  %v2240_v59 = vunpack.c.l.b16 %v2216_v5 }
 0xb66   :  { %2452 = vmatpush.bf16.msra.mxu3 %v5014_v15 }
 0xb67   :  { %v2197_v31 = vpop.f32.mrf.mxu1 }
 0xb68   :  { %v2217_v2 = vpack.c.bf16 %v2197_v31, %v2197_v31 }
 0xb6a   :  { %v2241_v19 = vunpack.c.l.b16 %v2217_v2  ;;  %2453 = vmatpush.bf16.msra.mxu3 %v5002_v14 }
 0xb6c   :  { %v5068_v0 = vpack.c.b16 %v2241_v19, %v2240_v59 }
 0xb6d   :  { %2454 = vmatmul.bf16.vlgmr.msra.gmra.mxu3 %v3758_v51 }
 0xb6e   :  { %3752 = vmatmul.msk.bf16.gmra.mxu2 %vm1180_vm6, %v5068_v0 }
 0xb6f   :  { %v2200_v15 = vpop.f32.mrf.mxu1 }
 0xb70   :  { %v2218_v20 = vpack.c.bf16 %v2200_v15, %v2200_v15 }
 0xb72   :  { %v2242_v14 = vunpack.c.l.b16 %v2218_v20 }
 0xb77   :  { %v2202_v4 = vpop.f32.mrf.mxu1 }
 0xb78   :  { %v2219_v52 = vpack.c.bf16 %v2202_v4, %v2202_v4 }
 0xb7a   :  { %v2243_v22 = vunpack.c.l.b16 %v2219_v52 }
 0xb7c   :  { %v5078_v26 = vpack.c.b16 %v2243_v22, %v2242_v14 }
 0xb7d   :  { %2459 = vmatmul.bf16.gmra.mxu3 %v3770_v41 }
 0xb7e   :  { %3753 = vmatmul.msk.bf16.gmra.mxu2 %vm1180_vm6, %v5078_v26 }
 0xb7f   :  { %v2205_v63 = vpop.f32.mrf.mxu1 }
 0xb80   :  { %v2220_v48 = vpack.c.bf16 %v2205_v63, %v2205_v63 }
 0xb82   :  { %v2244_v39 = vunpack.c.l.b16 %v2220_v48 }
 0xb87   :  { %v2207_v42 = vpop.f32.mrf.mxu1 }
 0xb88   :  { %v2221_v43 = vpack.c.bf16 %v2207_v42, %v2207_v42 }
 0xb8a   :  { %v2245_v36 = vunpack.c.l.b16 %v2221_v43 }
 0xb8c   :  { %v2251_v3 = vpack.c.b16 %v2245_v36, %v2244_v39 }
 0xb8e   :  { %3754 = vmatmul.msk.bf16.gmra.mxu2 %vm1180_vm6, %v2251_v3 }
 0xbbd   :  { %v2279_v16 = vpop.f32.mrf.mxu2 }
 0xbbe   :  { %v2309_v48 = vmul.f32 2.0, %v2279_v16 }
 0xbc5   :  { %v2281_v29 = vpop.f32.mrf.mxu2 }
 0xbc6   :  { %v2310_v41 = vmul.f32 2.0, %v2281_v29 }
 0xbd1   :  { %v2284_v44 = vpop.f32.mrf.mxu2 }
 0xbd2   :  { %v2311_v23 = vmul.f32 2.0, %v2284_v44 }
 0xbd4   :  { %v2323_v42 = vsub.f32 %v2311_v23, %v5006_v30 }
 0xbd9   :  { %v2286_v40 = vpop.f32.mrf.mxu2 }
 0xbda   :  { %v2312_v19 = vmul.f32 2.0, %v2286_v40 }
 0xbdc   :  { %v2324_v14 = vsub.f32 %v2312_v19, %v5010_v18 }
 0xbde   :  { %v2336_v44 = vpack.c.bf16 %v2324_v14, %v2324_v14 }
 0xbe1   :  { %v2289_v35 = vpop.f32.mrf.mxu2 }
 0xbe2   :  { %v2313_v2 = vmul.f32 2.0, %v2289_v35  ;;  %v2321_v35 = vsub.f32 %v2309_v48, %v4994_v60 }
 0xbe4   :  { %v2325_v13 = vsub.f32 %v2313_v2, %v5018_v53  ;;  %v2333_v16 = vpack.c.bf16 %v2321_v35, %v2321_v35 }
 0xbe9   :  { %v2291_v5 = vpop.f32.mrf.mxu2 }
 0xbea   :  { %v2314_v31 = vmul.f32 2.0, %v2291_v5  ;;  %v2372_v5 = vunpack.c.l.b16 %v2336_v44 }
 0xbec   :  { %v2326_v15 = vsub.f32 %v2314_v31, %v5022_v6  ;;  %v2322_v6 = vsub.f32 %v2310_v41, %v4998_v61 }
 0xbee   :  { %v2338_v22 = vpack.c.bf16 %v2326_v15, %v2326_v15  ;;  %v2334_v18 = vpack.c.bf16 %v2322_v6, %v2322_v6  ;;  %v3771_v6 = vld [vmem:[%s5395_s7 + $0x24] sm:$0xf0] }
 0xbf0   :  { %v2374_v40 = vunpack.c.l.b16 %v2338_v22  ;;  %v2370_v31 = vunpack.c.l.b16 %v2334_v18 }
 0xbf1   :  { %v2294_v27 = vpop.f32.mrf.mxu2 }
 0xbf2   :  { %v2315_v47 = vmul.f32 2.0, %v2294_v27 }
 0xbf4   :  { %v2327_v51 = vsub.f32 %v2315_v47, %v5027_v37  ;;  %v2337_v37 = vpack.c.bf16 %v2325_v13, %v2325_v13 }
 0xbf6   :  { %v2339_v4 = vpack.c.bf16 %v2327_v51, %v2327_v51  ;;  %v2373_v29 = vunpack.c.l.b16 %v2337_v37  ;;  %v2369_v51 = vunpack.c.l.b16 %v2333_v16  ;;  %v3765_v37 = vld [vmem:[%s5395_s7 + $0x8] sm:$0xf] }
 0xbf8   :  { %v2375_v43 = vunpack.c.l.b16 %v2339_v4  ;;  %v2383_v27 = vpack.c.b16 %v2374_v40, %v2373_v29  ;;  %v2381_v61 = vpack.c.b16 %v2370_v31, %v2369_v51  ;;  %v3777_v40 = vld [vmem:[%s5395_s7 + $0x20] sm:$0xf] }
 0xbf9   :  { %v2296_v59 = vpop.f32.mrf.mxu2 }
 0xbfa   :  { %v2316_v20 = vmul.f32 2.0, %v2296_v59 }
 0xbfc   :  { %v2328_v52 = vsub.f32 %v2316_v20, %v5031_v9  ;;  %v2335_v9 = vpack.c.bf16 %v2323_v42, %v2323_v42 }
 0xbfe   :  { %v2340_v63 = vpack.c.bf16 %v2328_v52, %v2328_v52  ;;  %v2371_v47 = vunpack.c.l.b16 %v2335_v9  ;;  %v2455_v9 = vpop.f32.mrf.mxu3 }
 0xc00   :  { %v2376_v39 = vunpack.c.l.b16 %v2340_v63  ;;  %v2382_v2 = vpack.c.b16 %v2372_v5, %v2371_v47 }
 0xc01   :  { %v2299_v36 = vpop.f32.mrf.mxu2 }
 0xc02   :  { %v2384_v53 = vpack.c.b16 %v2376_v39, %v2375_v43  ;;  %v2317_v15 = vmul.f32 2.0, %v2299_v36  ;;  %v3946_v43 = vld [vmem:[%s5395_s7 + $0x10] sm:$0xf0] }
 0xc03   :  { %v3766_v36 = vor.u32 %v3946_v43, %v3765_v37 }
 0xc04   :  { %2465 = vmatpush.bf16.msrb.mxu0 %v2384_v53  ;;  %v2329_v52 = vsub.f32 %v2317_v15, %v4804_v1  ;;  %v3949_v53 = vld [vmem:[%s5395_s7 + $0x28] sm:$0xf0] }
 0xc05   :  { %v3778_v35 = vor.u32 %v3949_v53, %v3777_v40 }
 0xc06   :  { %v2457_v29 = vpop.f32.mrf.mxu3 }
 0xc08   :  { %2466 = vmatpush.bf16.msrb.mxu0 %v2383_v27 }
 0xc09   :  { %v2301_v30 = vpop.f32.mrf.mxu2 }
 0xc0a   :  { %v2318_v60 = vmul.f32 2.0, %v2301_v30 }
 0xc0c   :  { %2467 = vmatpush.bf16.msrb.mxu0 %v2382_v2  ;;  %v2330_v13 = vsub.f32 %v2318_v60, %v4802_v24  ;;  %v2341_v24 = vpack.c.bf16 %v2329_v52, %v2329_v52 }
 0xc0e   :  { %v2460_v18 = vpop.f32.mrf.mxu3 }
 0xc10   :  { %2468 = vmatpush.bf16.msrb.mxu0 %v2381_v61 }
 0xc11   :  { %v2304_v59 = vpop.f32.mrf.mxu2 }
 0xc12   :  { %v2319_v19 = vmul.f32 2.0, %v2304_v59 }
 0xc14   :  { %2469 = vmatpush.bf16.msrb.mxu0 %v2251_v3  ;;  %v2331_v20 = vsub.f32 %v2319_v19, %v4814_v54  ;;  %v3944_v3 = vld [vmem:[%s5395_s7 + $0x4] sm:$0xf]  ;;  %v3759_v54 = vld [vmem:[%s5395_s7 + $0xc] sm:$0xf0] }
 0xc15   :  { %v3762_v63 = vor.u32 %v3944_v3, %v3759_v54 }
 0xc16   :  { %v2343_v41 = vpack.c.bf16 %v2331_v20, %v2331_v20  ;;  %v2462_v27 = vpop.f32.mrf.mxu3 }
 0xc18   :  { %2470 = vmatpush.bf16.msrb.mxu0 %v5078_v26  ;;  %v2342_v26 = vpack.c.bf16 %v2330_v13, %v2330_v13  ;;  %v2379_v48 = vunpack.c.l.b16 %v2343_v41 }
 0xc19   :  { %v2306_v23 = vpop.f32.mrf.mxu2 }
 0xc1a   :  { %v2320_v4 = vmul.f32 2.0, %v2306_v23  ;;  %v2378_v1 = vunpack.c.l.b16 %v2342_v26 }
 0xc1c   :  { %v2332_v14 = vsub.f32 %v2320_v4, %v4816_v32  ;;  %2471 = vmatpush.bf16.msrb.mxu0 %v5068_v0  ;;  %v2377_v0 = vunpack.c.l.b16 %v2341_v24 }
 0xc1e   :  { %v2344_v22 = vpack.c.bf16 %v2332_v14, %v2332_v14  ;;  %v2385_v39 = vpack.c.b16 %v2378_v1, %v2377_v0 }
 0xc20   :  { %v2380_v42 = vunpack.c.l.b16 %v2344_v22  ;;  %2472 = vmatpush.bf16.msrb.mxu0 %v5056_v56  ;;  %v3947_v56 = vld [vmem:[%s5395_s7 + $0x1c] sm:$0xf] }
 0xc21   :  { %v3774_v44 = vor.u32 %v3947_v56, %v3771_v6 }
 0xc22   :  { %v2386_v32 = vpack.c.b16 %v2380_v42, %v2379_v48 }
 0xc23   :  { %2473 = vmatmul.bf16.vlgmr.msrb.gmra.mxu0 %v3762_v63 }
 0xc24   :  { %2490 = vmatpush.bf16.msrb.mxu3 %v2386_v32 }
 0xc28   :  { %2491 = vmatpush.bf16.msrb.mxu3 %v2385_v39 }
 0xc2b   :  { %3779 = vmatmul.msk.bf16.vlgmr.msrb.gmra.mxu3 %vm2439_vm0, %v3766_v36 }
 0xc2c   :  { %2760 = vmatpush.bf16.msra.mxu3 %v4088_v7 }
 0xc30   :  { %2761 = vmatpush.bf16.msra.mxu3 %v4117_v17 }
 0xc33   :  { %2478 = vmatmul.bf16.gmra.mxu0 %v3774_v44 }
 0xc34   :  { %2762 = vmatpush.bf16.msra.mxu3 %v4165_v33 }
 0xc38   :  { %2763 = vmatpush.bf16.msra.mxu3 %v4201_v45 }
 0xc3b   :  { %3780 = vmatmul.msk.bf16.gmra.mxu3 %vm2439_vm0, %v3778_v35 }
 0xc3c   :  { %2764 = vmatpush.bf16.msra.mxu3 %v4237_v57 }
 0xc40   :  { %2765 = vmatpush.bf16.msra.mxu3 %v4279_v10 }
 0xc44   :  { %2766 = vmatpush.bf16.msra.mxu3 %v4321_v28 }
 0xc48   :  { %2767 = vmatpush.bf16.msra.mxu3 %v4357_v49 }
 0xc4c   :  { %2892 = vmatpush.bf16.msrb.mxu3 %v4088_v7  ;;  %v2402_v7 = vpop.permute.xlu0 %2401 }
 0xc4d   :  { %v2456_v16 = vadd.f32 %v2455_v9, %v2402_v7  ;;  %v2461_v59 = vadd.f32 %v2460_v18, %v2402_v7 }
 0xc50   :  { %2893 = vmatpush.bf16.msrb.mxu3 %v4117_v17 }
 0xc54   :  { %2894 = vmatpush.bf16.msrb.mxu3 %v4165_v33 }
 0xc58   :  { %2895 = vmatpush.bf16.msrb.mxu3 %v4201_v45 }
 0xc5c   :  { %2896 = vmatpush.bf16.msrb.mxu3 %v4237_v57 }
 0xc60   :  { %2897 = vmatpush.bf16.msrb.mxu3 %v4279_v10  ;;  %v2407_v10 = vpop.permute.xlu1 %2406 }
 0xc61   :  { %v2463_v4 = vadd.f32 %v2462_v27, %v2407_v10 }
 0xc64   :  { %2898 = vmatpush.bf16.msrb.mxu3 %v4321_v28  ;;  %v2458_v28 = vadd.f32 %v2457_v29, %v2407_v10  ;;  %v3809_v10 = vld [vmem:[%s5396_s13 + $0x38] sm:$0xf0] }
 0xc68   :  { %2899 = vmatpush.bf16.msrb.mxu3 %v4357_v49 }
 0xca0   :  { %v2474_v5 = vpop.f32.mrf.mxu0 }
 0xca1   :  { %v2475_v17 = vadd.f32 %v2474_v5, %v2456_v16 }
 0xca8   :  { %v2476_v47 = vpop.f32.mrf.mxu0 }
 0xca9   :  { %v2477_v31 = vadd.f32 %v2476_v47, %v2458_v28 }
 0xcae   :  { %v2493_v33 = vpop.f32.mrf.mxu3 }
 0xcaf   :  { %v5138_v30 = vadd.f32 %v2493_v33, %v2475_v17 }
 0xcb0   :  { %v2479_v61 = vpop.f32.mrf.mxu0 }
 0xcb1   :  { %v2503_v45 = vsel %vm1180_vm6, %v5138_v30, 0.0  ;;  %v2515_v57 = vmul.f32 %v5138_v30, %v5138_v30  ;;  %v2480_v60 = vadd.f32 %v2479_v61, %v2461_v59 }
 0xcb2   :  { %2504 = vadd.xlane.f32.xlu2 %v2503_v45 }
 0xcb3   :  { %v2519_v49 = vsel %vm1180_vm6, %v2515_v57, 0.0  ;;  %v3956_v57 = vld [vmem:[%s5396_s13 + $0x34] sm:$0xf] }
 0xcb4   :  { %2520 = vadd.xlane.f32.xlu0 %v2519_v49  ;;  %v3812_v49 = vor.u32 %v3956_v57, %v3809_v10  ;;  %v5426_v10 = vld [vmem:[#allocation2_spill] sm:$0xff] }
 0xcb6   :  { %v2495_v2 = vpop.f32.mrf.mxu3  ;;  %2684 = vmatpush.bf16.msra.mxu1 %v3812_v49 }
 0xcb7   :  { %v5145_v51 = vadd.f32 %v2495_v2, %v2477_v31 }
 0xcb8   :  { %v2481_v13 = vpop.f32.mrf.mxu0 }
 0xcb9   :  { %v2506_v19 = vsel %vm1180_vm6, %v5145_v51, 0.0  ;;  %v2482_v52 = vadd.f32 %v2481_v13, %v2463_v4  ;;  %v2516_v41 = vmul.f32 %v5145_v51, %v5145_v51 }
 0xcbb   :  { %v2522_v26 = vsel %vm1180_vm6, %v2516_v41, 0.0  ;;  %v2395_v41 = vld [vmem:[%s5386_s9 + $0xb8] sm:$0xff] }
 0xcbc   :  { %2507 = vadd.xlane.f32.xlu0 %v2506_v19 }
 0xcbe   :  { %v2498_v15 = vpop.f32.mrf.mxu3 }
 0xcbf   :  { %v5149_v20 = vadd.f32 %v2498_v15, %v2480_v60  ;;  %v2396_v60 = vld [vmem:[%s5386_s9 + $0xc0] sm:$0xff] }
 0xcc1   :  { %v2509_v23 = vsel %vm1180_vm6, %v5149_v20, 0.0  ;;  %v2517_v24 = vmul.f32 %v5149_v20, %v5149_v20 }
 0xcc2   :  { %2510 = vadd.xlane.f32.xlu1 %v2509_v23 }
 0xcc3   :  { %v2525_v48 = vsel %vm1180_vm6, %v2517_v24, 0.0 }
 0xcc6   :  { %v2500_v14 = vpop.f32.mrf.mxu3 }
 0xcc7   :  { %v5155_v3 = vadd.f32 %v2500_v14, %v2482_v52 }
 0xcc9   :  { %v2512_v54 = vsel %vm1180_vm6, %v5155_v3, 0.0  ;;  %v2518_v22 = vmul.f32 %v5155_v3, %v5155_v3 }
 0xcca   :  { %2513 = vadd.xlane.f32.xlu2 %v2512_v54  ;;  %2523 = vadd.xlane.f32.xlu1 %v2522_v26 }
 0xccb   :  { %v2528_v63 = vsel %vm1180_vm6, %v2518_v22, 0.0  ;;  %v2397_v22 = vld [vmem:[%s5386_s9 + $0xc8] sm:$0xff] }
 0xccc   :  { %2529 = vadd.xlane.f32.xlu0 %v2528_v63 }
 0xcd2   :  { %2526 = vadd.xlane.f32.xlu2 %v2525_v48  ;;  %v3024_v48 = vld [vmem:[%s5386_s9 + $0xd8] sm:$0xff] }
 0xd25   :  { %v2505_v1 = vpop.xlane.xlu2 %2504 }
 0xd27   :  { %v2521_v42 = vpop.xlane.xlu0 %2520 }
 0xd2f   :  { %v2508_v0 = vpop.xlane.xlu0 %2507 }
 0xd35   :  { %v2511_v32 = vpop.xlane.xlu1 %2510 }
 0xd36   :  { %v2531_v56 = vadd.f32 %v2511_v32, %v2505_v1  ;;  %v2398_v1 = vld [vmem:[%s5386_s9 + $0xd0] sm:$0xff] }
 0xd38   :  { %v2535_v35 = vmul.f32 %v2531_v56, %v4722_v55 }
 0xd3a   :  { %v2539_v27 = vmul.f32 %v2535_v35, %v2535_v35 }
 0xd3d   :  { %v2514_v37 = vpop.xlane.xlu2 %2513  ;;  %v2524_v39 = vpop.xlane.xlu1 %2523 }
 0xd3e   :  { %v2532_v43 = vadd.f32 %v2514_v37, %v2508_v0  ;;  %v3954_v0 = vld [vmem:[%s5396_s13 + $0x24] sm:$0xf]  ;;  %v3801_v37 = vld [vmem:[%s5396_s13 + $0x28] sm:$0xf0] }
 0xd3f   :  { %v2530_v36 = vpop.xlane.xlu0 %2529 }
 0xd40   :  { %v2536_v6 = vmul.f32 %v2532_v43, %v4722_v55  ;;  %v2534_v44 = vadd.f32 %v2530_v36, %v2524_v39  ;;  %v3952_v43 = vld [vmem:[%s5396_s13 + $0x14] sm:$0xf]  ;;  %v3804_v39 = vor.u32 %v3954_v0, %v3801_v37  ;;  %v3793_v36 = vld [vmem:[%s5396_s13 + $0x18] sm:$0xf0] }
 0xd41   :  { %v3796_v56 = vor.u32 %v3952_v43, %v3793_v36  ;;  %v5431_v36 = vld [vmem:[#allocation7_spill] sm:$0xff] }
 0xd42   :  { %v2540_v40 = vmul.f32 %v2536_v6, %v2536_v6  ;;  %v2538_v53 = vmul.f32 %v2534_v44, %v4722_v55  ;;  %2685 = vmatpush.bf16.msra.mxu1 %v3804_v39  ;;  %v3957_v44 = vld [vmem:[%s5396_s13 + $0x34] sm:$0xf0] }
 0xd44   :  { %v2542_v9 = vsub.f32 %v2538_v53, %v2540_v40  ;;  %v3799_v53 = vld [vmem:[%s5396_s13 + $0x20] sm:$0xf] }
 0xd45   :  { %v2527_v29 = vpop.xlane.xlu2 %2526 }
 0xd46   :  { %v2544_v18 = vmax.f32 %v2542_v9, 0.0  ;;  %v2533_v5 = vadd.f32 %v2527_v29, %v2521_v42  ;;  %2686 = vmatpush.bf16.msra.mxu1 %v3796_v56  ;;  %v3791_v29 = vld [vmem:[%s5396_s13 + $0x10] sm:$0xf] }
 0xd47   :  { %v5432_v56 = vld [vmem:[#allocation8_spill] sm:$0xff] }
 0xd48   :  { %v2546_v7 = vadd.f32 1e-05, %v2544_v18  ;;  %v2537_v16 = vmul.f32 %v2533_v5, %v4722_v55  ;;  %v3953_v18 = vld [vmem:[%s5396_s13 + $0x14] sm:$0xf0] }
 0xd49   :  { %v3792_v5 = vor.u32 %v3953_v18, %v3791_v29 }
 0xd4a   :  { %3985 = vrsqrt.f32 %v2546_v7  ;;  %v2541_v17 = vsub.f32 %v2537_v16, %v2539_v27  ;;  %vm2563_vm2 = vweird.f32 %v2546_v7  ;;  %v3783_v27 = vld [vmem:[%s5396_s13] sm:$0xf]  ;;  %v3950_v16 = vld [vmem:[%s5396_s13 + $0x4] sm:$0xf] }
 0xd4c   :  { %v2543_v47 = vmax.f32 %v2541_v17, 0.0 }
 0xd4e   :  { %v2545_v33 = vadd.f32 1e-05, %v2543_v47  ;;  %v3785_v47 = vld [vmem:[%s5396_s13 + $0x8] sm:$0xf0] }
 0xd50   :  { %v3986_v45 = vpop.eup %3985  ;;  %3987 = vrsqrt.f32 %v2545_v33  ;;  %vm2553_vm5 = vweird.f32 %v2545_v33 }
 0xd51   :  { %v2558_v28 = vmul.f32 %v3986_v45, %v2546_v7  ;;  %vm2564_vm1 = vweird.f32 %v3986_v45  ;;  %v3951_v7 = vld [vmem:[%s5396_s13 + $0x4] sm:$0xf0] }
 0xd52   :  { %vm2565_vm3 = vmor %vm2563_vm2, %vm2564_vm1  ;;  %v3784_v17 = vor.u32 %v3951_v7, %v3783_v27 }
 0xd53   :  { %v2559_v31 = vmul.f32 %v3986_v45, %v2558_v28 }
 0xd55   :  { %v2560_v2 = vmul.f32 0.5, %v2559_v31  ;;  %v5427_v31 = vld [vmem:[#allocation3_spill] sm:$0xff] }
 0xd56   :  { %v3988_v55 = vpop.eup %3987 }
 0xd57   :  { %v2548_v61 = vmul.f32 %v3988_v55, %v2545_v33  ;;  %v2561_v59 = vsub.f32 1.5, %v2560_v2  ;;  %vm2554_vm4 = vweird.f32 %v3988_v55  ;;  %v3788_v33 = vor.u32 %v3950_v16, %v3785_v47 }
 0xd58   :  { %vm2555_vm7 = vmor %vm2553_vm5, %vm2554_vm4 }
 0xd59   :  { %v2549_v19 = vmul.f32 %v3988_v55, %v2548_v61  ;;  %v2562_v15 = vmul.f32 %v3986_v45, %v2561_v59  ;;  %2687 = vmatpush.bf16.msra.mxu1 %v3788_v33  ;;  %v5428_v61 = vld [vmem:[#allocation4_spill] sm:$0xff] }
 0xd5b   :  { %v2566_v23 = vsel %vm2565_vm3, %v3986_v45, %v2562_v15  ;;  %v2550_v13 = vmul.f32 0.5, %v2549_v19 }
 0xd5c   :  { %v2568_v4 = vmul.f32 %v2566_v23, %v2396_v60  ;;  %v5429_v60 = vld [vmem:[#allocation5_spill] sm:$0xff] }
 0xd5d   :  { %v2551_v52 = vsub.f32 1.5, %v2550_v13  ;;  %2808 = vmatpush.bf16.msrb.mxu1 %v4102_v12  ;;  %v5430_v13 = vld [vmem:[#allocation6_spill] sm:$0xff] }
 0xd5e   :  { %2580 = vperm.xlu2 %3963, %v2568_v4   ;;  %v2570_v42 = vmul.f32 %v2568_v4, %v2536_v6  ;;  %v3807_v6 = vld [vmem:[%s5396_s13 + $0x30] sm:$0xf] }
 0xd5f   :  { %v2552_v14 = vmul.f32 %v3988_v55, %v2551_v52  ;;  %v3808_v40 = vor.u32 %v3957_v44, %v3807_v6  ;;  %v2704_v6 = vpack.c.bf16 %v5432_v56, %v5431_v36  ;;  %v5433_v44 = vld [vmem:[#allocation9_spill] sm:$0xff] }
 0xd60   :  { %v2572_v32 = vsub.f32 %v2398_v1, %v2570_v42 }
 0xd61   :  { %v2556_v54 = vsel %vm2555_vm7, %v3988_v55, %v2552_v14  ;;  %2665 = vmatpush.bf16.msra.mxu0 %v3808_v40  ;;  %2809 = vmatpush.bf16.msrb.mxu1 %v4140_v25  ;;  %v5434_v40 = vld [vmem:[#allocation10_spill] sm:$0xff]  ;;  %v2721_v29 = vunpack.c.h.b16 %v2704_v6 }
 0xd62   :  { %v2567_v26 = vmul.f32 %v2556_v54, %v2395_v41 }
 0xd64   :  { %2575 = vperm.xlu1 %3964, %v2567_v26   ;;  %v2569_v63 = vmul.f32 %v2567_v26, %v2535_v35  ;;  %v3955_v35 = vld [vmem:[%s5396_s13 + $0x24] sm:$0xf0] }
 0xd65   :  { %v3800_v9 = vor.u32 %v3955_v35, %v3799_v53  ;;  %2810 = vmatpush.bf16.msrb.mxu1 %v4179_v38  ;;  %v2705_v53 = vpack.c.bf16 %v5434_v40, %v5433_v44  ;;  %v2720_v35 = vunpack.c.l.b16 %v2704_v6 }
 0xd66   :  { %v2571_v24 = vsub.f32 %v2397_v22, %v2569_v63 }
 0xd67   :  { %2666 = vmatpush.bf16.msra.mxu0 %v3800_v9  ;;  %v2722_v9 = vunpack.c.l.b16 %v2705_v53  ;;  %v2723_v18 = vunpack.c.h.b16 %v2705_v53 }
 0xd68   :  { %2589 = vperm.xlu0 %3962, %v2571_v24  }
 0xd69   :  { %2811 = vmatpush.bf16.msrb.mxu1 %v4215_v50  ;;  %v5319_v27 = vpack.c.b16 %v2723_v18, %v2721_v29 }
 0xd6b   :  { %2667 = vmatpush.bf16.msra.mxu0 %v3792_v5  ;;  %v5317_v5 = vpack.c.b16 %v2722_v9, %v2720_v35 }
 0xd6c   :  { %3027 = vperm.xlu1 %3964, %v3024_v48  }
 0xd6d   :  { %2812 = vmatpush.bf16.msrb.mxu1 %v4251_v62 }
 0xd6f   :  { %2668 = vmatpush.bf16.msra.mxu0 %v3784_v17 }
 0xd70   :  { %2594 = vperm.xlu0 %3962, %v2572_v32  }
 0xd71   :  { %2813 = vmatpush.bf16.msrb.mxu1 %v5426_v10 }
 0xd73   :  { %2784 = vmatpush.bf16.msrb.mxu0 %v4090_v8 }
 0xd75   :  { %2814 = vmatpush.bf16.msrb.mxu1 %v5428_v61 }
 0xd77   :  { %2785 = vmatpush.bf16.msrb.mxu0 %v4129_v21 }
 0xd79   :  { %2815 = vmatpush.bf16.msrb.mxu1 %v5430_v13 }
 0xd7b   :  { %2786 = vmatpush.bf16.msrb.mxu0 %v4167_v34 }
 0xd7f   :  { %2787 = vmatpush.bf16.msrb.mxu0 %v4203_v46 }
 0xd83   :  { %2788 = vmatpush.bf16.msrb.mxu0 %v4239_v58 }
 0xd87   :  { %2789 = vmatpush.bf16.msrb.mxu0 %v4281_v11 }
 0xd8b   :  { %2790 = vmatpush.bf16.msrb.mxu0 %v5427_v31 }
 0xd8f   :  { %2791 = vmatpush.bf16.msrb.mxu0 %v5429_v60 }
 0xdb8   :  { %v2581_v28 = vpop.permute.xlu2 %2580 }
 0xdb9   :  { %v2584_v2 = vmul.f32 %v2581_v28, %v5145_v51 }
 0xdd6   :  { %v2576_v57 = vpop.permute.xlu1 %2575 }
 0xdd7   :  { %v2583_v49 = vmul.f32 %v2576_v57, %v5138_v30  ;;  %v2586_v30 = vmul.f32 %v2581_v28, %v5155_v3  ;;  %v2585_v51 = vmul.f32 %v2576_v57, %v5149_v20 }
 0xdda   :  { %v2590_v45 = vpop.permute.xlu0 %2589 }
 0xddb   :  { %v2597_v55 = vadd.f32 %v2590_v45, %v2583_v49  ;;  %v2599_v41 = vadd.f32 %v2590_v45, %v2585_v51 }
 0xddd   :  { %v2601_v15 = vmax.f32 %v2597_v55, 0.0  ;;  %v2603_v54 = vmax.f32 %v2599_v41, 0.0 }
 0xde2   :  { %v2595_v59 = vpop.permute.xlu0 %2594 }
 0xde3   :  { %v2598_v19 = vadd.f32 %v2595_v59, %v2584_v2  ;;  %v2600_v52 = vadd.f32 %v2595_v59, %v2586_v30 }
 0xde5   :  { %v2602_v23 = vmax.f32 %v2598_v19, 0.0  ;;  %v2604_v14 = vmax.f32 %v2600_v52, 0.0 }
 0xde7   :  { %v2613_v4 = vpack.c.bf16 %v2602_v23, %v2601_v15 }
 0xde9   :  { %3813 = vmatmul.msk.bf16.vlgmr.msra.gmra.mxu0 %vm1180_vm6, %v2613_v4  ;;  %3815 = vmatmul.msk.bf16.vlgmr.msra.gmra.mxu1 %vm1180_vm6, %v2613_v4 }
 0xdea   :  { %2916 = vmatpush.bf16.msra.mxu0 %v4090_v8  ;;  %2940 = vmatpush.bf16.msra.mxu1 %v4102_v12  ;;  %v2614_v8 = vpack.c.bf16 %v2604_v14, %v2603_v54 }
 0xdee   :  { %2917 = vmatpush.bf16.msra.mxu0 %v4129_v21  ;;  %2941 = vmatpush.bf16.msra.mxu1 %v4140_v25 }
 0xdf2   :  { %2918 = vmatpush.bf16.msra.mxu0 %v4167_v34  ;;  %2942 = vmatpush.bf16.msra.mxu1 %v4179_v38 }
 0xdf6   :  { %2919 = vmatpush.bf16.msra.mxu0 %v4203_v46  ;;  %2943 = vmatpush.bf16.msra.mxu1 %v4215_v50 }
 0xdf9   :  { %3814 = vmatmul.msk.bf16.gmra.mxu0 %vm1180_vm6, %v2614_v8  ;;  %3816 = vmatmul.msk.bf16.gmra.mxu1 %vm1180_vm6, %v2614_v8 }
 0xdfa   :  { %2920 = vmatpush.bf16.msra.mxu0 %v4239_v58  ;;  %2944 = vmatpush.bf16.msra.mxu1 %v4251_v62 }
 0xdfe   :  { %2921 = vmatpush.bf16.msra.mxu0 %v4281_v11  ;;  %2945 = vmatpush.bf16.msra.mxu1 %v5426_v10 }
 0xe02   :  { %2922 = vmatpush.bf16.msra.mxu0 %v5427_v31  ;;  %2946 = vmatpush.bf16.msra.mxu1 %v5428_v61 }
 0xe06   :  { %2923 = vmatpush.bf16.msra.mxu0 %v5429_v60  ;;  %2947 = vmatpush.bf16.msra.mxu1 %v5430_v13 }
 0xe66   :  { %v5273_v12 = vpop.f32.mrf.mxu0  ;;  %v5275_v21 = vpop.f32.mrf.mxu1 }
 0xe67   :  { %v2700_v25 = vpack.c.bf16 %v5275_v21, %v5273_v12 }
 0xe69   :  { %v2712_v50 = vunpack.c.l.b16 %v2700_v25  ;;  %v2713_v58 = vunpack.c.h.b16 %v2700_v25 }
 0xe6e   :  { %v5279_v34 = vpop.f32.mrf.mxu0  ;;  %v5281_v38 = vpop.f32.mrf.mxu1 }
 0xe6f   :  { %v2701_v46 = vpack.c.bf16 %v5281_v38, %v5279_v34 }
 0xe71   :  { %v2714_v62 = vunpack.c.l.b16 %v2701_v46  ;;  %v2715_v11 = vunpack.c.h.b16 %v2701_v46 }
 0xe73   :  { %v5285_v20 = vpack.c.b16 %v2714_v62, %v2712_v50  ;;  %v5287_v3 = vpack.c.b16 %v2715_v11, %v2713_v58 }
 0xe75   :  { %2744 = vmatmul.bf16.vlgmr.msra.gmra.mxu2 %v5285_v20  ;;  %2768 = vmatmul.bf16.vlgmr.msra.gmra.mxu3 %v5287_v3 }
 0xe76   :  { %2792 = vmatmul.bf16.vlgmr.msrb.gmra.mxu0 %v5285_v20  ;;  %2816 = vmatmul.bf16.vlgmr.msrb.gmra.mxu1 %v5287_v3  ;;  %v5293_v26 = vpop.f32.mrf.mxu0  ;;  %v5295_v22 = vpop.f32.mrf.mxu1 }
 0xe77   :  { %v2702_v63 = vpack.c.bf16 %v5295_v22, %v5293_v26 }
 0xe79   :  { %v2716_v1 = vunpack.c.l.b16 %v2702_v63  ;;  %v2717_v32 = vunpack.c.h.b16 %v2702_v63 }
 0xe7e   :  { %v5299_v24 = vpop.f32.mrf.mxu0  ;;  %v5301_v48 = vpop.f32.mrf.mxu1 }
 0xe7f   :  { %v2703_v42 = vpack.c.bf16 %v5301_v48, %v5299_v24 }
 0xe81   :  { %v2718_v0 = vunpack.c.l.b16 %v2703_v42  ;;  %v2719_v37 = vunpack.c.h.b16 %v2703_v42 }
 0xe83   :  { %v5305_v43 = vpack.c.b16 %v2718_v0, %v2716_v1  ;;  %v5307_v39 = vpack.c.b16 %v2719_v37, %v2717_v32 }
 0xe85   :  { %2749 = vmatmul.bf16.gmra.mxu2 %v5305_v43  ;;  %2773 = vmatmul.bf16.gmra.mxu3 %v5307_v39 }
 0xe86   :  { %2797 = vmatmul.bf16.gmra.mxu0 %v5305_v43  ;;  %2821 = vmatmul.bf16.gmra.mxu1 %v5307_v39 }
 0xe95   :  { %2754 = vmatmul.bf16.gmra.mxu2 %v5317_v5  ;;  %2778 = vmatmul.bf16.gmra.mxu3 %v5319_v27 }
 0xe96   :  { %2802 = vmatmul.bf16.gmra.mxu0 %v5317_v5  ;;  %2826 = vmatmul.bf16.gmra.mxu1 %v5319_v27 }
 0xef3   :  { %v2793_v7 = vpop.f32.mrf.mxu0  ;;  %v2817_v16 = vpop.f32.mrf.mxu1 }
 0xef4   :  { %v2818_v10 = vadd.f32 %v2817_v16, %v2793_v7 }
 0xef8   :  { %v2745_v17 = vpop.f32.mrf.mxu2  ;;  %v2769_v47 = vpop.f32.mrf.mxu3 }
 0xef9   :  { %v2770_v57 = vadd.f32 %v2769_v47, %v2745_v17 }
 0xefb   :  { %v2795_v33 = vpop.f32.mrf.mxu0  ;;  %v2819_v45 = vpop.f32.mrf.mxu1  ;;  %v2832_v31 = vpack.c.bf16 %v2818_v10, %v2770_v57 }
 0xefc   :  { %v2820_v2 = vadd.f32 %v2819_v45, %v2795_v33 }
 0xefd   :  { %v2844_v60 = vunpack.c.l.b16 %v2832_v31  ;;  %v2845_v15 = vunpack.c.h.b16 %v2832_v31 }
 0xf00   :  { %v2747_v28 = vpop.f32.mrf.mxu2  ;;  %v2771_v49 = vpop.f32.mrf.mxu3 }
 0xf01   :  { %v2772_v55 = vadd.f32 %v2771_v49, %v2747_v28 }
 0xf03   :  { %v2833_v61 = vpack.c.bf16 %v2820_v2, %v2772_v55  ;;  %v2798_v59 = vpop.f32.mrf.mxu0  ;;  %v2822_v19 = vpop.f32.mrf.mxu1 }
 0xf04   :  { %v2823_v8 = vadd.f32 %v2822_v19, %v2798_v59 }
 0xf05   :  { %v2846_v23 = vunpack.c.l.b16 %v2833_v61  ;;  %v2847_v13 = vunpack.c.h.b16 %v2833_v61 }
 0xf07   :  { %v5325_v4 = vpack.c.b16 %v2846_v23, %v2844_v60  ;;  %v5327_v30 = vpack.c.b16 %v2847_v13, %v2845_v15 }
 0xf08   :  { %v2750_v51 = vpop.f32.mrf.mxu2  ;;  %v2774_v52 = vpop.f32.mrf.mxu3 }
 0xf09   :  { %2876 = vmatmul.bf16.vlgmr.msrb.gmra.mxu2 %v5325_v4  ;;  %2900 = vmatmul.bf16.vlgmr.msrb.gmra.mxu3 %v5327_v30  ;;  %v2775_v54 = vadd.f32 %v2774_v52, %v2750_v51 }
 0xf0a   :  { %2924 = vmatmul.bf16.vlgmr.msra.gmra.mxu0 %v5325_v4  ;;  %2948 = vmatmul.bf16.vlgmr.msra.gmra.mxu1 %v5327_v30 }
 0xf0b   :  { %v2800_v41 = vpop.f32.mrf.mxu0  ;;  %v2824_v14 = vpop.f32.mrf.mxu1  ;;  %v2834_v50 = vpack.c.bf16 %v2823_v8, %v2775_v54 }
 0xf0c   :  { %v2825_v58 = vadd.f32 %v2824_v14, %v2800_v41 }
 0xf0d   :  { %v2848_v1 = vunpack.c.l.b16 %v2834_v50  ;;  %v2849_v32 = vunpack.c.h.b16 %v2834_v50 }
 0xf10   :  { %v2752_v25 = vpop.f32.mrf.mxu2  ;;  %v2776_v46 = vpop.f32.mrf.mxu3 }
 0xf11   :  { %v2777_v62 = vadd.f32 %v2776_v46, %v2752_v25 }
 0xf13   :  { %v2835_v11 = vpack.c.bf16 %v2825_v58, %v2777_v62  ;;  %v2803_v63 = vpop.f32.mrf.mxu0  ;;  %v2827_v42 = vpop.f32.mrf.mxu1 }
 0xf14   :  { %v2828_v16 = vadd.f32 %v2827_v42, %v2803_v63 }
 0xf15   :  { %v2850_v0 = vunpack.c.l.b16 %v2835_v11  ;;  %v2851_v37 = vunpack.c.h.b16 %v2835_v11 }
 0xf17   :  { %v5333_v6 = vpack.c.b16 %v2850_v0, %v2848_v1  ;;  %v5335_v53 = vpack.c.b16 %v2851_v37, %v2849_v32 }
 0xf18   :  { %v2755_v35 = vpop.f32.mrf.mxu2  ;;  %v2779_v9 = vpop.f32.mrf.mxu3 }
 0xf19   :  { %2881 = vmatmul.bf16.gmra.mxu2 %v5333_v6  ;;  %2905 = vmatmul.bf16.gmra.mxu3 %v5335_v53  ;;  %v2780_v29 = vadd.f32 %v2779_v9, %v2755_v35 }
 0xf1a   :  { %2929 = vmatmul.bf16.gmra.mxu0 %v5333_v6  ;;  %2953 = vmatmul.bf16.gmra.mxu1 %v5335_v53 }
 0xf1b   :  { %v2805_v18 = vpop.f32.mrf.mxu0  ;;  %v2829_v7 = vpop.f32.mrf.mxu1  ;;  %v2836_v33 = vpack.c.bf16 %v2828_v16, %v2780_v29 }
 0xf1c   :  { %v2830_v45 = vadd.f32 %v2829_v7, %v2805_v18 }
 0xf1d   :  { %v2852_v28 = vunpack.c.l.b16 %v2836_v33  ;;  %v2853_v49 = vunpack.c.h.b16 %v2836_v33 }
 0xf20   :  { %v2757_v17 = vpop.f32.mrf.mxu2  ;;  %v2781_v47 = vpop.f32.mrf.mxu3 }
 0xf21   :  { %v2782_v57 = vadd.f32 %v2781_v47, %v2757_v17 }
 0xf23   :  { %v2837_v10 = vpack.c.bf16 %v2830_v45, %v2782_v57 }
 0xf25   :  { %v2854_v31 = vunpack.c.l.b16 %v2837_v10  ;;  %v2855_v2 = vunpack.c.h.b16 %v2837_v10 }
 0xf27   :  { %v5341_v55 = vpack.c.b16 %v2854_v31, %v2852_v28  ;;  %v5343_v61 = vpack.c.b16 %v2855_v2, %v2853_v49 }
 0xf29   :  { %2886 = vmatmul.bf16.gmra.mxu2 %v5341_v55  ;;  %2910 = vmatmul.bf16.gmra.mxu3 %v5343_v61 }
 0xf2a   :  { %2934 = vmatmul.bf16.gmra.mxu0 %v5341_v55  ;;  %2958 = vmatmul.bf16.gmra.mxu1 %v5343_v61 }
 0xf87   :  { %v2925_v59 = vpop.f32.mrf.mxu0  ;;  %v2949_v19 = vpop.f32.mrf.mxu1 }
 0xf88   :  { %v2950_v32 = vadd.f32 %v2949_v19, %v2925_v59 }
 0xf8a   :  { %v2965_v47 = vmul.f32 2.0, %v2950_v32 }
 0xf8c   :  { %v2877_v60 = vpop.f32.mrf.mxu2  ;;  %v2901_v15 = vpop.f32.mrf.mxu3  ;;  %v2977_v19 = vsub.f32 %v2965_v47, %v5275_v21 }
 0xf8d   :  { %v2902_v11 = vadd.f32 %v2901_v15, %v2877_v60 }
 0xf8f   :  { %v2927_v23 = vpop.f32.mrf.mxu0  ;;  %v2951_v13 = vpop.f32.mrf.mxu1  ;;  %v2964_v35 = vmul.f32 2.0, %v2902_v11 }
 0xf90   :  { %v2952_v63 = vadd.f32 %v2951_v13, %v2927_v23 }
 0xf91   :  { %v2976_v49 = vsub.f32 %v2964_v35, %v5273_v12 }
 0xf92   :  { %v2967_v9 = vmul.f32 2.0, %v2952_v63 }
 0xf93   :  { %v2988_v23 = vpack.c.bf16 %v2977_v19, %v2976_v49 }
 0xf94   :  { %v2879_v51 = vpop.f32.mrf.mxu2  ;;  %v2903_v52 = vpop.f32.mrf.mxu3  ;;  %v2979_v31 = vsub.f32 %v2967_v9, %v5281_v38 }
 0xf95   :  { %v2904_v46 = vadd.f32 %v2903_v52, %v2879_v51  ;;  %v3000_v21 = vunpack.c.l.b16 %v2988_v23 }
 0xf97   :  { %v2930_v41 = vpop.f32.mrf.mxu0  ;;  %v2954_v14 = vpop.f32.mrf.mxu1  ;;  %v2966_v0 = vmul.f32 2.0, %v2904_v46 }
 0xf98   :  { %v2955_v50 = vadd.f32 %v2954_v14, %v2930_v41 }
 0xf99   :  { %v2978_v33 = vsub.f32 %v2966_v0, %v5279_v34 }
 0xf9a   :  { %v2969_v37 = vmul.f32 2.0, %v2955_v50 }
 0xf9b   :  { %v2989_v60 = vpack.c.bf16 %v2979_v31, %v2978_v33 }
 0xf9c   :  { %v2882_v54 = vpop.f32.mrf.mxu2  ;;  %v2906_v8 = vpop.f32.mrf.mxu3  ;;  %v2981_v45 = vsub.f32 %v2969_v37, %v5295_v22 }
 0xf9d   :  { %v2907_v25 = vadd.f32 %v2906_v8, %v2882_v54  ;;  %v3002_v12 = vunpack.c.l.b16 %v2989_v60  ;;  %v3003_v46 = vunpack.c.h.b16 %v2989_v60 }
 0xf9f   :  { %v2932_v58 = vpop.f32.mrf.mxu0  ;;  %v2956_v62 = vpop.f32.mrf.mxu1  ;;  %v2968_v42 = vmul.f32 2.0, %v2907_v25  ;;  %v3012_v11 = vpack.c.b16 %v3002_v12, %v3000_v21 }
 0xfa0   :  { %v2957_v1 = vadd.f32 %v2956_v62, %v2932_v58  ;;  %v3001_v58 = vunpack.c.h.b16 %v2988_v23 }
 0xfa1   :  { %v2980_v29 = vsub.f32 %v2968_v42, %v5293_v26 }
 0xfa2   :  { %v2971_v16 = vmul.f32 2.0, %v2957_v1  ;;  %v3013_v63 = vpack.c.b16 %v3003_v46, %v3001_v58 }
 0xfa3   :  { %v2990_v2 = vpack.c.bf16 %v2981_v45, %v2980_v29 }
 0xfa4   :  { %v2884_v18 = vpop.f32.mrf.mxu2  ;;  %v2908_v7 = vpop.f32.mrf.mxu3  ;;  %v2983_v59 = vsub.f32 %v2971_v16, %v5301_v48 }
 0xfa5   :  { %v2909_v17 = vadd.f32 %v2908_v7, %v2884_v18  ;;  %v3004_v34 = vunpack.c.l.b16 %v2990_v2  ;;  %v3005_v51 = vunpack.c.h.b16 %v2990_v2 }
 0xfa7   :  { %v2970_v57 = vmul.f32 2.0, %v2909_v17  ;;  %v2935_v10 = vpop.f32.mrf.mxu0  ;;  %v2959_v28 = vpop.f32.mrf.mxu1 }
 0xfa8   :  { %v2960_v54 = vadd.f32 %v2959_v28, %v2935_v10 }
 0xfa9   :  { %v2982_v26 = vsub.f32 %v2970_v57, %v5299_v24 }
 0xfaa   :  { %v2973_v62 = vmul.f32 2.0, %v2960_v54 }
 0xfab   :  { %v2991_v15 = vpack.c.bf16 %v2983_v59, %v2982_v26 }
 0xfac   :  { %v2887_v13 = vpop.f32.mrf.mxu2  ;;  %v2911_v22 = vpop.f32.mrf.mxu3  ;;  %v2985_v35 = vsub.f32 %v2973_v62, %v5432_v56 }
 0xfad   :  { %v3006_v52 = vunpack.c.l.b16 %v2991_v15  ;;  %v3007_v41 = vunpack.c.h.b16 %v2991_v15  ;;  %v2912_v14 = vadd.f32 %v2911_v22, %v2887_v13 }
 0xfaf   :  { %v2937_v38 = vpop.f32.mrf.mxu0  ;;  %v2961_v8 = vpop.f32.mrf.mxu1  ;;  %v3014_v25 = vpack.c.b16 %v3006_v52, %v3004_v34  ;;  %v3015_v48 = vpack.c.b16 %v3007_v41, %v3005_v51  ;;  %v2972_v24 = vmul.f32 2.0, %v2912_v14 }
 0xfb0   :  { %v2962_v50 = vadd.f32 %v2961_v8, %v2937_v38 }
 0xfb1   :  { %3039 = vmatpush.bf16.msra.mxu2 %v3014_v25  ;;  %3065 = vmatpush.bf16.msrb.mxu0 %v3015_v48  ;;  %v2984_v32 = vsub.f32 %v2972_v24, %v5431_v36  ;;  %v2699_v36 = vld [vmem:[%s5397_s8] sm:$0xff] }
 0xfb2   :  { %v2975_v0 = vmul.f32 2.0, %v2962_v50  ;;  %v3032_v17 = vunpack.c.h.b16 %v2699_v36 }
 0xfb3   :  { %v2992_v29 = vpack.c.bf16 %v2985_v35, %v2984_v32 }
 0xfb4   :  { %v2889_v42 = vpop.f32.mrf.mxu2  ;;  %v2913_v1 = vpop.f32.mrf.mxu3  ;;  %v2987_v18 = vsub.f32 %v2975_v0, %v5434_v40  ;;  %v3034_v40 = vpack.c.b16 %v3032_v17, %v3032_v17 }
 0xfb5   :  { %v2914_v37 = vadd.f32 %v2913_v1, %v2889_v42  ;;  %3040 = vmatpush.bf16.msra.mxu2 %v3012_v11  ;;  %3066 = vmatpush.bf16.msrb.mxu0 %v3013_v63  ;;  %v3008_v47 = vunpack.c.l.b16 %v2992_v29 }
 0xfb7   :  { %v2974_v9 = vmul.f32 2.0, %v2914_v37 }
 0xfb9   :  { %v2986_v7 = vsub.f32 %v2974_v9, %v5433_v44  ;;  %3041 = vmatpush.bf16.msra.mxu2 %v5341_v55  ;;  %3067 = vmatpush.bf16.msrb.mxu0 %v5343_v61  ;;  %v3031_v55 = vunpack.c.l.b16 %v2699_v36 }
 0xfbb   :  { %v2993_v16 = vpack.c.bf16 %v2987_v18, %v2986_v7  ;;  %v3033_v61 = vpack.c.b16 %v3031_v55, %v3031_v55 }
 0xfbd   :  { %v3010_v33 = vunpack.c.l.b16 %v2993_v16  ;;  %3042 = vmatpush.bf16.msra.mxu2 %v5333_v6  ;;  %3068 = vmatpush.bf16.msrb.mxu0 %v5335_v53  ;;  %v3011_v44 = vunpack.c.h.b16 %v2993_v16  ;;  %v3009_v6 = vunpack.c.h.b16 %v2992_v29 }
 0xfbf   :  { %v3016_v56 = vpack.c.b16 %v3010_v33, %v3008_v47  ;;  %v3017_v53 = vpack.c.b16 %v3011_v44, %v3009_v6 }
 0xfc1   :  { %3043 = vmatpush.bf16.msra.mxu2 %v5325_v4  ;;  %3059 = vmatpush.bf16.msra.mxu3 %v3016_v56 }
 0xfc2   :  { %3069 = vmatpush.bf16.msrb.mxu0 %v5327_v30  ;;  %v3028_v30 = vpop.permute.xlu1 %3027 }
 0xfc4   :  { %3817 = vmatmul.msk.bf16.vlgmr.msra.gmra.mxu3 %vm1652_vm15, %v3034_v40 }
 0xfc5   :  { %3044 = vmatpush.bf16.msra.mxu2 %v5317_v5 }
 0xfc6   :  { %3070 = vmatpush.bf16.msrb.mxu0 %v5319_v27 }
 0xfc9   :  { %3045 = vmatpush.bf16.msra.mxu2 %v5305_v43 }
 0xfca   :  { %3071 = vmatpush.bf16.msrb.mxu0 %v5307_v39 }
 0xfcd   :  { %3046 = vmatpush.bf16.msra.mxu2 %v5285_v20 }
 0xfce   :  { %3072 = vmatpush.bf16.msrb.mxu0 %v5287_v3 }
 0xfd0   :  { %3047 = vmatmul.bf16.vlgmr.msra.gmra.mxu2 %v3033_v61 }
 0xfd1   :  { %3085 = vmatpush.bf16.msrb.mxu2 %v3017_v53  ;;  %3073 = vmatmul.bf16.vlgmr.msrb.gmra.mxu0 %v3033_v61 }
 0xfe0   :  { %3818 = vmatmul.msk.bf16.vlgmr.msrb.gmra.mxu2 %vm1652_vm15, %v3034_v40 }
0x1047   :  { %v3061_v5 = vpop.f32.mrf.mxu3 }
0x104e   :  { %v3074_v27 = vpop.f32.mrf.mxu0 }
0x104f   :  { %v3063_v4 = vpop.f32.mrf.mxu3  ;;  %v3075_v39 = vadd.f32 %v3074_v27, %v3028_v30 }
0x1053   :  { %v3048_v45 = vpop.f32.mrf.mxu2 }
0x1054   :  { %v3049_v43 = vadd.f32 %v3048_v45, %v3028_v30 }
0x1056   :  { %v3062_v57 = vadd.f32 %v3061_v5, %v3049_v43  ;;  %v3076_v10 = vpop.f32.mrf.mxu0 }
0x1058   :  { %3091 = vst [vmem:[%s5398_s14] sm:$0xff] %v3062_v57 }
0x105b   :  { %v3050_v20 = vpop.f32.mrf.mxu2 }
0x1063   :  { %v3087_v3 = vpop.f32.mrf.mxu2 }
0x1064   :  { %v3088_v28 = vadd.f32 %v3087_v3, %v3075_v39 }
0x1066   :  { %3092 = vst [vmem:[%s5398_s14 + $0x8] sm:$0xff] %v3088_v28 }
0x106b   :  { %v3089_v49 = vpop.f32.mrf.mxu2 }

</bundles_post_ra>
